<compile_context>
chip_gen: v6e
topology: v6e:2x2x1
jax: 0.10.0
libtpu: 0.0.40
codegen_flags: <defaults>
</compile_context>

<pallas_src>
import functools

import numpy as np
import jax
import jax.numpy as jnp
from jax import lax
from jax.experimental import pallas as pl
from jax.experimental.pallas import tpu as pltpu


def _round_up(v, m):
    return ((v + m - 1) // m) * m


def _cp(semantics, vmem_mb=48):
    return pltpu.CompilerParams(dimension_semantics=semantics,
                                vmem_limit_bytes=vmem_mb * 1024 * 1024)


def _leaky(x):
    return jnp.where(x >= 0.0, x, 0.01 * x)


# ----------------------------------------------------------------------------
# Kernels
# ----------------------------------------------------------------------------

def _embed1_kernel(x_ref, w1_ref, sh1_ref, w2_ref, sh2_ref, o_ref):
    """Fused embed1_1 -> embed1_2 (two matmuls, LeakyReLU), bf16 output."""
    h = jnp.dot(x_ref[...].astype(jnp.bfloat16), w1_ref[...],
                preferred_element_type=jnp.float32) + sh1_ref[...]
    h = _leaky(h)
    h = jnp.dot(h.astype(jnp.bfloat16), w2_ref[...],
                preferred_element_type=jnp.float32) + sh2_ref[...]
    o_ref[...] = _leaky(h).astype(o_ref.dtype)


def embed1_apply(x2d, fp, tm=1024):
    M, cin = x2d.shape
    Ep = fp["e1_w1"].shape[1]
    TM = min(tm, _round_up(M, 8))
    return pl.pallas_call(
        _embed1_kernel,
        out_shape=jax.ShapeDtypeStruct((M, Ep), jnp.bfloat16),
        grid=(pl.cdiv(M, TM),),
        in_specs=[
            pl.BlockSpec((TM, cin), lambda i: (i, 0)),
            pl.BlockSpec((cin, Ep), lambda i: (0, 0)),
            pl.BlockSpec((1, Ep), lambda i: (0, 0)),
            pl.BlockSpec((Ep, Ep), lambda i: (0, 0)),
            pl.BlockSpec((1, Ep), lambda i: (0, 0)),
        ],
        out_specs=pl.BlockSpec((TM, Ep), lambda i: (i, 0)),
        compiler_params=_cp(("parallel",)),
    )(x2d, fp["e1_w1"], fp["e1_sh1"], fp["e1_w2"], fp["e1_sh2"])


def _knn_kernel(xq_ref, xf_ref, idx_ref, *, k):
    """Fused pairwise sq-distance (bf16 MXU) + iterative top-k (smallest)."""
    xq = xq_ref[0]                                   # (TN, Ep) bf16
    xf = xf_ref[0]                                   # (N,  Ep) bf16
    n = xf.shape[0]
    inner = lax.dot_general(xq, xf, (((1,), (1,)), ((), ())),
                            preferred_element_type=jnp.float32)       # (TN, N)
    xq32 = xq.astype(jnp.float32)
    xf32 = xf.astype(jnp.float32)
    sqq = jnp.sum(xq32 * xq32, axis=1, keepdims=True)                 # (TN, 1)
    sqf = lax.dot_general(jnp.ones((1, xf.shape[1]), jnp.float32), xf32 * xf32,
                          (((1,), (1,)), ((), ())),
                          preferred_element_type=jnp.float32)         # (1, N)
    dist = sqq + sqf - 2.0 * inner                                    # (TN, N)

    col_f = lax.broadcasted_iota(jnp.int32, dist.shape, 1).astype(jnp.float32)
    kcol = lax.broadcasted_iota(jnp.int32, (dist.shape[0], k), 1)
    big = jnp.float32(1e30)

    def body(j, carry):
        d, acc = carry
        m = jnp.min(d, axis=1, keepdims=True)
        sel = jnp.where(d <= m, col_f, jnp.float32(n))
        amin_f = jnp.min(sel, axis=1, keepdims=True)                  # (TN, 1)
        d = jnp.where(col_f == amin_f, big, d)
        acc = jnp.where(kcol == j, amin_f.astype(jnp.int32), acc)
        return d, acc

    acc0 = jnp.zeros((dist.shape[0], k), jnp.int32)
    _, acc = lax.fori_loop(0, k, body, (dist, acc0))
    idx_ref[0] = acc


def knn_indices(h, k, tn=128):
    B, N, Ep = h.shape
    TN = min(tn, _round_up(N, 8))
    return pl.pallas_call(
        functools.partial(_knn_kernel, k=k),
        out_shape=jax.ShapeDtypeStruct((B, N, k), jnp.int32),
        grid=(B, pl.cdiv(N, TN)),
        in_specs=[
            pl.BlockSpec((1, TN, Ep), lambda b, t: (b, t, 0)),
            pl.BlockSpec((1, N, Ep), lambda b, t: (b, 0, 0)),
        ],
        out_specs=pl.BlockSpec((1, TN, k), lambda b, t: (b, t, 0)),
        compiler_params=_cp(("parallel", "parallel")),
    )(h, h)


def _neigh_kernel(g_ref, c_ref, wd_ref, wc_ref, w2_ref, sh1_ref, sh2_ref, o_ref):
    """Fused neighbor embedding: concat-free embed2_1 -> embed2_2 -> max over K.

    concat([x_j - x_i, x_i]) @ W1 == x_j @ Wd + x_i @ (Wc - Wd); Wc-Wd folded
    host-side; intermediates stay in VMEM, only (TN, Cp) is emitted.
    """
    tn, kk, ep = g_ref.shape[1], g_ref.shape[2], g_ref.shape[3]
    cp = wd_ref.shape[1]
    g = g_ref[0].reshape(tn * kk, ep)                                  # bf16
    c = c_ref[0]                                                       # (tn, ep) bf16
    h1 = jnp.dot(g, wd_ref[...], preferred_element_type=jnp.float32)
    h1 = h1.reshape(tn, kk, cp)
    hc = jnp.dot(c, wc_ref[...], preferred_element_type=jnp.float32) + sh1_ref[...]
    h1 = _leaky(h1 + hc[:, None, :])
    h2 = jnp.dot(h1.reshape(tn * kk, cp).astype(jnp.bfloat16), w2_ref[...],
                 preferred_element_type=jnp.float32) + sh2_ref[...]
    h2 = _leaky(h2).reshape(tn, kk, cp)
    o_ref[0] = jnp.max(h2, axis=1).astype(o_ref.dtype)


def neighbor_embed(grouped, h, fp, tn=64):
    B, N, K, Ep = grouped.shape
    Cp = fp["e2_wd"].shape[1]
    TN = min(tn, _round_up(N, 8))
    return pl.pallas_call(
        _neigh_kernel,
        out_shape=jax.ShapeDtypeStruct((B, N, Cp), jnp.bfloat16),
        grid=(B, pl.cdiv(N, TN)),
        in_specs=[
            pl.BlockSpec((1, TN, K, Ep), lambda b, t: (b, t, 0, 0)),
            pl.BlockSpec((1, TN, Ep), lambda b, t: (b, t, 0)),
            pl.BlockSpec((Ep, Cp), lambda b, t: (0, 0)),
            pl.BlockSpec((Ep, Cp), lambda b, t: (0, 0)),
            pl.BlockSpec((Cp, Cp), lambda b, t: (0, 0)),
            pl.BlockSpec((1, Cp), lambda b, t: (0, 0)),
            pl.BlockSpec((1, Cp), lambda b, t: (0, 0)),
        ],
        out_specs=pl.BlockSpec((1, TN, Cp), lambda b, t: (b, t, 0)),
        compiler_params=_cp(("parallel", "parallel")),
    )(grouped, h, fp["e2_wd"], fp["e2_wc"], fp["e2_w2"], fp["e2_sh1"], fp["e2_sh2"])


def _oa_kernel(x_ref, wqk_ref, wv_ref, wp_ref, shift_ref, o_ref):
    """Offset-Attention for one batch element (x: (N, Cp) bf16).

    energy[i,j] = x_i Wq Wk^T x_j ; softmax over the query axis (== dim=1 of
    the (B,N,N) tensor, matching nn.Softmax(dim=1)), then L1-renormalized over
    keys; projection has BN scale folded into Wp; residual add.
    """
    xb = x_ref[0]                                                        # (N, Cp) bf16
    qk = jnp.dot(xb, wqk_ref[...], preferred_element_type=jnp.float32)   # (N, Cp)
    energy = lax.dot_general(qk.astype(jnp.bfloat16), xb,
                             (((1,), (1,)), ((), ())),
                             preferred_element_type=jnp.float32)         # (N, N)
    v = jnp.dot(xb, wv_ref[...], preferred_element_type=jnp.float32)     # (N, Cp)

    e = energy - jnp.max(energy, axis=0, keepdims=True)
    ex = jnp.exp(e)
    attn = ex * pl.reciprocal(jnp.sum(ex, axis=0, keepdims=True), approx=True)
    attn = attn * pl.reciprocal(1e-9 + jnp.sum(attn, axis=1, keepdims=True),
                                approx=True)
    x_r = jnp.dot(attn.astype(jnp.bfloat16), v.astype(jnp.bfloat16),
                  preferred_element_type=jnp.float32)                    # (N, Cp)
    d = (xb.astype(jnp.float32) - x_r).astype(jnp.bfloat16)
    pj = jnp.dot(d, wp_ref[...], preferred_element_type=jnp.float32) + shift_ref[...]
    pj = _leaky(pj)
    o_ref[0] = (pj + xb.astype(jnp.float32)).astype(o_ref.dtype)


def oa_apply(x, p):
    B, N, Cp = x.shape
    return pl.pallas_call(
        _oa_kernel,
        out_shape=jax.ShapeDtypeStruct((B, N, Cp), jnp.bfloat16),
        grid=(B,),
        in_specs=[
            pl.BlockSpec((1, N, Cp), lambda b: (b, 0, 0)),
            pl.BlockSpec((Cp, Cp), lambda b: (0, 0)),
            pl.BlockSpec((Cp, Cp), lambda b: (0, 0)),
            pl.BlockSpec((Cp, Cp), lambda b: (0, 0)),
            pl.BlockSpec((1, Cp), lambda b: (0, 0)),
        ],
        out_specs=pl.BlockSpec((1, N, Cp), lambda b: (b, 0, 0)),
        compiler_params=_cp(("parallel",)),
    )(x, p["wqk"], p["wv"], p["wp"], p["shift"])


def _enc4_kernel(x1_ref, x2_ref, x3_ref, x4_ref,
                 w1_ref, w2_ref, w3_ref, w4_ref, sh_ref,
                 o_ref, gmax_ref, gmean_ref, *, n_points):
    """enc_lbr1 fused with the (oa1..oa4) concat (4 matmuls) + global max/mean
    epilogue (resident output accumulators over the 'arbitrary' N-tile axis)."""
    t = pl.program_id(1)
    acc = jnp.dot(x1_ref[0], w1_ref[...], preferred_element_type=jnp.float32)
    acc += jnp.dot(x2_ref[0], w2_ref[...], preferred_element_type=jnp.float32)
    acc += jnp.dot(x3_ref[0], w3_ref[...], preferred_element_type=jnp.float32)
    acc += jnp.dot(x4_ref[0], w4_ref[...], preferred_element_type=jnp.float32)
    acc = _leaky(acc + sh_ref[...])                                     # (TN, Gp) f32
    o_ref[0] = acc.astype(o_ref.dtype)

    tn = acc.shape[0]
    row = lax.broadcasted_iota(jnp.int32, acc.shape, 0) + t * tn
    valid = row < n_points                                              # mask ragged tail
    mx = jnp.max(jnp.where(valid, acc, -jnp.inf), axis=0, keepdims=True)
    sm = jnp.sum(jnp.where(valid, acc, 0.0), axis=0, keepdims=True)

    @pl.when(t == 0)
    def _():
        gmax_ref[0] = mx
        gmean_ref[0] = sm

    @pl.when(t > 0)
    def _():
        gmax_ref[0] = jnp.maximum(gmax_ref[0], mx)
        gmean_ref[0] = gmean_ref[0] + sm

    @pl.when(t == pl.num_programs(1) - 1)
    def _():
        gmean_ref[0] = gmean_ref[0] * (1.0 / n_points)


def enc4_apply(oas, fp, tn=512):
    B, N, Cp = oas[0].shape
    Gp = fp["enc_ws"][0].shape[1]
    TN = min(tn, _round_up(N, 8))
    return pl.pallas_call(
        functools.partial(_enc4_kernel, n_points=N),
        out_shape=(jax.ShapeDtypeStruct((B, N, Gp), jnp.bfloat16),
                   jax.ShapeDtypeStruct((B, 1, Gp), jnp.float32),
                   jax.ShapeDtypeStruct((B, 1, Gp), jnp.float32)),
        grid=(B, pl.cdiv(N, TN)),
        in_specs=[pl.BlockSpec((1, TN, Cp), lambda b, t: (b, t, 0))] * 4
                 + [pl.BlockSpec((Cp, Gp), lambda b, t: (0, 0))] * 4
                 + [pl.BlockSpec((1, Gp), lambda b, t: (0, 0))],
        out_specs=(pl.BlockSpec((1, TN, Gp), lambda b, t: (b, t, 0)),
                   pl.BlockSpec((1, 1, Gp), lambda b, t: (b, 0, 0)),
                   pl.BlockSpec((1, 1, Gp), lambda b, t: (b, 0, 0))),
        compiler_params=_cp(("parallel", "arbitrary")),
    )(*oas, *fp["enc_ws"], fp["enc_shift"])


def _head_kernel(x_ref, gsh_ref, w1_ref, w2_ref, sh2_ref, wl_ref, bl_ref, o_ref):
    """Fused segmentation head: lbrd1 (per-batch gf term) -> lbrd2 -> final linear.
    gsh already contains gf @ W1[gf rows] + shift1; output lane-padded to 128."""
    x = x_ref[0]                                                         # (TN, Gp) bf16
    h1 = jnp.dot(x, w1_ref[...], preferred_element_type=jnp.float32) + gsh_ref[0]
    h1 = _leaky(h1)                                # Dropout(0.5): eval identity
    h2 = jnp.dot(h1.astype(jnp.bfloat16), w2_ref[...],
                 preferred_element_type=jnp.float32) + sh2_ref[...]
    h2 = _leaky(h2)
    o_ref[0] = jnp.dot(h2.astype(jnp.bfloat16), wl_ref[...],
                       preferred_element_type=jnp.float32) + bl_ref[...]


def head_apply(enc, gf_shift, fp, tn=512):
    B, N, Gp = enc.shape
    E2p = fp["w2"].shape[1]
    NSp = fp["wl"].shape[1]
    TN = min(tn, _round_up(N, 8))
    return pl.pallas_call(
        _head_kernel,
        out_shape=jax.ShapeDtypeStruct((B, N, NSp), jnp.float32),
        grid=(B, pl.cdiv(N, TN)),
        in_specs=[
            pl.BlockSpec((1, TN, Gp), lambda b, t: (b, t, 0)),
            pl.BlockSpec((1, 1, E2p), lambda b, t: (b, 0, 0)),
            pl.BlockSpec((Gp, E2p), lambda b, t: (0, 0)),
            pl.BlockSpec((E2p, E2p), lambda b, t: (0, 0)),
            pl.BlockSpec((1, E2p), lambda b, t: (0, 0)),
            pl.BlockSpec((E2p, NSp), lambda b, t: (0, 0)),
            pl.BlockSpec((1, NSp), lambda b, t: (0, 0)),
        ],
        out_specs=pl.BlockSpec((1, TN, NSp), lambda b, t: (b, t, 0)),
        compiler_params=_cp(("parallel", "parallel")),
    )(enc, gf_shift, fp["w1_enc"], fp["w2"], fp["shift2"], fp["wl"], fp["bl"])


# ----------------------------------------------------------------------------
# Parameters (deterministic synthetic init; eval-mode BN folded to scale/shift)
# ----------------------------------------------------------------------------

def _lbrd_init(key, cin, cout):
    ks = jax.random.split(key, 5)
    w = jax.random.normal(ks[0], (cin, cout), jnp.float32) / np.sqrt(cin)
    gamma = 1.0 + 0.1 * jax.random.normal(ks[1], (cout,), jnp.float32)
    beta = 0.1 * jax.random.normal(ks[2], (cout,), jnp.float32)
    rmean = 0.1 * jax.random.normal(ks[3], (cout,), jnp.float32)
    rvar = 1.0 + 0.1 * jnp.abs(jax.random.normal(ks[4], (cout,), jnp.float32))
    scale = gamma / jnp.sqrt(rvar + 1e-5)
    shift = beta - rmean * scale
    return {"w": w, "scale": scale, "shift": shift}


def _oa_init(key, cin, cout):
    ks = jax.random.split(key, 4)
    return {
        "wq": jax.random.normal(ks[0], (cin, cout), jnp.float32) / np.sqrt(cin),
        "wk": jax.random.normal(ks[1], (cin, cout), jnp.float32) / np.sqrt(cin),
        "wv": jax.random.normal(ks[2], (cin, cin), jnp.float32) / np.sqrt(cin),
        "proj": _lbrd_init(ks[3], cin, cin),
    }


def init_params(key, dim_in, dim_embed, global_feat, dim_cat, num_seg,
                num_categories=2):
    E, E2, G, DC = dim_embed, 2 * dim_embed, global_feat, dim_cat
    ks = jax.random.split(key, 16)
    return {
        "embed1_1": _lbrd_init(ks[0], dim_in, E),
        "embed1_2": _lbrd_init(ks[1], E, E),
        "embed2_1": _lbrd_init(ks[2], E2, E2),
        "embed2_2": _lbrd_init(ks[3], E2, E2),
        "oa1": _oa_init(ks[4], E2, E // 4),
        "oa2": _oa_init(ks[5], E2, E // 4),
        "oa3": _oa_init(ks[6], E2, E // 4),
        "oa4": _oa_init(ks[7], E2, E // 4),
        "enc_lbr1": _lbrd_init(ks[8], 8 * E, G),
        "cat_table": 0.1 * jax.random.normal(ks[9], (num_categories, DC), jnp.float32),
        "embed_conv_w": jax.random.normal(ks[10], (DC, DC), jnp.float32) / np.sqrt(DC),
        "embed_conv_b": 0.1 * jax.random.normal(ks[11], (DC,), jnp.float32),
        "lbrd1": _lbrd_init(ks[12], 3 * G + DC, E2),
        "lbrd2": _lbrd_init(ks[13], E2, E2),
        "linear_w": jax.random.normal(ks[14], (E2, num_seg), jnp.float32) / np.sqrt(E2),
        "linear_b": 0.1 * jax.random.normal(ks[15], (num_seg,), jnp.float32),
    }


def _pad2(w, rows, cols, dtype=jnp.bfloat16):
    out = jnp.zeros((rows, cols), jnp.float32).at[:w.shape[0], :w.shape[1]].set(w)
    return out.astype(dtype)


def _pad_shift(s, cols):
    return jnp.zeros((1, cols), jnp.float32).at[0, :s.shape[0]].set(s)


def fold_params(p):
    """Host-side folds: BN scale into weights, Wq·Wkᵀ, embed2_1 concat split,
    lbrd1 gf-row split, lane padding of every channel axis to a multiple of
    128 (zero rows/cols + zero shifts), bf16 weight storage."""
    E = p["embed1_1"]["w"].shape[1]
    C = 2 * E
    G = p["enc_lbr1"]["w"].shape[1]
    E2 = p["lbrd2"]["w"].shape[1]
    DC = p["cat_table"].shape[1]
    num_seg = int(p["linear_w"].shape[1])

    Ep = _round_up(E, 128)
    Cp = _round_up(C, 128)
    Gp = _round_up(G, 128)
    E2p = _round_up(E2, 128)
    NSp = _round_up(num_seg, 128)

    def scaled(d):
        return d["w"] * d["scale"][None, :]

    w11, w12 = scaled(p["embed1_1"]), scaled(p["embed1_2"])
    w21, w22 = scaled(p["embed2_1"]), scaled(p["embed2_2"])
    wd = w21[:E]                       # rows acting on (x_j - x_i)
    wc = w21[E:] - w21[:E]             # concat-elimination fold

    def oa(d):
        # TODO(synk): on v5e (128-deep MXU) keep the low-rank q/k path when C > 128.
        wqk = jnp.dot(d["wq"], d["wk"].T)                     # (C, C)
        wp = d["proj"]["w"] * d["proj"]["scale"][None, :]
        return {"wqk": _pad2(wqk, Cp, Cp), "wv": _pad2(d["wv"], Cp, Cp),
                "wp": _pad2(wp, Cp, Cp),
                "shift": _pad_shift(d["proj"]["shift"], Cp)}

    enc_w = scaled(p["enc_lbr1"])                             # (4C, G)
    enc_ws = tuple(_pad2(enc_w[i * C:(i + 1) * C], Cp, Gp) for i in range(4))

    w1 = scaled(p["lbrd1"])                                   # (3G+DC, E2)
    # gf rows laid out for (gfmax[0:Gp] | gfmean[Gp:2Gp] | cat) padded inputs.
    w1_gf = jnp.zeros((2 * Gp + DC, E2p), jnp.float32)
    w1_gf = w1_gf.at[0:G, :E2].set(w1[G:2 * G])
    w1_gf = w1_gf.at[Gp:Gp + G, :E2].set(w1[2 * G:3 * G])
    w1_gf = w1_gf.at[2 * Gp:2 * Gp + DC, :E2].set(w1[3 * G:])

    fp = {
        "e1_w1": _pad2(w11, w11.shape[0], Ep),
        "e1_sh1": _pad_shift(p["embed1_1"]["shift"], Ep),
        "e1_w2": _pad2(w12, Ep, Ep),
        "e1_sh2": _pad_shift(p["embed1_2"]["shift"], Ep),
        "e2_wd": _pad2(wd, Ep, Cp),
        "e2_wc": _pad2(wc, Ep, Cp),
        "e2_sh1": _pad_shift(p["embed2_1"]["shift"], Cp),
        "e2_w2": _pad2(w22, Cp, Cp),
        "e2_sh2": _pad_shift(p["embed2_2"]["shift"], Cp),
        "oa1": oa(p["oa1"]), "oa2": oa(p["oa2"]),
        "oa3": oa(p["oa3"]), "oa4": oa(p["oa4"]),
        "enc_ws": enc_ws,
        "enc_shift": _pad_shift(p["enc_lbr1"]["shift"], Gp),
        "cat_table": p["cat_table"],
        "embed_conv_w": p["embed_conv_w"], "embed_conv_b": p["embed_conv_b"],
        "w1_enc": _pad2(w1[:G], Gp, E2p),
        "w1_gf": w1_gf,
        "shift1": jnp.zeros((E2p,), jnp.float32).at[:E2].set(p["lbrd1"]["shift"]),
        "w2": _pad2(scaled(p["lbrd2"]), E2p, E2p),
        "shift2": _pad_shift(p["lbrd2"]["shift"], E2p),
        "wl": _pad2(p["linear_w"], E2p, NSp),
        "bl": _pad_shift(p["linear_b"], NSp),
    }
    return fp, num_seg


# ----------------------------------------------------------------------------
# Forward pass (inference semantics: BN uses running stats, Dropout = identity)
# ----------------------------------------------------------------------------

@functools.partial(jax.jit, static_argnums=(3, 4))
def pct_segmentation_forward(fp, x, category, knn_k, num_seg):
    B, N, _ = x.shape

    # ---- NeighborEmbedding ----
    h = embed1_apply(x.reshape(B * N, -1), fp).reshape(B, N, -1)      # (B, N, Ep) bf16
    # TODO(synk): kdneighGPU assumed = feature-space k-NN + concat([x_j-x_i, x_i]).
    idx = knn_indices(h, knn_k)                                       # (B, N, K) int32
    grouped = jax.vmap(lambda hb, ib: hb[ib])(h, idx)                 # (B, N, K, Ep) bf16
    x_emb = neighbor_embed(grouped, h, fp)                            # (B, N, Cp) bf16

    # ---- Offset-attention stack ----
    oa1 = oa_apply(x_emb, fp["oa1"])
    oa2 = oa_apply(oa1, fp["oa2"])
    oa3 = oa_apply(oa2, fp["oa3"])
    oa4 = oa_apply(oa3, fp["oa4"])
    enc, gfmax, gfmean = enc4_apply((oa1, oa2, oa3, oa4), fp)         # (B,N,Gp) bf16

    # ---- Segmentation head ----
    cat_emb = fp["cat_table"][category] @ fp["embed_conv_w"] + fp["embed_conv_b"]
    gf = jnp.concatenate([gfmax[:, 0, :], gfmean[:, 0, :], cat_emb], axis=1)
    # Per-batch additive term = gf @ W1[gf rows] + shift1 (replaces broadcast+concat).
    gf_shift = (gf @ fp["w1_gf"] + fp["shift1"])[:, None, :]          # (B, 1, E2p)
    out = head_apply(enc, gf_shift, fp)                               # (B, N, NSpad)
    return out[..., :num_seg]


# ----------------------------------------------------------------------------
# Demo
# ----------------------------------------------------------------------------

if __name__ == "__main__":
    B, N = 2, 64
    DIM_IN, DIM_EMBED, GLOBAL_FEAT, DIM_CAT = 3, 32, 128, 16
    NUM_SEG, KNN = 16, 8

    key = jax.random.PRNGKey(0)
    kp, kx = jax.random.split(key)
    raw_params = init_params(kp, DIM_IN, DIM_EMBED, GLOBAL_FEAT, DIM_CAT, NUM_SEG)
    params, num_seg = fold_params(raw_params)

    x = jax.random.normal(kx, (B, N, DIM_IN), jnp.float32)   # point cloud (B, N, 3)
    category = jnp.array([0, 1], dtype=jnp.int32)             # object class per cloud

    out = pct_segmentation_forward(params, x, category, KNN, num_seg)
    jax.block_until_ready(out)
    assert out.shape == (B, N, NUM_SEG), out.shape
    assert jnp.all(jnp.isfinite(out))
    print("KERNEL_OK")
</pallas_src>

<mosaic_0001>
module attributes {stable_mosaic.version = 11 : i64} {
  func.func @_knn_kernel(%arg0: i32, %arg1: i32, %arg2: memref<1x64x128xbf16, #tpu.memory_space<vmem>>, %arg3: memref<1x64x128xbf16, #tpu.memory_space<vmem>>, %arg4: memref<1x64x8xi32, #tpu.memory_space<vmem>>) attributes {dimension_semantics = [#tpu.dimension_semantics<parallel>, #tpu.dimension_semantics<parallel>], iteration_bounds = array<i64: 2, 1>, scalar_prefetch = 0 : i64, scratch_operands = 0 : i64, tpu.core_type = #tpu.core_type<tc>, window_params = [{transform_indices = @transform_0, window_bounds = array<i64: 1, 64, 128>}, {transform_indices = @transform_1, window_bounds = array<i64: 1, 64, 128>}, {transform_indices = @transform_2, window_bounds = array<i64: 1, 64, 8>}]} {
    %c0 = arith.constant 0 : index
    %c0_0 = arith.constant 0 : index
    %c0_1 = arith.constant 0 : index
    %0 = vector.load %arg2[%c0, %c0_0, %c0_1] : memref<1x64x128xbf16, #tpu.memory_space<vmem>>, vector<1x64x128xbf16>
    %1 = vector.shape_cast %0 : vector<1x64x128xbf16> to vector<64x128xbf16>
    %c0_2 = arith.constant 0 : index
    %c0_3 = arith.constant 0 : index
    %c0_4 = arith.constant 0 : index
    %2 = vector.load %arg3[%c0_2, %c0_3, %c0_4] : memref<1x64x128xbf16, #tpu.memory_space<vmem>>, vector<1x64x128xbf16>
    %3 = vector.shape_cast %2 : vector<1x64x128xbf16> to vector<64x128xbf16>
    %cst = arith.constant dense<0.000000e+00> : vector<64x64xf32>
    %4 = tpu.matmul %1, %3, %cst {dimension_numbers = #tpu.dot_dimension_numbers<[1], [1], [0], [0], [0, 0, 1, 0], [], []>} : vector<64x128xbf16>, vector<64x128xbf16>, vector<64x64xf32> -> vector<64x64xf32>
    %5 = arith.extf %1 : vector<64x128xbf16> to vector<64x128xf32>
    %6 = arith.extf %3 : vector<64x128xbf16> to vector<64x128xf32>
    %7 = arith.mulf %5, %5 : vector<64x128xf32>
    %cst_5 = arith.constant dense<0.000000e+00> : vector<64xf32>
    %8 = vector.multi_reduction <add>, %7, %cst_5 [1] : vector<64x128xf32> to vector<64xf32>
    %9 = vector.shape_cast %8 : vector<64xf32> to vector<64x1xf32>
    %cst_6 = arith.constant 1.000000e+00 : f32
    %10 = vector.broadcast %cst_6 : f32 to vector<1x128xf32>
    %11 = arith.mulf %6, %6 : vector<64x128xf32>
    %cst_7 = arith.constant dense<0.000000e+00> : vector<1x64xf32>
    %12 = tpu.matmul %10, %11, %cst_7 {dimension_numbers = #tpu.dot_dimension_numbers<[1], [1], [0], [0], [0, 0, 1, 0], [], []>} : vector<1x128xf32>, vector<64x128xf32>, vector<1x64xf32> -> vector<1x64xf32>
    %13 = vector.broadcast %9 : vector<64x1xf32> to vector<64x64xf32>
    %14 = vector.broadcast %12 : vector<1x64xf32> to vector<64x64xf32>
    %15 = arith.addf %13, %14 : vector<64x64xf32>
    %cst_8 = arith.constant 2.000000e+00 : f32
    %16 = vector.broadcast %cst_8 : f32 to vector<64x64xf32>
    %17 = arith.mulf %16, %4 : vector<64x64xf32>
    %18 = arith.subf %15, %17 : vector<64x64xf32>
    %19 = tpu.iota {dimensions = array<i32: 1>} : vector<64x64xi32>
    %20 = arith.sitofp %19 : vector<64x64xi32> to vector<64x64xf32>
    %21 = tpu.iota {dimensions = array<i32: 1>} : vector<64x8xi32>
    %c0_i32 = arith.constant 0 : i32
    %22 = vector.broadcast %c0_i32 : i32 to vector<64x8xi32>
    %cst_9 = arith.constant 1.000000e+30 : f32
    %c0_i32_10 = arith.constant 0 : i32
    %c8_i32 = arith.constant 8 : i32
    %23 = arith.addi %c0_i32_10, %c8_i32 : i32
    %c1_i32 = arith.constant 1 : i32
    %24:2 = scf.for %arg5 = %c0_i32_10 to %23 step %c1_i32 iter_args(%arg6 = %18, %arg7 = %22) -> (vector<64x64xf32>, vector<64x8xi32>)  : i32 {
      %cst_15 = arith.constant dense<0x7F800000> : vector<64xf32>
      %28 = vector.multi_reduction <minimumf>, %arg6, %cst_15 [1] : vector<64x64xf32> to vector<64xf32>
      %29 = vector.shape_cast %28 : vector<64xf32> to vector<64x1xf32>
      %30 = vector.broadcast %29 : vector<64x1xf32> to vector<64x64xf32>
      %31 = arith.cmpf ole, %arg6, %30 : vector<64x64xf32>
      %cst_16 = arith.constant 6.400000e+01 : f32
      %32 = vector.broadcast %cst_16 : f32 to vector<64x64xf32>
      %33 = arith.select %31, %20, %32 : vector<64x64xi1>, vector<64x64xf32>
      %cst_17 = arith.constant dense<0x7F800000> : vector<64xf32>
      %34 = vector.multi_reduction <minimumf>, %33, %cst_17 [1] : vector<64x64xf32> to vector<64xf32>
      %35 = vector.shape_cast %34 : vector<64xf32> to vector<64x1xf32>
      %36 = vector.broadcast %35 : vector<64x1xf32> to vector<64x64xf32>
      %37 = arith.cmpf oeq, %20, %36 : vector<64x64xf32>
      %38 = vector.broadcast %cst_9 : f32 to vector<64x64xf32>
      %39 = arith.select %37, %38, %arg6 : vector<64x64xi1>, vector<64x64xf32>
      %40 = vector.broadcast %arg5 : i32 to vector<64x8xi32>
      %41 = arith.cmpi eq, %21, %40 : vector<64x8xi32>
      %42 = arith.fptosi %35 : vector<64x1xf32> to vector<64x1xi32>
      %43 = vector.shape_cast %42 : vector<64x1xi32> to vector<64x1xi32>
      %44 = vector.broadcast %43 : vector<64x1xi32> to vector<64x8xi32>
      %45 = arith.select %41, %44, %arg7 : vector<64x8xi1>, vector<64x8xi32>
      scf.yield %39, %45 : vector<64x64xf32>, vector<64x8xi32>
    }
    %c8_i32_11 = arith.constant 8 : i32
    %c0_12 = arith.constant 0 : index
    %c0_13 = arith.constant 0 : index
    %c0_14 = arith.constant 0 : index
    %25 = vector.load %arg4[%c0_12, %c0_13, %c0_14] : memref<1x64x8xi32, #tpu.memory_space<vmem>>, vector<1x64x8xi32>
    %26 = vector.shape_cast %25 : vector<1x64x8xi32> to vector<64x8xi32>
    %27 = vector.shape_cast %24#1 : vector<64x8xi32> to vector<1x64x8xi32>
    tpu.vector_store %arg4[%c0_12, %c0_13, %c0_14], %27 {strides = array<i32>} : memref<1x64x8xi32, #tpu.memory_space<vmem>>, vector<1x64x8xi32>,
    return
  }
  func.func @transform_0(%arg0: i32, %arg1: i32) -> (i32, i32, i32) {
    %c0_i32 = arith.constant 0 : i32
    %c0_i32_0 = arith.constant 0 : i32
    return %arg0, %arg1, %c0_i32 : i32, i32, i32
  }
  func.func @transform_1(%arg0: i32, %arg1: i32) -> (i32, i32, i32) {
    %c0_i32 = arith.constant 0 : i32
    %c0_i32_0 = arith.constant 0 : i32
    %c0_i32_1 = arith.constant 0 : i32
    return %arg0, %c0_i32, %c0_i32_0 : i32, i32, i32
  }
  func.func @transform_2(%arg0: i32, %arg1: i32) -> (i32, i32, i32) {
    %c0_i32 = arith.constant 0 : i32
    %c0_i32_0 = arith.constant 0 : i32
    return %arg0, %arg1, %c0_i32 : i32, i32, i32
  }
}

module attributes {stable_mosaic.version = 11 : i64} {
  func.func @_embed1_kernel(%arg0: i32, %arg1: memref<128x3xf32, #tpu.memory_space<vmem>>, %arg2: memref<3x128xbf16, #tpu.memory_space<vmem>>, %arg3: memref<1x128xf32, #tpu.memory_space<vmem>>, %arg4: memref<128x128xbf16, #tpu.memory_space<vmem>>, %arg5: memref<1x128xf32, #tpu.memory_space<vmem>>, %arg6: memref<128x128xbf16, #tpu.memory_space<vmem>>) attributes {dimension_semantics = [#tpu.dimension_semantics<parallel>], iteration_bounds = array<i64: 1>, scalar_prefetch = 0 : i64, scratch_operands = 0 : i64, tpu.core_type = #tpu.core_type<tc>, window_params = [{transform_indices = @transform_0, window_bounds = array<i64: 128, 3>}, {pipeline_mode = #tpu.pipeline_mode<synchronous>, transform_indices = @transform_1, window_bounds = array<i64: 3, 128>}, {pipeline_mode = #tpu.pipeline_mode<synchronous>, transform_indices = @transform_2, window_bounds = array<i64: 1, 128>}, {pipeline_mode = #tpu.pipeline_mode<synchronous>, transform_indices = @transform_3, window_bounds = array<i64: 128, 128>}, {pipeline_mode = #tpu.pipeline_mode<synchronous>, transform_indices = @transform_4, window_bounds = array<i64: 1, 128>}, {transform_indices = @transform_5, window_bounds = array<i64: 128, 128>}]} {
    %c0 = arith.constant 0 : index
    %c0_0 = arith.constant 0 : index
    %0 = vector.load %arg1[%c0, %c0_0] : memref<128x3xf32, #tpu.memory_space<vmem>>, vector<128x3xf32>
    %1 = arith.truncf %0 : vector<128x3xf32> to vector<128x3xbf16>
    %c0_1 = arith.constant 0 : index
    %c0_2 = arith.constant 0 : index
    %2 = vector.load %arg2[%c0_1, %c0_2] : memref<3x128xbf16, #tpu.memory_space<vmem>>, vector<3x128xbf16>
    %cst = arith.constant dense<0.000000e+00> : vector<128x128xf32>
    %3 = tpu.matmul %1, %2, %cst {dimension_numbers = #tpu.dot_dimension_numbers<[1], [0], [0], [1], [0, 0, 1, 1], [], []>} : vector<128x3xbf16>, vector<3x128xbf16>, vector<128x128xf32> -> vector<128x128xf32>
    %c0_3 = arith.constant 0 : index
    %c0_4 = arith.constant 0 : index
    %4 = vector.load %arg3[%c0_3, %c0_4] : memref<1x128xf32, #tpu.memory_space<vmem>>, vector<1x128xf32>
    %5 = vector.broadcast %4 : vector<1x128xf32> to vector<128x128xf32>
    %6 = arith.addf %3, %5 : vector<128x128xf32>
    %cst_5 = arith.constant 0.000000e+00 : f32
    %7 = vector.broadcast %cst_5 : f32 to vector<128x128xf32>
    %8 = arith.cmpf oge, %6, %7 : vector<128x128xf32>
    %cst_6 = arith.constant 0.00999999977 : f32
    %9 = vector.broadcast %cst_6 : f32 to vector<128x128xf32>
    %10 = arith.mulf %9, %6 : vector<128x128xf32>
    %11 = arith.select %8, %6, %10 : vector<128x128xi1>, vector<128x128xf32>
    %12 = arith.truncf %11 : vector<128x128xf32> to vector<128x128xbf16>
    %c0_7 = arith.constant 0 : index
    %c0_8 = arith.constant 0 : index
    %13 = vector.load %arg4[%c0_7, %c0_8] : memref<128x128xbf16, #tpu.memory_space<vmem>>, vector<128x128xbf16>
    %cst_9 = arith.constant dense<0.000000e+00> : vector<128x128xf32>
    %14 = tpu.matmul %12, %13, %cst_9 {dimension_numbers = #tpu.dot_dimension_numbers<[1], [0], [0], [1], [0, 0, 1, 1], [], []>} : vector<128x128xbf16>, vector<128x128xbf16>, vector<128x128xf32> -> vector<128x128xf32>
    %c0_10 = arith.constant 0 : index
    %c0_11 = arith.constant 0 : index
    %15 = vector.load %arg5[%c0_10, %c0_11] : memref<1x128xf32, #tpu.memory_space<vmem>>, vector<1x128xf32>
    %16 = vector.broadcast %15 : vector<1x128xf32> to vector<128x128xf32>
    %17 = arith.addf %14, %16 : vector<128x128xf32>
    %cst_12 = arith.constant 0.000000e+00 : f32
    %18 = vector.broadcast %cst_12 : f32 to vector<128x128xf32>
    %19 = arith.cmpf oge, %17, %18 : vector<128x128xf32>
    %cst_13 = arith.constant 0.00999999977 : f32
    %20 = vector.broadcast %cst_13 : f32 to vector<128x128xf32>
    %21 = arith.mulf %20, %17 : vector<128x128xf32>
    %22 = arith.select %19, %17, %21 : vector<128x128xi1>, vector<128x128xf32>
    %23 = arith.truncf %22 : vector<128x128xf32> to vector<128x128xbf16>
    %c0_14 = arith.constant 0 : index
    %c0_15 = arith.constant 0 : index
    %24 = vector.load %arg6[%c0_14, %c0_15] : memref<128x128xbf16, #tpu.memory_space<vmem>>, vector<128x128xbf16>
    tpu.vector_store %arg6[%c0_14, %c0_15], %23 {strides = array<i32>} : memref<128x128xbf16, #tpu.memory_space<vmem>>, vector<128x128xbf16>,
    return
  }
  func.func @transform_0(%arg0: i32) -> (i32, i32) {
    %c0_i32 = arith.constant 0 : i32
    %c0_i32_0 = arith.constant 0 : i32
    return %arg0, %c0_i32 : i32, i32
  }
  func.func @transform_1(%arg0: i32) -> (i32, i32) {
    %c0_i32 = arith.constant 0 : i32
    %c0_i32_0 = arith.constant 0 : i32
    %c0_i32_1 = arith.constant 0 : i32
    return %c0_i32, %c0_i32_0 : i32, i32
  }
  func.func @transform_2(%arg0: i32) -> (i32, i32) {
    %c0_i32 = arith.constant 0 : i32
    %c0_i32_0 = arith.constant 0 : i32
    %c0_i32_1 = arith.constant 0 : i32
    return %c0_i32, %c0_i32_0 : i32, i32
  }
  func.func @transform_3(%arg0: i32) -> (i32, i32) {
    %c0_i32 = arith.constant 0 : i32
    %c0_i32_0 = arith.constant 0 : i32
    %c0_i32_1 = arith.constant 0 : i32
    return %c0_i32, %c0_i32_0 : i32, i32
  }
  func.func @transform_4(%arg0: i32) -> (i32, i32) {
    %c0_i32 = arith.constant 0 : i32
    %c0_i32_0 = arith.constant 0 : i32
    %c0_i32_1 = arith.constant 0 : i32
    return %c0_i32, %c0_i32_0 : i32, i32
  }
  func.func @transform_5(%arg0: i32) -> (i32, i32) {
    %c0_i32 = arith.constant 0 : i32
    %c0_i32_0 = arith.constant 0 : i32
    return %arg0, %c0_i32 : i32, i32
  }
}

module attributes {stable_mosaic.version = 11 : i64} {
  func.func @_neigh_kernel(%arg0: i32, %arg1: i32, %arg2: memref<1x64x8x128xbf16, #tpu.memory_space<vmem>>, %arg3: memref<1x64x128xbf16, #tpu.memory_space<vmem>>, %arg4: memref<128x128xbf16, #tpu.memory_space<vmem>>, %arg5: memref<128x128xbf16, #tpu.memory_space<vmem>>, %arg6: memref<128x128xbf16, #tpu.memory_space<vmem>>, %arg7: memref<1x128xf32, #tpu.memory_space<vmem>>, %arg8: memref<1x128xf32, #tpu.memory_space<vmem>>, %arg9: memref<1x64x128xbf16, #tpu.memory_space<vmem>>) attributes {dimension_semantics = [#tpu.dimension_semantics<parallel>, #tpu.dimension_semantics<parallel>], iteration_bounds = array<i64: 2, 1>, scalar_prefetch = 0 : i64, scratch_operands = 0 : i64, tpu.core_type = #tpu.core_type<tc>, window_params = [{transform_indices = @transform_0, window_bounds = array<i64: 1, 64, 8, 128>}, {transform_indices = @transform_1, window_bounds = array<i64: 1, 64, 128>}, {pipeline_mode = #tpu.pipeline_mode<synchronous>, transform_indices = @transform_2, window_bounds = array<i64: 128, 128>}, {pipeline_mode = #tpu.pipeline_mode<synchronous>, transform_indices = @transform_3, window_bounds = array<i64: 128, 128>}, {pipeline_mode = #tpu.pipeline_mode<synchronous>, transform_indices = @transform_4, window_bounds = array<i64: 128, 128>}, {pipeline_mode = #tpu.pipeline_mode<synchronous>, transform_indices = @transform_5, window_bounds = array<i64: 1, 128>}, {pipeline_mode = #tpu.pipeline_mode<synchronous>, transform_indices = @transform_6, window_bounds = array<i64: 1, 128>}, {transform_indices = @transform_7, window_bounds = array<i64: 1, 64, 128>}]} {
    %c0 = arith.constant 0 : index
    %c0_0 = arith.constant 0 : index
    %c0_1 = arith.constant 0 : index
    %c0_2 = arith.constant 0 : index
    %0 = vector.load %arg2[%c0, %c0_0, %c0_1, %c0_2] : memref<1x64x8x128xbf16, #tpu.memory_space<vmem>>, vector<1x64x8x128xbf16>
    %1 = vector.shape_cast %0 : vector<1x64x8x128xbf16> to vector<64x8x128xbf16>
    %2 = vector.shape_cast %1 : vector<64x8x128xbf16> to vector<512x128xbf16>
    %c0_3 = arith.constant 0 : index
    %c0_4 = arith.constant 0 : index
    %c0_5 = arith.constant 0 : index
    %3 = vector.load %arg3[%c0_3, %c0_4, %c0_5] : memref<1x64x128xbf16, #tpu.memory_space<vmem>>, vector<1x64x128xbf16>
    %4 = vector.shape_cast %3 : vector<1x64x128xbf16> to vector<64x128xbf16>
    %c0_6 = arith.constant 0 : index
    %c0_7 = arith.constant 0 : index
    %5 = vector.load %arg4[%c0_6, %c0_7] : memref<128x128xbf16, #tpu.memory_space<vmem>>, vector<128x128xbf16>
    %cst = arith.constant dense<0.000000e+00> : vector<512x128xf32>
    %6 = tpu.matmul %2, %5, %cst {dimension_numbers = #tpu.dot_dimension_numbers<[1], [0], [0], [1], [0, 0, 1, 1], [], []>} : vector<512x128xbf16>, vector<128x128xbf16>, vector<512x128xf32> -> vector<512x128xf32>
    %7 = vector.shape_cast %6 : vector<512x128xf32> to vector<64x8x128xf32>
    %c0_8 = arith.constant 0 : index
    %c0_9 = arith.constant 0 : index
    %8 = vector.load %arg5[%c0_8, %c0_9] : memref<128x128xbf16, #tpu.memory_space<vmem>>, vector<128x128xbf16>
    %cst_10 = arith.constant dense<0.000000e+00> : vector<64x128xf32>
    %9 = tpu.matmul %4, %8, %cst_10 {dimension_numbers = #tpu.dot_dimension_numbers<[1], [0], [0], [1], [0, 0, 1, 1], [], []>} : vector<64x128xbf16>, vector<128x128xbf16>, vector<64x128xf32> -> vector<64x128xf32>
    %c0_11 = arith.constant 0 : index
    %c0_12 = arith.constant 0 : index
    %10 = vector.load %arg7[%c0_11, %c0_12] : memref<1x128xf32, #tpu.memory_space<vmem>>, vector<1x128xf32>
    %11 = vector.broadcast %10 : vector<1x128xf32> to vector<64x128xf32>
    %12 = arith.addf %9, %11 : vector<64x128xf32>
    %13 = vector.shape_cast %12 : vector<64x128xf32> to vector<64x1x128xf32>
    %14 = vector.broadcast %13 : vector<64x1x128xf32> to vector<64x8x128xf32>
    %15 = arith.addf %7, %14 : vector<64x8x128xf32>
    %cst_13 = arith.constant 0.000000e+00 : f32
    %16 = vector.broadcast %cst_13 : f32 to vector<64x8x128xf32>
    %17 = arith.cmpf oge, %15, %16 : vector<64x8x128xf32>
    %cst_14 = arith.constant 0.00999999977 : f32
    %18 = vector.broadcast %cst_14 : f32 to vector<64x8x128xf32>
    %19 = arith.mulf %18, %15 : vector<64x8x128xf32>
    %20 = arith.select %17, %15, %19 : vector<64x8x128xi1>, vector<64x8x128xf32>
    %21 = vector.shape_cast %20 : vector<64x8x128xf32> to vector<512x128xf32>
    %22 = arith.truncf %21 : vector<512x128xf32> to vector<512x128xbf16>
    %c0_15 = arith.constant 0 : index
    %c0_16 = arith.constant 0 : index
    %23 = vector.load %arg6[%c0_15, %c0_16] : memref<128x128xbf16, #tpu.memory_space<vmem>>, vector<128x128xbf16>
    %cst_17 = arith.constant dense<0.000000e+00> : vector<512x128xf32>
    %24 = tpu.matmul %22, %23, %cst_17 {dimension_numbers = #tpu.dot_dimension_numbers<[1], [0], [0], [1], [0, 0, 1, 1], [], []>} : vector<512x128xbf16>, vector<128x128xbf16>, vector<512x128xf32> -> vector<512x128xf32>
    %c0_18 = arith.constant 0 : index
    %c0_19 = arith.constant 0 : index
    %25 = vector.load %arg8[%c0_18, %c0_19] : memref<1x128xf32, #tpu.memory_space<vmem>>, vector<1x128xf32>
    %26 = vector.broadcast %25 : vector<1x128xf32> to vector<512x128xf32>
    %27 = arith.addf %24, %26 : vector<512x128xf32>
    %cst_20 = arith.constant 0.000000e+00 : f32
    %28 = vector.broadcast %cst_20 : f32 to vector<512x128xf32>
    %29 = arith.cmpf oge, %27, %28 : vector<512x128xf32>
    %cst_21 = arith.constant 0.00999999977 : f32
    %30 = vector.broadcast %cst_21 : f32 to vector<512x128xf32>
    %31 = arith.mulf %30, %27 : vector<512x128xf32>
    %32 = arith.select %29, %27, %31 : vector<512x128xi1>, vector<512x128xf32>
    %33 = vector.shape_cast %32 : vector<512x128xf32> to vector<64x8x128xf32>
    %cst_22 = arith.constant dense<0xFF800000> : vector<64x128xf32>
    %34 = vector.multi_reduction <maximumf>, %33, %cst_22 [1] : vector<64x8x128xf32> to vector<64x128xf32>
    %35 = arith.truncf %34 : vector<64x128xf32> to vector<64x128xbf16>
    %c0_23 = arith.constant 0 : index
    %c0_24 = arith.constant 0 : index
    %c0_25 = arith.constant 0 : index
    %36 = vector.load %arg9[%c0_23, %c0_24, %c0_25] : memref<1x64x128xbf16, #tpu.memory_space<vmem>>, vector<1x64x128xbf16>
    %37 = vector.shape_cast %36 : vector<1x64x128xbf16> to vector<64x128xbf16>
    %38 = vector.shape_cast %35 : vector<64x128xbf16> to vector<1x64x128xbf16>
    tpu.vector_store %arg9[%c0_23, %c0_24, %c0_25], %38 {strides = array<i32>} : memref<1x64x128xbf16, #tpu.memory_space<vmem>>, vector<1x64x128xbf16>,
    return
  }
  func.func @transform_0(%arg0: i32, %arg1: i32) -> (i32, i32, i32, i32) {
    %c0_i32 = arith.constant 0 : i32
    %c0_i32_0 = arith.constant 0 : i32
    %c0_i32_1 = arith.constant 0 : i32
    return %arg0, %arg1, %c0_i32, %c0_i32_0 : i32, i32, i32, i32
  }
  func.func @transform_1(%arg0: i32, %arg1: i32) -> (i32, i32, i32) {
    %c0_i32 = arith.constant 0 : i32
    %c0_i32_0 = arith.constant 0 : i32
    return %arg0, %arg1, %c0_i32 : i32, i32, i32
  }
  func.func @transform_2(%arg0: i32, %arg1: i32) -> (i32, i32) {
    %c0_i32 = arith.constant 0 : i32
    %c0_i32_0 = arith.constant 0 : i32
    %c0_i32_1 = arith.constant 0 : i32
    return %c0_i32, %c0_i32_0 : i32, i32
  }
  func.func @transform_3(%arg0: i32, %arg1: i32) -> (i32, i32) {
    %c0_i32 = arith.constant 0 : i32
    %c0_i32_0 = arith.constant 0 : i32
    %c0_i32_1 = arith.constant 0 : i32
    return %c0_i32, %c0_i32_0 : i32, i32
  }
  func.func @transform_4(%arg0: i32, %arg1: i32) -> (i32, i32) {
    %c0_i32 = arith.constant 0 : i32
    %c0_i32_0 = arith.constant 0 : i32
    %c0_i32_1 = arith.constant 0 : i32
    return %c0_i32, %c0_i32_0 : i32, i32
  }
  func.func @transform_5(%arg0: i32, %arg1: i32) -> (i32, i32) {
    %c0_i32 = arith.constant 0 : i32
    %c0_i32_0 = arith.constant 0 : i32
    %c0_i32_1 = arith.constant 0 : i32
    return %c0_i32, %c0_i32_0 : i32, i32
  }
  func.func @transform_6(%arg0: i32, %arg1: i32) -> (i32, i32) {
    %c0_i32 = arith.constant 0 : i32
    %c0_i32_0 = arith.constant 0 : i32
    %c0_i32_1 = arith.constant 0 : i32
    return %c0_i32, %c0_i32_0 : i32, i32
  }
  func.func @transform_7(%arg0: i32, %arg1: i32) -> (i32, i32, i32) {
    %c0_i32 = arith.constant 0 : i32
    %c0_i32_0 = arith.constant 0 : i32
    return %arg0, %arg1, %c0_i32 : i32, i32, i32
  }
}

module attributes {stable_mosaic.version = 11 : i64} {
  func.func @_oa_kernel(%arg0: i32, %arg1: memref<1x64x128xbf16, #tpu.memory_space<vmem>>, %arg2: memref<128x128xbf16, #tpu.memory_space<vmem>>, %arg3: memref<128x128xbf16, #tpu.memory_space<vmem>>, %arg4: memref<128x128xbf16, #tpu.memory_space<vmem>>, %arg5: memref<1x128xf32, #tpu.memory_space<vmem>>, %arg6: memref<1x64x128xbf16, #tpu.memory_space<vmem>>) attributes {dimension_semantics = [#tpu.dimension_semantics<parallel>], iteration_bounds = array<i64: 2>, scalar_prefetch = 0 : i64, scratch_operands = 0 : i64, tpu.core_type = #tpu.core_type<tc>, window_params = [{transform_indices = @transform_0, window_bounds = array<i64: 1, 64, 128>}, {pipeline_mode = #tpu.pipeline_mode<synchronous>, transform_indices = @transform_1, window_bounds = array<i64: 128, 128>}, {pipeline_mode = #tpu.pipeline_mode<synchronous>, transform_indices = @transform_2, window_bounds = array<i64: 128, 128>}, {pipeline_mode = #tpu.pipeline_mode<synchronous>, transform_indices = @transform_3, window_bounds = array<i64: 128, 128>}, {pipeline_mode = #tpu.pipeline_mode<synchronous>, transform_indices = @transform_4, window_bounds = array<i64: 1, 128>}, {transform_indices = @transform_5, window_bounds = array<i64: 1, 64, 128>}]} {
    %c0 = arith.constant 0 : index
    %c0_0 = arith.constant 0 : index
    %c0_1 = arith.constant 0 : index
    %0 = vector.load %arg1[%c0, %c0_0, %c0_1] : memref<1x64x128xbf16, #tpu.memory_space<vmem>>, vector<1x64x128xbf16>
    %1 = vector.shape_cast %0 : vector<1x64x128xbf16> to vector<64x128xbf16>
    %c0_2 = arith.constant 0 : index
    %c0_3 = arith.constant 0 : index
    %2 = vector.load %arg2[%c0_2, %c0_3] : memref<128x128xbf16, #tpu.memory_space<vmem>>, vector<128x128xbf16>
    %cst = arith.constant dense<0.000000e+00> : vector<64x128xf32>
    %3 = tpu.matmul %1, %2, %cst {dimension_numbers = #tpu.dot_dimension_numbers<[1], [0], [0], [1], [0, 0, 1, 1], [], []>} : vector<64x128xbf16>, vector<128x128xbf16>, vector<64x128xf32> -> vector<64x128xf32>
    %4 = arith.truncf %3 : vector<64x128xf32> to vector<64x128xbf16>
    %cst_4 = arith.constant dense<0.000000e+00> : vector<64x64xf32>
    %5 = tpu.matmul %4, %1, %cst_4 {dimension_numbers = #tpu.dot_dimension_numbers<[1], [1], [0], [0], [0, 0, 1, 0], [], []>} : vector<64x128xbf16>, vector<64x128xbf16>, vector<64x64xf32> -> vector<64x64xf32>
    %c0_5 = arith.constant 0 : index
    %c0_6 = arith.constant 0 : index
    %6 = vector.load %arg3[%c0_5, %c0_6] : memref<128x128xbf16, #tpu.memory_space<vmem>>, vector<128x128xbf16>
    %cst_7 = arith.constant dense<0.000000e+00> : vector<64x128xf32>
    %7 = tpu.matmul %1, %6, %cst_7 {dimension_numbers = #tpu.dot_dimension_numbers<[1], [0], [0], [1], [0, 0, 1, 1], [], []>} : vector<64x128xbf16>, vector<128x128xbf16>, vector<64x128xf32> -> vector<64x128xf32>
    %cst_8 = arith.constant dense<0xFF800000> : vector<64xf32>
    %8 = vector.multi_reduction <maximumf>, %5, %cst_8 [0] : vector<64x64xf32> to vector<64xf32>
    %9 = vector.shape_cast %8 : vector<64xf32> to vector<1x64xf32>
    %10 = vector.broadcast %9 : vector<1x64xf32> to vector<64x64xf32>
    %11 = arith.subf %5, %10 : vector<64x64xf32>
    %12 = math.exp %11 : vector<64x64xf32>
    %cst_9 = arith.constant dense<0.000000e+00> : vector<64xf32>
    %13 = vector.multi_reduction <add>, %12, %cst_9 [0] : vector<64x64xf32> to vector<64xf32>
    %14 = vector.shape_cast %13 : vector<64xf32> to vector<1x64xf32>
    %15 = tpu.reciprocal %14 {approx = true} : vector<1x64xf32> -> vector<1x64xf32>
    %16 = vector.broadcast %15 : vector<1x64xf32> to vector<64x64xf32>
    %17 = arith.mulf %12, %16 : vector<64x64xf32>
    %cst_10 = arith.constant dense<0.000000e+00> : vector<64xf32>
    %18 = vector.multi_reduction <add>, %17, %cst_10 [1] : vector<64x64xf32> to vector<64xf32>
    %19 = vector.shape_cast %18 : vector<64xf32> to vector<64x1xf32>
    %cst_11 = arith.constant 9.99999971E-10 : f32
    %20 = vector.broadcast %cst_11 : f32 to vector<64x1xf32>
    %21 = arith.addf %20, %19 : vector<64x1xf32>
    %22 = tpu.reciprocal %21 {approx = true} : vector<64x1xf32> -> vector<64x1xf32>
    %23 = vector.broadcast %22 : vector<64x1xf32> to vector<64x64xf32>
    %24 = arith.mulf %17, %23 : vector<64x64xf32>
    %25 = arith.truncf %24 : vector<64x64xf32> to vector<64x64xbf16>
    %26 = arith.truncf %7 : vector<64x128xf32> to vector<64x128xbf16>
    %cst_12 = arith.constant dense<0.000000e+00> : vector<64x128xf32>
    %27 = tpu.matmul %25, %26, %cst_12 {dimension_numbers = #tpu.dot_dimension_numbers<[1], [0], [0], [1], [0, 0, 1, 1], [], []>} : vector<64x64xbf16>, vector<64x128xbf16>, vector<64x128xf32> -> vector<64x128xf32>
    %28 = arith.extf %1 : vector<64x128xbf16> to vector<64x128xf32>
    %29 = arith.subf %28, %27 : vector<64x128xf32>
    %30 = arith.truncf %29 : vector<64x128xf32> to vector<64x128xbf16>
    %c0_13 = arith.constant 0 : index
    %c0_14 = arith.constant 0 : index
    %31 = vector.load %arg4[%c0_13, %c0_14] : memref<128x128xbf16, #tpu.memory_space<vmem>>, vector<128x128xbf16>
    %cst_15 = arith.constant dense<0.000000e+00> : vector<64x128xf32>
    %32 = tpu.matmul %30, %31, %cst_15 {dimension_numbers = #tpu.dot_dimension_numbers<[1], [0], [0], [1], [0, 0, 1, 1], [], []>} : vector<64x128xbf16>, vector<128x128xbf16>, vector<64x128xf32> -> vector<64x128xf32>
    %c0_16 = arith.constant 0 : index
    %c0_17 = arith.constant 0 : index
    %33 = vector.load %arg5[%c0_16, %c0_17] : memref<1x128xf32, #tpu.memory_space<vmem>>, vector<1x128xf32>
    %34 = vector.broadcast %33 : vector<1x128xf32> to vector<64x128xf32>
    %35 = arith.addf %32, %34 : vector<64x128xf32>
    %cst_18 = arith.constant 0.000000e+00 : f32
    %36 = vector.broadcast %cst_18 : f32 to vector<64x128xf32>
    %37 = arith.cmpf oge, %35, %36 : vector<64x128xf32>
    %cst_19 = arith.constant 0.00999999977 : f32
    %38 = vector.broadcast %cst_19 : f32 to vector<64x128xf32>
    %39 = arith.mulf %38, %35 : vector<64x128xf32>
    %40 = arith.select %37, %35, %39 : vector<64x128xi1>, vector<64x128xf32>
    %41 = arith.extf %1 : vector<64x128xbf16> to vector<64x128xf32>
    %42 = arith.addf %40, %41 : vector<64x128xf32>
    %43 = arith.truncf %42 : vector<64x128xf32> to vector<64x128xbf16>
    %c0_20 = arith.constant 0 : index
    %c0_21 = arith.constant 0 : index
    %c0_22 = arith.constant 0 : index
    %44 = vector.load %arg6[%c0_20, %c0_21, %c0_22] : memref<1x64x128xbf16, #tpu.memory_space<vmem>>, vector<1x64x128xbf16>
    %45 = vector.shape_cast %44 : vector<1x64x128xbf16> to vector<64x128xbf16>
    %46 = vector.shape_cast %43 : vector<64x128xbf16> to vector<1x64x128xbf16>
    tpu.vector_store %arg6[%c0_20, %c0_21, %c0_22], %46 {strides = array<i32>} : memref<1x64x128xbf16, #tpu.memory_space<vmem>>, vector<1x64x128xbf16>,
    return
  }
  func.func @transform_0(%arg0: i32) -> (i32, i32, i32) {
    %c0_i32 = arith.constant 0 : i32
    %c0_i32_0 = arith.constant 0 : i32
    %c0_i32_1 = arith.constant 0 : i32
    return %arg0, %c0_i32, %c0_i32_0 : i32, i32, i32
  }
  func.func @transform_1(%arg0: i32) -> (i32, i32) {
    %c0_i32 = arith.constant 0 : i32
    %c0_i32_0 = arith.constant 0 : i32
    %c0_i32_1 = arith.constant 0 : i32
    return %c0_i32, %c0_i32_0 : i32, i32
  }
  func.func @transform_2(%arg0: i32) -> (i32, i32) {
    %c0_i32 = arith.constant 0 : i32
    %c0_i32_0 = arith.constant 0 : i32
    %c0_i32_1 = arith.constant 0 : i32
    return %c0_i32, %c0_i32_0 : i32, i32
  }
  func.func @transform_3(%arg0: i32) -> (i32, i32) {
    %c0_i32 = arith.constant 0 : i32
    %c0_i32_0 = arith.constant 0 : i32
    %c0_i32_1 = arith.constant 0 : i32
    return %c0_i32, %c0_i32_0 : i32, i32
  }
  func.func @transform_4(%arg0: i32) -> (i32, i32) {
    %c0_i32 = arith.constant 0 : i32
    %c0_i32_0 = arith.constant 0 : i32
    %c0_i32_1 = arith.constant 0 : i32
    return %c0_i32, %c0_i32_0 : i32, i32
  }
  func.func @transform_5(%arg0: i32) -> (i32, i32, i32) {
    %c0_i32 = arith.constant 0 : i32
    %c0_i32_0 = arith.constant 0 : i32
    %c0_i32_1 = arith.constant 0 : i32
    return %arg0, %c0_i32, %c0_i32_0 : i32, i32, i32
  }
}

module attributes {stable_mosaic.version = 11 : i64} {
  func.func @_enc4_kernel(%arg0: i32, %arg1: i32, %arg2: memref<1x64x128xbf16, #tpu.memory_space<vmem>>, %arg3: memref<1x64x128xbf16, #tpu.memory_space<vmem>>, %arg4: memref<1x64x128xbf16, #tpu.memory_space<vmem>>, %arg5: memref<1x64x128xbf16, #tpu.memory_space<vmem>>, %arg6: memref<128x128xbf16, #tpu.memory_space<vmem>>, %arg7: memref<128x128xbf16, #tpu.memory_space<vmem>>, %arg8: memref<128x128xbf16, #tpu.memory_space<vmem>>, %arg9: memref<128x128xbf16, #tpu.memory_space<vmem>>, %arg10: memref<1x128xf32, #tpu.memory_space<vmem>>, %arg11: memref<1x64x128xbf16, #tpu.memory_space<vmem>>, %arg12: memref<1x1x128xf32, #tpu.memory_space<vmem>>, %arg13: memref<1x1x128xf32, #tpu.memory_space<vmem>>) attributes {dimension_semantics = [#tpu.dimension_semantics<parallel>, #tpu.dimension_semantics<arbitrary>], iteration_bounds = array<i64: 2, 1>, scalar_prefetch = 0 : i64, scratch_operands = 0 : i64, tpu.core_type = #tpu.core_type<tc>, window_params = [{transform_indices = @transform_0, window_bounds = array<i64: 1, 64, 128>}, {transform_indices = @transform_1, window_bounds = array<i64: 1, 64, 128>}, {transform_indices = @transform_2, window_bounds = array<i64: 1, 64, 128>}, {transform_indices = @transform_3, window_bounds = array<i64: 1, 64, 128>}, {pipeline_mode = #tpu.pipeline_mode<synchronous>, transform_indices = @transform_4, window_bounds = array<i64: 128, 128>}, {pipeline_mode = #tpu.pipeline_mode<synchronous>, transform_indices = @transform_5, window_bounds = array<i64: 128, 128>}, {pipeline_mode = #tpu.pipeline_mode<synchronous>, transform_indices = @transform_6, window_bounds = array<i64: 128, 128>}, {pipeline_mode = #tpu.pipeline_mode<synchronous>, transform_indices = @transform_7, window_bounds = array<i64: 128, 128>}, {pipeline_mode = #tpu.pipeline_mode<synchronous>, transform_indices = @transform_8, window_bounds = array<i64: 1, 128>}, {transform_indices = @transform_9, window_bounds = array<i64: 1, 64, 128>}, {transform_indices = @transform_10, window_bounds = array<i64: 1, 1, 128>}, {transform_indices = @transform_11, window_bounds = array<i64: 1, 1, 128>}]} {
    %c0 = arith.constant 0 : index
    %c0_0 = arith.constant 0 : index
    %c0_1 = arith.constant 0 : index
    %0 = vector.load %arg2[%c0, %c0_0, %c0_1] : memref<1x64x128xbf16, #tpu.memory_space<vmem>>, vector<1x64x128xbf16>
    %1 = vector.shape_cast %0 : vector<1x64x128xbf16> to vector<64x128xbf16>
    %c0_2 = arith.constant 0 : index
    %c0_3 = arith.constant 0 : index
    %2 = vector.load %arg6[%c0_2, %c0_3] : memref<128x128xbf16, #tpu.memory_space<vmem>>, vector<128x128xbf16>
    %cst = arith.constant dense<0.000000e+00> : vector<64x128xf32>
    %3 = tpu.matmul %1, %2, %cst {dimension_numbers = #tpu.dot_dimension_numbers<[1], [0], [0], [1], [0, 0, 1, 1], [], []>} : vector<64x128xbf16>, vector<128x128xbf16>, vector<64x128xf32> -> vector<64x128xf32>
    %c0_4 = arith.constant 0 : index
    %c0_5 = arith.constant 0 : index
    %c0_6 = arith.constant 0 : index
    %4 = vector.load %arg3[%c0_4, %c0_5, %c0_6] : memref<1x64x128xbf16, #tpu.memory_space<vmem>>, vector<1x64x128xbf16>
    %5 = vector.shape_cast %4 : vector<1x64x128xbf16> to vector<64x128xbf16>
    %c0_7 = arith.constant 0 : index
    %c0_8 = arith.constant 0 : index
    %6 = vector.load %arg7[%c0_7, %c0_8] : memref<128x128xbf16, #tpu.memory_space<vmem>>, vector<128x128xbf16>
    %cst_9 = arith.constant dense<0.000000e+00> : vector<64x128xf32>
    %7 = tpu.matmul %5, %6, %cst_9 {dimension_numbers = #tpu.dot_dimension_numbers<[1], [0], [0], [1], [0, 0, 1, 1], [], []>} : vector<64x128xbf16>, vector<128x128xbf16>, vector<64x128xf32> -> vector<64x128xf32>
    %8 = arith.addf %3, %7 : vector<64x128xf32>
    %c0_10 = arith.constant 0 : index
    %c0_11 = arith.constant 0 : index
    %c0_12 = arith.constant 0 : index
    %9 = vector.load %arg4[%c0_10, %c0_11, %c0_12] : memref<1x64x128xbf16, #tpu.memory_space<vmem>>, vector<1x64x128xbf16>
    %10 = vector.shape_cast %9 : vector<1x64x128xbf16> to vector<64x128xbf16>
    %c0_13 = arith.constant 0 : index
    %c0_14 = arith.constant 0 : index
    %11 = vector.load %arg8[%c0_13, %c0_14] : memref<128x128xbf16, #tpu.memory_space<vmem>>, vector<128x128xbf16>
    %cst_15 = arith.constant dense<0.000000e+00> : vector<64x128xf32>
    %12 = tpu.matmul %10, %11, %cst_15 {dimension_numbers = #tpu.dot_dimension_numbers<[1], [0], [0], [1], [0, 0, 1, 1], [], []>} : vector<64x128xbf16>, vector<128x128xbf16>, vector<64x128xf32> -> vector<64x128xf32>
    %13 = arith.addf %8, %12 : vector<64x128xf32>
    %c0_16 = arith.constant 0 : index
    %c0_17 = arith.constant 0 : index
    %c0_18 = arith.constant 0 : index
    %14 = vector.load %arg5[%c0_16, %c0_17, %c0_18] : memref<1x64x128xbf16, #tpu.memory_space<vmem>>, vector<1x64x128xbf16>
    %15 = vector.shape_cast %14 : vector<1x64x128xbf16> to vector<64x128xbf16>
    %c0_19 = arith.constant 0 : index
    %c0_20 = arith.constant 0 : index
    %16 = vector.load %arg9[%c0_19, %c0_20] : memref<128x128xbf16, #tpu.memory_space<vmem>>, vector<128x128xbf16>
    %cst_21 = arith.constant dense<0.000000e+00> : vector<64x128xf32>
    %17 = tpu.matmul %15, %16, %cst_21 {dimension_numbers = #tpu.dot_dimension_numbers<[1], [0], [0], [1], [0, 0, 1, 1], [], []>} : vector<64x128xbf16>, vector<128x128xbf16>, vector<64x128xf32> -> vector<64x128xf32>
    %18 = arith.addf %13, %17 : vector<64x128xf32>
    %c0_22 = arith.constant 0 : index
    %c0_23 = arith.constant 0 : index
    %19 = vector.load %arg10[%c0_22, %c0_23] : memref<1x128xf32, #tpu.memory_space<vmem>>, vector<1x128xf32>
    %20 = vector.broadcast %19 : vector<1x128xf32> to vector<64x128xf32>
    %21 = arith.addf %18, %20 : vector<64x128xf32>
    %cst_24 = arith.constant 0.000000e+00 : f32
    %22 = vector.broadcast %cst_24 : f32 to vector<64x128xf32>
    %23 = arith.cmpf oge, %21, %22 : vector<64x128xf32>
    %cst_25 = arith.constant 0.00999999977 : f32
    %24 = vector.broadcast %cst_25 : f32 to vector<64x128xf32>
    %25 = arith.mulf %24, %21 : vector<64x128xf32>
    %26 = arith.select %23, %21, %25 : vector<64x128xi1>, vector<64x128xf32>
    %27 = arith.truncf %26 : vector<64x128xf32> to vector<64x128xbf16>
    %c0_26 = arith.constant 0 : index
    %c0_27 = arith.constant 0 : index
    %c0_28 = arith.constant 0 : index
    %28 = vector.load %arg11[%c0_26, %c0_27, %c0_28] : memref<1x64x128xbf16, #tpu.memory_space<vmem>>, vector<1x64x128xbf16>
    %29 = vector.shape_cast %28 : vector<1x64x128xbf16> to vector<64x128xbf16>
    %30 = vector.shape_cast %27 : vector<64x128xbf16> to vector<1x64x128xbf16>
    tpu.vector_store %arg11[%c0_26, %c0_27, %c0_28], %30 {strides = array<i32>} : memref<1x64x128xbf16, #tpu.memory_space<vmem>>, vector<1x64x128xbf16>,
    %31 = tpu.iota {dimensions = array<i32: 0>} : vector<64x128xi32>
    %c64_i32 = arith.constant 64 : i32
    %32 = arith.muli %arg1, %c64_i32 : i32
    %33 = vector.broadcast %32 : i32 to vector<64x128xi32>
    %34 = arith.addi %31, %33 : vector<64x128xi32>
    %c64_i32_29 = arith.constant 64 : i32
    %35 = vector.broadcast %c64_i32_29 : i32 to vector<64x128xi32>
    %36 = arith.cmpi slt, %34, %35 : vector<64x128xi32>
    %cst_30 = arith.constant 0xFF800000 : f32
    %37 = vector.broadcast %cst_30 : f32 to vector<64x128xf32>
    %38 = arith.select %36, %26, %37 : vector<64x128xi1>, vector<64x128xf32>
    %cst_31 = arith.constant dense<0xFF800000> : vector<128xf32>
    %39 = vector.multi_reduction <maximumf>, %38, %cst_31 [0] : vector<64x128xf32> to vector<128xf32>
    %40 = vector.shape_cast %39 : vector<128xf32> to vector<1x128xf32>
    %cst_32 = arith.constant 0.000000e+00 : f32
    %41 = vector.broadcast %cst_32 : f32 to vector<64x128xf32>
    %42 = arith.select %36, %26, %41 : vector<64x128xi1>, vector<64x128xf32>
    %cst_33 = arith.constant dense<0.000000e+00> : vector<128xf32>
    %43 = vector.multi_reduction <add>, %42, %cst_33 [0] : vector<64x128xf32> to vector<128xf32>
    %44 = vector.shape_cast %43 : vector<128xf32> to vector<1x128xf32>
    %c0_i32 = arith.constant 0 : i32
    %45 = arith.cmpi eq, %arg1, %c0_i32 : i32
    %46 = arith.extui %45 : i1 to i32
    %c0_i32_34 = arith.constant 0 : i32
    %47 = arith.cmpi ne, %46, %c0_i32_34 : i32
    scf.if %47 {
      %c0_39 = arith.constant 0 : index
      %c0_40 = arith.constant 0 : index
      %c0_41 = arith.constant 0 : index
      %54 = vector.load %arg12[%c0_39, %c0_40, %c0_41] : memref<1x1x128xf32, #tpu.memory_space<vmem>>, vector<1x1x128xf32>
      %55 = vector.shape_cast %54 : vector<1x1x128xf32> to vector<1x128xf32>
      %56 = vector.shape_cast %40 : vector<1x128xf32> to vector<1x1x128xf32>
      tpu.vector_store %arg12[%c0_39, %c0_40, %c0_41], %56 {strides = array<i32>} : memref<1x1x128xf32, #tpu.memory_space<vmem>>, vector<1x1x128xf32>,
      %c0_42 = arith.constant 0 : index
      %c0_43 = arith.constant 0 : index
      %c0_44 = arith.constant 0 : index
      %57 = vector.load %arg13[%c0_42, %c0_43, %c0_44] : memref<1x1x128xf32, #tpu.memory_space<vmem>>, vector<1x1x128xf32>
      %58 = vector.shape_cast %57 : vector<1x1x128xf32> to vector<1x128xf32>
      %59 = vector.shape_cast %44 : vector<1x128xf32> to vector<1x1x128xf32>
      tpu.vector_store %arg13[%c0_42, %c0_43, %c0_44], %59 {strides = array<i32>} : memref<1x1x128xf32, #tpu.memory_space<vmem>>, vector<1x1x128xf32>,
    } else {
    }
    %c0_i32_35 = arith.constant 0 : i32
    %48 = arith.cmpi sgt, %arg1, %c0_i32_35 : i32
    %49 = arith.extui %48 : i1 to i32
    %c0_i32_36 = arith.constant 0 : i32
    %50 = arith.cmpi ne, %49, %c0_i32_36 : i32
    scf.if %50 {
      %c0_39 = arith.constant 0 : index
      %c0_40 = arith.constant 0 : index
      %c0_41 = arith.constant 0 : index
      %54 = vector.load %arg12[%c0_39, %c0_40, %c0_41] : memref<1x1x128xf32, #tpu.memory_space<vmem>>, vector<1x1x128xf32>
      %55 = vector.shape_cast %54 : vector<1x1x128xf32> to vector<1x128xf32>
      %56 = arith.maximumf %55, %40 : vector<1x128xf32>
      %c0_42 = arith.constant 0 : index
      %c0_43 = arith.constant 0 : index
      %c0_44 = arith.constant 0 : index
      %57 = vector.load %arg12[%c0_42, %c0_43, %c0_44] : memref<1x1x128xf32, #tpu.memory_space<vmem>>, vector<1x1x128xf32>
      %58 = vector.shape_cast %57 : vector<1x1x128xf32> to vector<1x128xf32>
      %59 = vector.shape_cast %56 : vector<1x128xf32> to vector<1x1x128xf32>
      tpu.vector_store %arg12[%c0_42, %c0_43, %c0_44], %59 {strides = array<i32>} : memref<1x1x128xf32, #tpu.memory_space<vmem>>, vector<1x1x128xf32>,
      %c0_45 = arith.constant 0 : index
      %c0_46 = arith.constant 0 : index
      %c0_47 = arith.constant 0 : index
      %60 = vector.load %arg13[%c0_45, %c0_46, %c0_47] : memref<1x1x128xf32, #tpu.memory_space<vmem>>, vector<1x1x128xf32>
      %61 = vector.shape_cast %60 : vector<1x1x128xf32> to vector<1x128xf32>
      %62 = arith.addf %61, %44 : vector<1x128xf32>
      %c0_48 = arith.constant 0 : index
      %c0_49 = arith.constant 0 : index
      %c0_50 = arith.constant 0 : index
      %63 = vector.load %arg13[%c0_48, %c0_49, %c0_50] : memref<1x1x128xf32, #tpu.memory_space<vmem>>, vector<1x1x128xf32>
      %64 = vector.shape_cast %63 : vector<1x1x128xf32> to vector<1x128xf32>
      %65 = vector.shape_cast %62 : vector<1x128xf32> to vector<1x1x128xf32>
      tpu.vector_store %arg13[%c0_48, %c0_49, %c0_50], %65 {strides = array<i32>} : memref<1x1x128xf32, #tpu.memory_space<vmem>>, vector<1x1x128xf32>,
    } else {
    }
    %c0_i32_37 = arith.constant 0 : i32
    %51 = arith.cmpi eq, %arg1, %c0_i32_37 : i32
    %52 = arith.extui %51 : i1 to i32
    %c0_i32_38 = arith.constant 0 : i32
    %53 = arith.cmpi ne, %52, %c0_i32_38 : i32
    scf.if %53 {
      %c0_39 = arith.constant 0 : index
      %c0_40 = arith.constant 0 : index
      %c0_41 = arith.constant 0 : index
      %54 = vector.load %arg13[%c0_39, %c0_40, %c0_41] : memref<1x1x128xf32, #tpu.memory_space<vmem>>, vector<1x1x128xf32>
      %55 = vector.shape_cast %54 : vector<1x1x128xf32> to vector<1x128xf32>
      %cst_42 = arith.constant 1.562500e-02 : f32
      %56 = vector.broadcast %cst_42 : f32 to vector<1x128xf32>
      %57 = arith.mulf %55, %56 : vector<1x128xf32>
      %c0_43 = arith.constant 0 : index
      %c0_44 = arith.constant 0 : index
      %c0_45 = arith.constant 0 : index
      %58 = vector.load %arg13[%c0_43, %c0_44, %c0_45] : memref<1x1x128xf32, #tpu.memory_space<vmem>>, vector<1x1x128xf32>
      %59 = vector.shape_cast %58 : vector<1x1x128xf32> to vector<1x128xf32>
      %60 = vector.shape_cast %57 : vector<1x128xf32> to vector<1x1x128xf32>
      tpu.vector_store %arg13[%c0_43, %c0_44, %c0_45], %60 {strides = array<i32>} : memref<1x1x128xf32, #tpu.memory_space<vmem>>, vector<1x1x128xf32>,
    } else {
    }
    return
  }
  func.func @transform_0(%arg0: i32, %arg1: i32) -> (i32, i32, i32) {
    %c0_i32 = arith.constant 0 : i32
    %c0_i32_0 = arith.constant 0 : i32
    return %arg0, %arg1, %c0_i32 : i32, i32, i32
  }
  func.func @transform_1(%arg0: i32, %arg1: i32) -> (i32, i32, i32) {
    %c0_i32 = arith.constant 0 : i32
    %c0_i32_0 = arith.constant 0 : i32
    return %arg0, %arg1, %c0_i32 : i32, i32, i32
  }
  func.func @transform_2(%arg0: i32, %arg1: i32) -> (i32, i32, i32) {
    %c0_i32 = arith.constant 0 : i32
    %c0_i32_0 = arith.constant 0 : i32
    return %arg0, %arg1, %c0_i32 : i32, i32, i32
  }
  func.func @transform_3(%arg0: i32, %arg1: i32) -> (i32, i32, i32) {
    %c0_i32 = arith.constant 0 : i32
    %c0_i32_0 = arith.constant 0 : i32
    return %arg0, %arg1, %c0_i32 : i32, i32, i32
  }
  func.func @transform_4(%arg0: i32, %arg1: i32) -> (i32, i32) {
    %c0_i32 = arith.constant 0 : i32
    %c0_i32_0 = arith.constant 0 : i32
    %c0_i32_1 = arith.constant 0 : i32
    return %c0_i32, %c0_i32_0 : i32, i32
  }
  func.func @transform_5(%arg0: i32, %arg1: i32) -> (i32, i32) {
    %c0_i32 = arith.constant 0 : i32
    %c0_i32_0 = arith.constant 0 : i32
    %c0_i32_1 = arith.constant 0 : i32
    return %c0_i32, %c0_i32_0 : i32, i32
  }
  func.func @transform_6(%arg0: i32, %arg1: i32) -> (i32, i32) {
    %c0_i32 = arith.constant 0 : i32
    %c0_i32_0 = arith.constant 0 : i32
    %c0_i32_1 = arith.constant 0 : i32
    return %c0_i32, %c0_i32_0 : i32, i32
  }
  func.func @transform_7(%arg0: i32, %arg1: i32) -> (i32, i32) {
    %c0_i32 = arith.constant 0 : i32
    %c0_i32_0 = arith.constant 0 : i32
    %c0_i32_1 = arith.constant 0 : i32
    return %c0_i32, %c0_i32_0 : i32, i32
  }
  func.func @transform_8(%arg0: i32, %arg1: i32) -> (i32, i32) {
    %c0_i32 = arith.constant 0 : i32
    %c0_i32_0 = arith.constant 0 : i32
    %c0_i32_1 = arith.constant 0 : i32
    return %c0_i32, %c0_i32_0 : i32, i32
  }
  func.func @transform_9(%arg0: i32, %arg1: i32) -> (i32, i32, i32) {
    %c0_i32 = arith.constant 0 : i32
    %c0_i32_0 = arith.constant 0 : i32
    return %arg0, %arg1, %c0_i32 : i32, i32, i32
  }
  func.func @transform_10(%arg0: i32, %arg1: i32) -> (i32, i32, i32) {
    %c0_i32 = arith.constant 0 : i32
    %c0_i32_0 = arith.constant 0 : i32
    %c0_i32_1 = arith.constant 0 : i32
    return %arg0, %c0_i32, %c0_i32_0 : i32, i32, i32
  }
  func.func @transform_11(%arg0: i32, %arg1: i32) -> (i32, i32, i32) {
    %c0_i32 = arith.constant 0 : i32
    %c0_i32_0 = arith.constant 0 : i32
    %c0_i32_1 = arith.constant 0 : i32
    return %arg0, %c0_i32, %c0_i32_0 : i32, i32, i32
  }
}

module attributes {stable_mosaic.version = 11 : i64} {
  func.func @_head_kernel(%arg0: i32, %arg1: i32, %arg2: memref<1x64x128xbf16, #tpu.memory_space<vmem>>, %arg3: memref<1x1x128xf32, #tpu.memory_space<vmem>>, %arg4: memref<128x128xbf16, #tpu.memory_space<vmem>>, %arg5: memref<128x128xbf16, #tpu.memory_space<vmem>>, %arg6: memref<1x128xf32, #tpu.memory_space<vmem>>, %arg7: memref<128x128xbf16, #tpu.memory_space<vmem>>, %arg8: memref<1x128xf32, #tpu.memory_space<vmem>>, %arg9: memref<1x64x128xf32, #tpu.memory_space<vmem>>) attributes {dimension_semantics = [#tpu.dimension_semantics<parallel>, #tpu.dimension_semantics<parallel>], iteration_bounds = array<i64: 2, 1>, scalar_prefetch = 0 : i64, scratch_operands = 0 : i64, tpu.core_type = #tpu.core_type<tc>, window_params = [{transform_indices = @transform_0, window_bounds = array<i64: 1, 64, 128>}, {transform_indices = @transform_1, window_bounds = array<i64: 1, 1, 128>}, {pipeline_mode = #tpu.pipeline_mode<synchronous>, transform_indices = @transform_2, window_bounds = array<i64: 128, 128>}, {pipeline_mode = #tpu.pipeline_mode<synchronous>, transform_indices = @transform_3, window_bounds = array<i64: 128, 128>}, {pipeline_mode = #tpu.pipeline_mode<synchronous>, transform_indices = @transform_4, window_bounds = array<i64: 1, 128>}, {pipeline_mode = #tpu.pipeline_mode<synchronous>, transform_indices = @transform_5, window_bounds = array<i64: 128, 128>}, {pipeline_mode = #tpu.pipeline_mode<synchronous>, transform_indices = @transform_6, window_bounds = array<i64: 1, 128>}, {transform_indices = @transform_7, window_bounds = array<i64: 1, 64, 128>}]} {
    %c0 = arith.constant 0 : index
    %c0_0 = arith.constant 0 : index
    %c0_1 = arith.constant 0 : index
    %0 = vector.load %arg2[%c0, %c0_0, %c0_1] : memref<1x64x128xbf16, #tpu.memory_space<vmem>>, vector<1x64x128xbf16>
    %1 = vector.shape_cast %0 : vector<1x64x128xbf16> to vector<64x128xbf16>
    %c0_2 = arith.constant 0 : index
    %c0_3 = arith.constant 0 : index
    %2 = vector.load %arg4[%c0_2, %c0_3] : memref<128x128xbf16, #tpu.memory_space<vmem>>, vector<128x128xbf16>
    %cst = arith.constant dense<0.000000e+00> : vector<64x128xf32>
    %3 = tpu.matmul %1, %2, %cst {dimension_numbers = #tpu.dot_dimension_numbers<[1], [0], [0], [1], [0, 0, 1, 1], [], []>} : vector<64x128xbf16>, vector<128x128xbf16>, vector<64x128xf32> -> vector<64x128xf32>
    %c0_4 = arith.constant 0 : index
    %c0_5 = arith.constant 0 : index
    %c0_6 = arith.constant 0 : index
    %4 = vector.load %arg3[%c0_4, %c0_5, %c0_6] : memref<1x1x128xf32, #tpu.memory_space<vmem>>, vector<1x1x128xf32>
    %5 = vector.shape_cast %4 : vector<1x1x128xf32> to vector<1x128xf32>
    %6 = vector.broadcast %5 : vector<1x128xf32> to vector<64x128xf32>
    %7 = arith.addf %3, %6 : vector<64x128xf32>
    %cst_7 = arith.constant 0.000000e+00 : f32
    %8 = vector.broadcast %cst_7 : f32 to vector<64x128xf32>
    %9 = arith.cmpf oge, %7, %8 : vector<64x128xf32>
    %cst_8 = arith.constant 0.00999999977 : f32
    %10 = vector.broadcast %cst_8 : f32 to vector<64x128xf32>
    %11 = arith.mulf %10, %7 : vector<64x128xf32>
    %12 = arith.select %9, %7, %11 : vector<64x128xi1>, vector<64x128xf32>
    %13 = arith.truncf %12 : vector<64x128xf32> to vector<64x128xbf16>
    %c0_9 = arith.constant 0 : index
    %c0_10 = arith.constant 0 : index
    %14 = vector.load %arg5[%c0_9, %c0_10] : memref<128x128xbf16, #tpu.memory_space<vmem>>, vector<128x128xbf16>
    %cst_11 = arith.constant dense<0.000000e+00> : vector<64x128xf32>
    %15 = tpu.matmul %13, %14, %cst_11 {dimension_numbers = #tpu.dot_dimension_numbers<[1], [0], [0], [1], [0, 0, 1, 1], [], []>} : vector<64x128xbf16>, vector<128x128xbf16>, vector<64x128xf32> -> vector<64x128xf32>
    %c0_12 = arith.constant 0 : index
    %c0_13 = arith.constant 0 : index
    %16 = vector.load %arg6[%c0_12, %c0_13] : memref<1x128xf32, #tpu.memory_space<vmem>>, vector<1x128xf32>
    %17 = vector.broadcast %16 : vector<1x128xf32> to vector<64x128xf32>
    %18 = arith.addf %15, %17 : vector<64x128xf32>
    %cst_14 = arith.constant 0.000000e+00 : f32
    %19 = vector.broadcast %cst_14 : f32 to vector<64x128xf32>
    %20 = arith.cmpf oge, %18, %19 : vector<64x128xf32>
    %cst_15 = arith.constant 0.00999999977 : f32
    %21 = vector.broadcast %cst_15 : f32 to vector<64x128xf32>
    %22 = arith.mulf %21, %18 : vector<64x128xf32>
    %23 = arith.select %20, %18, %22 : vector<64x128xi1>, vector<64x128xf32>
    %24 = arith.truncf %23 : vector<64x128xf32> to vector<64x128xbf16>
    %c0_16 = arith.constant 0 : index
    %c0_17 = arith.constant 0 : index
    %25 = vector.load %arg7[%c0_16, %c0_17] : memref<128x128xbf16, #tpu.memory_space<vmem>>, vector<128x128xbf16>
    %cst_18 = arith.constant dense<0.000000e+00> : vector<64x128xf32>
    %26 = tpu.matmul %24, %25, %cst_18 {dimension_numbers = #tpu.dot_dimension_numbers<[1], [0], [0], [1], [0, 0, 1, 1], [], []>} : vector<64x128xbf16>, vector<128x128xbf16>, vector<64x128xf32> -> vector<64x128xf32>
    %c0_19 = arith.constant 0 : index
    %c0_20 = arith.constant 0 : index
    %27 = vector.load %arg8[%c0_19, %c0_20] : memref<1x128xf32, #tpu.memory_space<vmem>>, vector<1x128xf32>
    %28 = vector.broadcast %27 : vector<1x128xf32> to vector<64x128xf32>
    %29 = arith.addf %26, %28 : vector<64x128xf32>
    %c0_21 = arith.constant 0 : index
    %c0_22 = arith.constant 0 : index
    %c0_23 = arith.constant 0 : index
    %30 = vector.load %arg9[%c0_21, %c0_22, %c0_23] : memref<1x64x128xf32, #tpu.memory_space<vmem>>, vector<1x64x128xf32>
    %31 = vector.shape_cast %30 : vector<1x64x128xf32> to vector<64x128xf32>
    %32 = vector.shape_cast %29 : vector<64x128xf32> to vector<1x64x128xf32>
    tpu.vector_store %arg9[%c0_21, %c0_22, %c0_23], %32 {strides = array<i32>} : memref<1x64x128xf32, #tpu.memory_space<vmem>>, vector<1x64x128xf32>,
    return
  }
  func.func @transform_0(%arg0: i32, %arg1: i32) -> (i32, i32, i32) {
    %c0_i32 = arith.constant 0 : i32
    %c0_i32_0 = arith.constant 0 : i32
    return %arg0, %arg1, %c0_i32 : i32, i32, i32
  }
  func.func @transform_1(%arg0: i32, %arg1: i32) -> (i32, i32, i32) {
    %c0_i32 = arith.constant 0 : i32
    %c0_i32_0 = arith.constant 0 : i32
    %c0_i32_1 = arith.constant 0 : i32
    return %arg0, %c0_i32, %c0_i32_0 : i32, i32, i32
  }
  func.func @transform_2(%arg0: i32, %arg1: i32) -> (i32, i32) {
    %c0_i32 = arith.constant 0 : i32
    %c0_i32_0 = arith.constant 0 : i32
    %c0_i32_1 = arith.constant 0 : i32
    return %c0_i32, %c0_i32_0 : i32, i32
  }
  func.func @transform_3(%arg0: i32, %arg1: i32) -> (i32, i32) {
    %c0_i32 = arith.constant 0 : i32
    %c0_i32_0 = arith.constant 0 : i32
    %c0_i32_1 = arith.constant 0 : i32
    return %c0_i32, %c0_i32_0 : i32, i32
  }
  func.func @transform_4(%arg0: i32, %arg1: i32) -> (i32, i32) {
    %c0_i32 = arith.constant 0 : i32
    %c0_i32_0 = arith.constant 0 : i32
    %c0_i32_1 = arith.constant 0 : i32
    return %c0_i32, %c0_i32_0 : i32, i32
  }
  func.func @transform_5(%arg0: i32, %arg1: i32) -> (i32, i32) {
    %c0_i32 = arith.constant 0 : i32
    %c0_i32_0 = arith.constant 0 : i32
    %c0_i32_1 = arith.constant 0 : i32
    return %c0_i32, %c0_i32_0 : i32, i32
  }
  func.func @transform_6(%arg0: i32, %arg1: i32) -> (i32, i32) {
    %c0_i32 = arith.constant 0 : i32
    %c0_i32_0 = arith.constant 0 : i32
    %c0_i32_1 = arith.constant 0 : i32
    return %c0_i32, %c0_i32_0 : i32, i32
  }
  func.func @transform_7(%arg0: i32, %arg1: i32) -> (i32, i32, i32) {
    %c0_i32 = arith.constant 0 : i32
    %c0_i32_0 = arith.constant 0 : i32
    return %arg0, %arg1, %c0_i32 : i32, i32, i32
  }
}

</mosaic_0001>

<bundles_post_ra>
// kernel: pct_segmentation_forward.10
= control target key start
LH: loop header
LB: loop body
LE: loop exit
PB: predicated region body
PF: predicated region fallthrough
CT: control target
= control target key end

     0   :  { %s1213_s9 = smov 0   ;;  %s1215_s10 = smov 0   ;;  %s1497_s0 = inlined_call_operand.vmem [shape: bf16[2,64,128], index: 0, kind: input, shape index: {}, may-alias: {0,1}]   ;;  %s1498_s1 = inlined_call_operand.vmem [shape: bf16[2,64,128], index: 1, kind: input, shape index: {}, may-alias: {0,1}]   ;;  %s1499_s2 = inlined_call_operand.vmem [shape: s32[2,64,8], index: 2, kind: output, shape index: {}]  }
   0x1   :  { %s1217_s11 = smov 0  }
   0x2 LB: > { %s24_s12 = sadd.s32 1, %s1121_s10  ;;  %p768_p0 = scmp.ge.s32.totalorder %s1125_s11, 1  ;;  %s1125_s11 = sphi %s1217_s11, %s12_s11   ;;  %s1121_s10 = sphi %s1215_s10, %s1512_s10   ;;  %s1117_s9 = sphi %s1213_s9, %s1511_s9  }
   0x3   : > { %p26_p1 = scmp.ge.s32.totalorder %s24_s12, 2  ;;  %p143_p2 = scmp.lt.s32.totalorder %s1125_s11, 3 }
   0x5   : > { %s1514_s12 = smov (%p26_p1, %s24_s12), 0  ;;  %p144_p3 = pnand %p768_p0, %p143_p2 }
   0x6   : > { %p179_p4 = scmp.lt.s32.totalorder (!%p144_p3), %s1117_s9, 1  ;;  %s1300_s24 = smov (!%p144_p3), 0  }
   0x7   : > { %147 = sbr.rel (%p144_p3) target bundleno = 561 (0x231), region = 28 }
   0xc   : > { %v1195_v0 = vmov 0.0   ;;  %vm1196_vm0 = vmmov 0   ;;  %s1516_s9 = smov (!%p179_p4, %s1117_s9), 1  ;;  %v1197_v41 = vmov 1.0   ;;  %v451_v42 = vlaneseq }
   0xd   : > { %821 = vmatprep.subr.mxu1 %v1195_v0  ;;  %837 = vmatprep.mubr.msk.f32.mxu1 %vm1196_vm0, %v1195_v0  ;;  %s785_s13 = sshll.u32 %s1516_s9, 5  ;;  %s787_s14 = sshll.u32 %s1516_s9, 6 }
   0xe   : > { %s1236_s17 = scalar_lea.vmem %s1498_s1, %s785_s13  ;;  %s1241_s20 = scalar_lea.vmem %s1499_s2, %s787_s14  ;;  %v1263_v43 = vand.u32 127, %v451_v42  ;;  %v452_v48 = vshrl.u32 %v451_v42, 7 }
   0xf   : > { %v218_v1 = vld [vmem:[%s1236_s17 + $0x18] sm:$0xff]   ;;  %v216_v2 = vld [vmem:[%s1236_s17 + $0x10] sm:$0xff]   ;;  %s1248_s23 = scalar_lea.vmem %s1497_s0, %s785_s13  ;;  %v214_v9 = vld [vmem:[%s1236_s17 + $0x8] sm:$0xff]  }
  0x10   : > { %v347_v3 = vunpack.c.l.bf16 %v218_v1  ;;  %v348_v4 = vunpack.c.h.bf16 %v218_v1  ;;  %v204_v5 = vld [vmem:[%s1248_s23] sm:$0xff]   ;;  %805 = vmatprep.subr.bf16.mxu0 %v218_v1  ;;  %v346_v8 = vunpack.c.h.bf16 %v216_v2  ;;  %v206_v10 = vld [vmem:[%s1248_s23 + $0x8] sm:$0xff]   ;;  %v345_v17 = vunpack.c.l.bf16 %v216_v2  ;;  %v208_v18 = vld [vmem:[%s1248_s23 + $0x10] sm:$0xff]  }
  0x11   : > { %806 = vmatpush3.bf16.xpose.msra.mxu0 %v218_v1  ;;  %v333_v11 = vunpack.c.l.bf16 %v204_v5  ;;  %813 = vmatprep.mubr.bf16.mxu0 %v204_v5  ;;  %v335_v12 = vunpack.c.l.bf16 %v206_v10  ;;  %v334_v13 = vunpack.c.h.bf16 %v204_v5  ;;  %v336_v14 = vunpack.c.h.bf16 %v206_v10  ;;  %v210_v26 = vld [vmem:[%s1248_s23 + $0x18] sm:$0xff]   ;;  %v212_v27 = vld [vmem:[%s1236_s17] sm:$0xff]  }
  0x12   : > { %v380_v6 = vmul.f32 %v348_v4, %v348_v4  ;;  %v379_v7 = vmul.f32 %v347_v3, %v347_v3  ;;  %807 = vmatprep.subr.bf16.mxu0 %v216_v2  ;;  %v378_v16 = vmul.f32 %v346_v8, %v346_v8  ;;  %v337_v21 = vunpack.c.l.bf16 %v208_v18 }
  0x13   : > { %v349_v15 = vmul.f32 %v333_v11, %v333_v11  ;;  %v351_v19 = vmul.f32 %v335_v12, %v335_v12  ;;  %v350_v20 = vmul.f32 %v334_v13, %v334_v13  ;;  %v352_v22 = vmul.f32 %v336_v14, %v336_v14 }
  0x14   : > { %822 = vmatpush3.xpose.msra.mxu1 %v380_v6  ;;  %v338_v23 = vunpack.c.h.bf16 %v208_v18  ;;  %v377_v24 = vmul.f32 %v345_v17, %v345_v17  ;;  %v344_v25 = vunpack.c.h.bf16 %v214_v9  ;;  %v353_v28 = vmul.f32 %v337_v21, %v337_v21 }
  0x15   : > { %823 = vmatprep.subr.mxu1 %v1195_v0  ;;  %357 = vadd.xlane.f32.xlu0 %v349_v15  ;;  %v339_v29 = vunpack.c.l.bf16 %v210_v26  ;;  %v340_v31 = vunpack.c.h.bf16 %v210_v26  ;;  %v343_v33 = vunpack.c.l.bf16 %v214_v9  ;;  %v342_v37 = vunpack.c.h.bf16 %v212_v27 }
  0x16   : > { %361 = vadd.xlane.f32.xlu1 %v351_v19  ;;  %v354_v30 = vmul.f32 %v338_v23, %v338_v23  ;;  %v376_v32 = vmul.f32 %v344_v25, %v344_v25  ;;  %v341_v39 = vunpack.c.l.bf16 %v212_v27  ;;  %v1266_v44 = vcvt.s32.f32 %v1263_v43 }
  0x17   : > { %v355_v34 = vmul.f32 %v339_v29, %v339_v29  ;;  %v356_v35 = vmul.f32 %v340_v31, %v340_v31  ;;  %v375_v36 = vmul.f32 %v343_v33, %v343_v33  ;;  %v374_v38 = vmul.f32 %v342_v37, %v342_v37 }
  0x18   : > { %824 = vmatpush3.xpose.msra.mxu1 %v379_v7  ;;  %v373_v40 = vmul.f32 %v341_v39, %v341_v39  ;;  %v453_v50 = vsub.s32 0, %v452_v48  ;;  %v1274_v29 = vmov 0   ;;  %v1278_v31 = vmov 0  }
  0x19   : > { %825 = vmatprep.subr.mxu1 %v1195_v0  ;;  %808 = vmatpush3.bf16.xpose.msra.mxu0 %v216_v2  ;;  %v1282_v33 = vmov 0  }
  0x1a   : > { %809 = vmatprep.subr.bf16.mxu0 %v214_v9  ;;  %359 = vadd.xlane.f32.xlu0 %v350_v20 }
  0x1b   : > { %363 = vadd.xlane.f32.xlu1 %v352_v22 }
  0x1c   : > { %826 = vmatpush3.xpose.msra.mxu1 %v378_v16 }
  0x1d   : > { %827 = vmatprep.subr.mxu1 %v1195_v0 }
  0x1e   : > { %365 = vadd.xlane.f32.xlu0 %v353_v28  ;;  %v1272_v28 = vmov 0  }
  0x1f   : > { %367 = vadd.xlane.f32.xlu1 %v354_v30  ;;  %v1276_v30 = vmov 0  }
  0x20   : > { %828 = vmatpush3.xpose.msra.mxu1 %v377_v24 }
  0x21   : > { %829 = vmatprep.subr.mxu1 %v1195_v0  ;;  %810 = vmatpush3.bf16.xpose.msra.mxu0 %v214_v9 }
  0x22   : > { %811 = vmatprep.subr.bf16.mxu0 %v212_v27  ;;  %369 = vadd.xlane.f32.xlu0 %v355_v34 }
  0x23   : > { %371 = vadd.xlane.f32.xlu1 %v356_v35 }
  0x24   : > { %830 = vmatpush3.xpose.msra.mxu1 %v376_v32  ;;  %v1280_v32 = vmov 0  }
  0x25   : > { %831 = vmatprep.subr.mxu1 %v1195_v0 }
  0x28   : > { %832 = vmatpush3.xpose.msra.mxu1 %v375_v36 }
  0x29   : > { %833 = vmatprep.subr.mxu1 %v1195_v0  ;;  %812 = vmatpush3.bf16.xpose.msra.mxu0 %v212_v27  ;;  %v1270_v27 = vmov 0  }
  0x2c   : > { %834 = vmatpush3.xpose.msra.mxu1 %v374_v38 }
  0x2d   : > { %835 = vmatprep.subr.mxu1 %v1195_v0 }
  0x30   : > { %836 = vmatpush3.xpose.msra.mxu1 %v373_v40  ;;  %814 = vmatmul.mubr.bf16.vlgmr.msra.gmra.mxu0 %v206_v10 }
  0x31   : > { %817 = vmatprep.mubr.bf16.mxu0 %v208_v18 }
  0x33   : > { %838 = vmatmul.mubr.f32.vlgmr.msra.gmra.mxu1 %v1197_v41 }
  0x38   : > { %818 = vmatmul.mubr.bf16.gmra.mxu0 %v210_v26  ;;  %v1268_v26 = vmov 0  }
  0x9e   : > { %v358_v45 = vpop.xlane.xlu0 %357 }
  0x9f   : > { %v362_v46 = vpop.xlane.xlu1 %361 }
  0xa3   : > { %v360_v47 = vpop.xlane.xlu0 %359 }
  0xa4   : > { %v364_v49 = vpop.xlane.xlu1 %363 }
  0xa7   : > { %v366_v51 = vpop.xlane.xlu0 %365 }
  0xa8   : > { %v368_v56 = vpop.xlane.xlu1 %367 }
  0xab   : > { %v370_v0 = vpop.xlane.xlu0 %369 }
  0xac   : > { %v372_v10 = vpop.xlane.xlu1 %371 }
  0xf0   : > { %v815_v52 = vpop.f32.mrf.mxu0 }
  0xf1   : > { %v465_v59 = vmul.f32 2.0, %v815_v52 }
  0xf2   : > { %v302_v55 = vpop.f32.mrf.mxu0 }
  0xf3   : > { %v447_v53 = vpop.f32.mrf.mxu1  ;;  %v463_v57 = vmul.f32 2.0, %v302_v55 }
  0xf4   : > { %v454_v54 = vrot.slane %v447_v53, %v453_v50  ;;  %v816_v63 = vpop.f32.mrf.mxu0 }
  0xf5   : > { %v839_v58 = vpop.f32.mrf.mxu1  ;;  %v466_v1 = vmul.f32 2.0, %v816_v63 }
  0xf6   : > { %v457_v60 = vadd.f32 %v454_v54, %v362_v46  ;;  %v455_v61 = vadd.f32 %v454_v54, %v358_v45  ;;  %v458_v62 = vadd.f32 %v454_v54, %v364_v49  ;;  %v456_v2 = vadd.f32 %v454_v54, %v360_v47  ;;  %v305_v5 = vpop.f32.mrf.mxu0 }
  0xf7   : > { %v464_v7 = vmul.f32 2.0, %v305_v5  ;;  %v461_v8 = vadd.f32 %v454_v54, %v370_v0  ;;  %v459_v11 = vadd.f32 %v454_v54, %v366_v51  ;;  %v462_v17 = vadd.f32 %v454_v54, %v372_v10 }
  0xf8   : > { %v473_v3 = vsub.f32 %v457_v60, %v465_v59   ;;  %v471_v4 = vsub.f32 %v455_v61, %v463_v57   ;;  %v474_v6 = vsub.f32 %v458_v62, %v466_v1   ;;  %v819_v9 = vpop.f32.mrf.mxu0  ;;  %v460_v22 = vadd.f32 %v454_v54, %v368_v56 }
  0xf9   : > { %v472_v12 = vsub.f32 %v456_v2, %v464_v7   ;;  %v469_v13 = vmul.f32 2.0, %v819_v9 }
  0xfa   : > { %v318_v14 = vpop.f32.mrf.mxu0 }
  0xfb   : > { %v477_v15 = vsub.f32 %v461_v8, %v469_v13   ;;  %v467_v16 = vmul.f32 2.0, %v318_v14 }
  0xfc   : > { %v820_v18 = vpop.f32.mrf.mxu0 }
  0xfd   : > { %v475_v19 = vsub.f32 %v459_v11, %v467_v16   ;;  %v470_v20 = vmul.f32 2.0, %v820_v18 }
  0xfe   : > { %v321_v21 = vpop.f32.mrf.mxu0 }
  0xff   : > { %v478_v23 = vsub.f32 %v462_v17, %v470_v20   ;;  %v468_v24 = vmul.f32 2.0, %v321_v21 }
 0x101   : > { %v476_v25 = vsub.f32 %v460_v22, %v468_v24  }
 0x102 LB: >> { %vm504_vm1 = vcmask 523264   ;;  %v585_v7 = vstv %s1193_s24  ;;  %s487_s24 = sadd.s32 1, %s1193_s24   ;;  %s1193_s24 = sphi %s1300_s24, %s487_s24   ;;  %v1189_v4 = vphi %v471_v4, %v577_v4   ;;  %v1185_v12 = vphi %v472_v12, %v578_v12   ;;  %v1181_v3 = vphi %v473_v3, %v579_v3   ;;  %v1177_v6 = vphi %v474_v6, %v580_v6   ;;  %v1173_v19 = vphi %v475_v19, %v581_v19   ;;  %v1169_v25 = vphi %v476_v25, %v582_v25   ;;  %v1165_v15 = vphi %v477_v15, %v583_v15   ;;  %v1161_v23 = vphi %v478_v23, %v584_v23   ;;  %v1157_v33 = vphi %v1282_v33, %v1510_v33   ;;  %v1153_v32 = vphi %v1280_v32, %v1509_v32   ;;  %v1149_v31 = vphi %v1278_v31, %v1508_v31   ;;  %v1145_v30 = vphi %v1276_v30, %v1507_v30   ;;  %v1141_v29 = vphi %v1274_v29, %v1506_v29   ;;  %v1137_v28 = vphi %v1272_v28, %v1505_v28   ;;  %v1133_v27 = vphi %v1270_v27, %v1504_v27   ;;  %v1129_v26 = vphi %v1268_v26, %v1503_v26  }
 0x103   : >> { %v505_v34 = vsel %vm504_vm1, %v1189_v4, inf  ;;  %v511_v35 = vsel %vm504_vm1, %v1181_v3, inf  ;;  %v508_v36 = vsel %vm504_vm1, %v1185_v12, inf  ;;  %v514_v37 = vsel %vm504_vm1, %v1177_v6, inf  ;;  %p1440_p5 = scmp.ge.s32.totalorder %s487_s24, 8  }
 0x104   : >> { %506 = vmin.xlane.f32.xlu0 %v505_v34  ;;  %512 = vmin.xlane.f32.xlu1 %v511_v35  ;;  %v517_v38 = vsel %vm504_vm1, %v1173_v19, inf  ;;  %v520_v39 = vsel %vm504_vm1, %v1169_v25, inf  ;;  %v523_v40 = vsel %vm504_vm1, %v1165_v15, inf  ;;  %v526_v41 = vsel %vm504_vm1, %v1161_v23, inf }
 0x105   : >> { %vm1396_vm11 = vcmp.eq.s32.totalorder %v1263_v43, %v585_v7 }
 0x108   : >> { %509 = vmin.xlane.f32.xlu0 %v508_v36  ;;  %515 = vmin.xlane.f32.xlu1 %v514_v37 }
 0x10c   : >> { %518 = vmin.xlane.f32.xlu0 %v517_v38  ;;  %521 = vmin.xlane.f32.xlu1 %v520_v39 }
 0x110   : >> { %524 = vmin.xlane.f32.xlu0 %v523_v40  ;;  %527 = vmin.xlane.f32.xlu1 %v526_v41 }
 0x18d   : >> { %v507_v42 = vpop.xlane.xlu0 %506  ;;  %v513_v45 = vpop.xlane.xlu1 %512 }
 0x18e   : >> { %vm529_vm2 = vcmp.le.f32.partialorder %v1189_v4, %v507_v42  ;;  %vm531_vm3 = vcmp.le.f32.partialorder %v1181_v3, %v513_v45 }
 0x18f   : >> { %v537_v46 = vsel %vm529_vm2, %v1266_v44, 64.0  ;;  %v539_v47 = vsel %vm531_vm3, %v1266_v44, 64.0  ;;  %vm603_vm3 = vcmask (%p1440_p5), 64512  }
 0x190   : >> { %v545_v48 = vsel %vm504_vm1, %v537_v46, inf  ;;  %v551_v51 = vsel %vm504_vm1, %v539_v47, inf }
 0x191   : >> { %v510_v49 = vpop.xlane.xlu0 %509  ;;  %546 = vmin.xlane.f32.xlu0 %v545_v48  ;;  %v516_v50 = vpop.xlane.xlu1 %515 }
 0x192   : >> { %vm530_vm4 = vcmp.le.f32.partialorder %v1185_v12, %v510_v49  ;;  %vm532_vm5 = vcmp.le.f32.partialorder %v1177_v6, %v516_v50 }
 0x193   : >> { %v538_v52 = vsel %vm530_vm4, %v1266_v44, 64.0  ;;  %v540_v53 = vsel %vm532_vm5, %v1266_v44, 64.0 }
 0x194   : >> { %v548_v54 = vsel %vm504_vm1, %v538_v52, inf  ;;  %v554_v57 = vsel %vm504_vm1, %v540_v53, inf }
 0x195   : >> { %552 = vmin.xlane.f32.xlu0 %v551_v51  ;;  %549 = vmin.xlane.f32.xlu1 %v548_v54  ;;  %v519_v55 = vpop.xlane.xlu0 %518  ;;  %v522_v56 = vpop.xlane.xlu1 %521 }
 0x196   : >> { %vm533_vm6 = vcmp.le.f32.partialorder %v1173_v19, %v519_v55  ;;  %vm534_vm7 = vcmp.le.f32.partialorder %v1169_v25, %v522_v56 }
 0x197   : >> { %v541_v58 = vsel %vm533_vm6, %v1266_v44, 64.0  ;;  %v542_v59 = vsel %vm534_vm7, %v1266_v44, 64.0 }
 0x198   : >> { %v557_v60 = vsel %vm504_vm1, %v541_v58, inf  ;;  %v560_v63 = vsel %vm504_vm1, %v542_v59, inf }
 0x199   : >> { %555 = vmin.xlane.f32.xlu1 %v554_v57  ;;  %558 = vmin.xlane.f32.xlu0 %v557_v60  ;;  %v525_v61 = vpop.xlane.xlu0 %524  ;;  %v528_v62 = vpop.xlane.xlu1 %527 }
 0x19a   : >> { %vm535_vm8 = vcmp.le.f32.partialorder %v1165_v15, %v525_v61  ;;  %vm536_vm9 = vcmp.le.f32.partialorder %v1161_v23, %v528_v62 }
 0x19b   : >> { %v543_v0 = vsel %vm535_vm8, %v1266_v44, 64.0  ;;  %v544_v1 = vsel %vm536_vm9, %v1266_v44, 64.0 }
 0x19c   : >> { %v563_v2 = vsel %vm504_vm1, %v543_v0, inf  ;;  %v566_v5 = vsel %vm504_vm1, %v544_v1, inf }
 0x19d   : >> { %561 = vmin.xlane.f32.xlu1 %v560_v63  ;;  %564 = vmin.xlane.f32.xlu0 %v563_v2 }
 0x1a1   : >> { %567 = vmin.xlane.f32.xlu1 %v566_v5 }
 0x21a   : >> { %v547_v8 = vpop.xlane.xlu0 %546 }
 0x21b   : >> { %vm569_vm10 = vcmp.eq.f32.partialorder %v1266_v44, %v547_v8  ;;  %v840_v9 = vtrunc.f32 %v547_v8 }
 0x21c   : >> { %v577_v4 = vsel %vm569_vm10, 1e+30, %v1189_v4  }
 0x21d   : >> { %v841_v11 = vcvt.f32.s32 %v840_v9 }
 0x21e   : >> { %v553_v13 = vpop.xlane.xlu0 %552  ;;  %v550_v14 = vpop.xlane.xlu1 %549 }
 0x21f   : >> { %v595_v16 = vsel %vm1396_vm11, %v841_v11, %v1157_v33   ;;  %vm571_vm12 = vcmp.eq.f32.partialorder %v1266_v44, %v553_v13  ;;  %v844_v17 = vtrunc.f32 %v553_v13  ;;  %vm570_vm13 = vcmp.eq.f32.partialorder %v1266_v44, %v550_v14 }
 0x220   : >> { %v579_v3 = vsel %vm571_vm12, 1e+30, %v1181_v3   ;;  %v578_v12 = vsel %vm570_vm13, 1e+30, %v1185_v12   ;;  %v842_v18 = vtrunc.f32 %v550_v14  ;;  %604 = vst.msk [vmem:[%s1241_s20] sm:$0xff] (%p1440_p5), %vm603_vm3, %v595_v16 }
 0x221   : >> { %v845_v20 = vcvt.f32.s32 %v844_v17 }
 0x222   : >> { %v843_v21 = vcvt.f32.s32 %v842_v18  ;;  %v556_v22 = vpop.xlane.xlu1 %555  ;;  %v559_v24 = vpop.xlane.xlu0 %558 }
 0x223   : >> { %v597_v34 = vsel %vm1396_vm11, %v845_v20, %v1149_v31   ;;  %vm572_vm14 = vcmp.eq.f32.partialorder %v1266_v44, %v556_v22  ;;  %v846_v33 = vtrunc.f32 %v556_v22  ;;  %vm573_vm15 = vcmp.eq.f32.partialorder %v1266_v44, %v559_v24 }
 0x224   : >> { %v596_v35 = vsel %vm1396_vm11, %v843_v21, %v1153_v32   ;;  %v580_v6 = vsel %vm572_vm14, 1e+30, %v1177_v6   ;;  %v581_v19 = vsel %vm573_vm15, 1e+30, %v1173_v19   ;;  %v848_v36 = vtrunc.f32 %v559_v24  ;;  %606 = vst.msk [vmem:[%s1241_s20 + $0x10] sm:$0xff] (%p1440_p5), %vm603_vm3, %v597_v34 }
 0x225   : >> { %v847_v37 = vcvt.f32.s32 %v846_v33  ;;  %v1510_v33 = vmov %v595_v16  ;;  %605 = vst.msk [vmem:[%s1241_s20 + $0x8] sm:$0xff] (%p1440_p5), %vm603_vm3, %v596_v35 }
 0x226   : >> { %v849_v38 = vcvt.f32.s32 %v848_v36  ;;  %v562_v39 = vpop.xlane.xlu1 %561  ;;  %v565_v40 = vpop.xlane.xlu0 %564 }
 0x227   : >> { %v598_v41 = vsel %vm1396_vm11, %v847_v37, %v1145_v30   ;;  %vm574_vm0 = vcmp.eq.f32.partialorder %v1266_v44, %v562_v39  ;;  %v850_v31 = vtrunc.f32 %v562_v39  ;;  %vm575_vm1 = vcmp.eq.f32.partialorder %v1266_v44, %v565_v40 }
 0x228   : >> { %v599_v42 = vsel %vm1396_vm11, %v849_v38, %v1141_v29   ;;  %v582_v25 = vsel %vm574_vm0, 1e+30, %v1169_v25   ;;  %v583_v15 = vsel %vm575_vm1, 1e+30, %v1165_v15   ;;  %v852_v32 = vtrunc.f32 %v565_v40  ;;  %607 = vst.msk [vmem:[%s1241_s20 + $0x18] sm:$0xff] (%p1440_p5), %vm603_vm3, %v598_v41 }
 0x229   : >> { %v851_v45 = vcvt.f32.s32 %v850_v31  ;;  %v1508_v31 = vmov %v597_v34  ;;  %608 = vst.msk [vmem:[%s1241_s20 + $0x20] sm:$0xff] (%p1440_p5), %vm603_vm3, %v599_v42 }
 0x22a   : >> { %v853_v46 = vcvt.f32.s32 %v852_v32  ;;  %v568_v47 = vpop.xlane.xlu1 %567  ;;  %v1509_v32 = vmov %v596_v35 }
 0x22b   : >> { %v600_v48 = vsel %vm1396_vm11, %v851_v45, %v1137_v28   ;;  %vm576_vm2 = vcmp.eq.f32.partialorder %v1266_v44, %v568_v47  ;;  %v854_v30 = vtrunc.f32 %v568_v47 }
 0x22c   : >> { %v601_v49 = vsel %vm1396_vm11, %v853_v46, %v1133_v27   ;;  %v584_v23 = vsel %vm576_vm2, 1e+30, %v1161_v23   ;;  %v1505_v28 = vmov %v600_v48  ;;  %486 = sbr.rel (!%p1440_p5) target bundleno = 258 (0x102), region = 68  ;;  %609 = vst.msk [vmem:[%s1241_s20 + $0x28] sm:$0xff] (%p1440_p5), %vm603_vm3, %v600_v48 }
 0x22d   : >> { %v855_v29 = vcvt.f32.s32 %v854_v30  ;;  %v1504_v27 = vmov %v601_v49  ;;  %v1507_v30 = vmov %v598_v41  ;;  %610 = vst.msk [vmem:[%s1241_s20 + $0x30] sm:$0xff] (%p1440_p5), %vm603_vm3, %v601_v49 }
 0x22f   : >> { %v602_v50 = vsel %vm1396_vm11, %v855_v29, %v1129_v26   ;;  %v1506_v29 = vmov %v599_v42 }
 0x230   : >> { %v1503_v26 = vmov %v602_v50  ;;  %611 = vst.msk [vmem:[%s1241_s20 + $0x38] sm:$0xff] (%p1440_p5), %vm603_vm3, %v602_v50 }
 0x231 PF: > { %s12_s11 = sadd.s32 1, %s1125_s11   ;;  %s1511_s9 = smov %s1121_s10 }
 0x232   : > { %p9_p6 = scmp.ge.s32.totalorder %s12_s11, 4   ;;  %s1512_s10 = smov %s1514_s12 }
 0x234   :  { %11 = sbr.rel (!%p9_p6) target bundleno = 2 (0x2), region = 79 }

// kernel: pct_segmentation_forward.9
= control target key start
LH: loop header
LB: loop body
LE: loop exit
PB: predicated region body
PF: predicated region fallthrough
CT: control target
= control target key end

     0   :  { %vm78_vm0 = vcmask 1040384   ;;  %vm79_vm1 = vcmask 1041408   ;;  %v735_v1 = vmov 65535   ;;  %vm53_vm2 = vcmask 23552   ;;  %s915_s1 = inlined_call_operand.vmem [shape: bf16[3,128], index: 1, kind: input, shape index: {}]   ;;  %s916_s0 = inlined_call_operand.vmem [shape: f32[128,3], index: 0, kind: input, shape index: {}]   ;;  %s917_s3 = inlined_call_operand.vmem [shape: bf16[128,128], index: 3, kind: input, shape index: {}]   ;;  %s918_s2 = inlined_call_operand.vmem [shape: f32[1,128], index: 2, kind: input, shape index: {}]   ;;  %s919_s4 = inlined_call_operand.vmem [shape: f32[1,128], index: 4, kind: input, shape index: {}]   ;;  %s920_s5 = inlined_call_operand.vmem [shape: bf16[128,128], index: 5, kind: output, shape index: {}]  }
   0x1   :  { %v45_v0 = vld [vmem:[%s915_s1] sm:$0x3]  ;;  %v80_v2 = vsel %vm78_vm0, 4294967295, %v735_v1  ;;  %v22_v4 = vld [vmem:[%s916_s0 + $0x8] sm:$0xff]  ;;  %v23_v7 = vld [vmem:[%s916_s0 + $0x10] sm:$0xff] }
   0x2   :  { %v21_v3 = vld [vmem:[%s916_s0] sm:$0xff]  ;;  %v81_v5 = vsel %vm79_vm1, %v80_v2, 0  ;;  %v24_v8 = vld [vmem:[%s916_s0 + $0x18] sm:$0xff]  ;;  %v26_v11 = vld [vmem:[%s916_s0 + $0x28] sm:$0xff] }
   0x3   :  { %v37_v6 = vpack.c.bf16 %v22_v4, %v21_v3  ;;  %v83_v9 = vand.u32 %v81_v5, %v45_v0  ;;  %v25_v10 = vld [vmem:[%s916_s0 + $0x20] sm:$0xff]  ;;  %v38_v12 = vpack.c.bf16 %v24_v8, %v23_v7  ;;  %v727_v14 = vld [vmem:[%s917_s3 + $0x38] sm:$0xff]   ;;  %v27_v15 = vld [vmem:[%s916_s0 + $0x30] sm:$0xff] }
   0x4   :  { %v39_v13 = vpack.c.bf16 %v26_v11, %v25_v10  ;;  %v28_v16 = vld [vmem:[%s916_s0 + $0x38] sm:$0xff]  ;;  %v728_v17 = vld [vmem:[%s917_s3 + $0x30] sm:$0xff]   ;;  %v29_v18 = vld [vmem:[%s916_s0 + $0x40] sm:$0xff]  ;;  %710 = vmatprep.subr.bf16.mxu1 %v727_v14 }
   0x5   :  { %662 = vmatprep.mubr.msk.bf16.mxu0 %vm53_vm2, %v37_v6  ;;  %660 = vmatprep.subr.bf16.mxu0 %v83_v9  ;;  %v30_v19 = vld [vmem:[%s916_s0 + $0x48] sm:$0xff]  ;;  %v40_v21 = vpack.c.bf16 %v28_v16, %v27_v15  ;;  %v730_v23 = vld [vmem:[%s917_s3 + $0x20] sm:$0xff]   ;;  %v31_v24 = vld [vmem:[%s916_s0 + $0x50] sm:$0xff] }
   0x6   :  { %661 = vmatpush3.bf16.msra.mxu0 %v83_v9  ;;  %v729_v20 = vld [vmem:[%s917_s3 + $0x28] sm:$0xff]   ;;  %718 = vmatpush3.bf16.msra.mxu1 %v727_v14  ;;  %v41_v22 = vpack.c.bf16 %v30_v19, %v29_v18  ;;  %v32_v25 = vld [vmem:[%s916_s0 + $0x58] sm:$0xff]  ;;  %v33_v26 = vld [vmem:[%s916_s0 + $0x60] sm:$0xff] }
   0x7   :  { %678 = vmatprep.subr.bf16.mxu0 %v727_v14  ;;  %711 = vmatprep.subr.bf16.mxu1 %v728_v17  ;;  %v34_v27 = vld [vmem:[%s916_s0 + $0x68] sm:$0xff]  ;;  %v731_v28 = vld [vmem:[%s917_s3 + $0x18] sm:$0xff]   ;;  %v42_v29 = vpack.c.bf16 %v32_v25, %v31_v24  ;;  %v35_v31 = vld [vmem:[%s916_s0 + $0x70] sm:$0xff] }
   0x8   :  { %v43_v30 = vpack.c.bf16 %v34_v27, %v33_v26  ;;  %v36_v32 = vld [vmem:[%s916_s0 + $0x78] sm:$0xff]  ;;  %v732_v34 = vld [vmem:[%s917_s3 + $0x10] sm:$0xff]   ;;  %v733_v35 = vld [vmem:[%s917_s3 + $0x8] sm:$0xff]  }
   0x9   :  { %663 = vmatmul.mubr.msk.bf16.vlgmr.msra.gmra.mxu0 %vm53_vm2, %v38_v12  ;;  %v44_v33 = vpack.c.bf16 %v36_v32, %v35_v31  ;;  %v734_v36 = vld [vmem:[%s917_s3] sm:$0xff]  }
   0xa   :  { %666 = vmatprep.mubr.msk.bf16.mxu0 %vm53_vm2, %v39_v13  ;;  %679 = vmatpush3.bf16.msra.mxu0 %v727_v14  ;;  %v852_v38 = vld [vmem:[%s918_s2] ss:$0 sm:$0xff] }
   0xb   :  { %680 = vmatprep.subr.bf16.mxu0 %v728_v17  ;;  %719 = vmatpush3.bf16.msra.mxu1 %v728_v17 }
   0xc   :  { %712 = vmatprep.subr.bf16.mxu1 %v729_v20 }
   0xe   :  { %681 = vmatpush3.bf16.msra.mxu0 %v728_v17 }
   0xf   :  { %682 = vmatprep.subr.bf16.mxu0 %v729_v20  ;;  %720 = vmatpush3.bf16.msra.mxu1 %v729_v20 }
  0x10   :  { %713 = vmatprep.subr.bf16.mxu1 %v730_v23 }
  0x11   :  { %667 = vmatmul.mubr.msk.bf16.gmra.mxu0 %vm53_vm2, %v40_v21 }
  0x12   :  { %670 = vmatprep.mubr.msk.bf16.mxu0 %vm53_vm2, %v41_v22  ;;  %683 = vmatpush3.bf16.msra.mxu0 %v729_v20 }
  0x13   :  { %684 = vmatprep.subr.bf16.mxu0 %v730_v23  ;;  %721 = vmatpush3.bf16.msra.mxu1 %v730_v23 }
  0x14   :  { %714 = vmatprep.subr.bf16.mxu1 %v731_v28 }
  0x16   :  { %685 = vmatpush3.bf16.msra.mxu0 %v730_v23 }
  0x17   :  { %686 = vmatprep.subr.bf16.mxu0 %v731_v28  ;;  %722 = vmatpush3.bf16.msra.mxu1 %v731_v28 }
  0x18   :  { %715 = vmatprep.subr.bf16.mxu1 %v732_v34 }
  0x19   :  { %671 = vmatmul.mubr.msk.bf16.gmra.mxu0 %vm53_vm2, %v42_v29 }
  0x1a   :  { %674 = vmatprep.mubr.msk.bf16.mxu0 %vm53_vm2, %v43_v30  ;;  %687 = vmatpush3.bf16.msra.mxu0 %v731_v28 }
  0x1b   :  { %688 = vmatprep.subr.bf16.mxu0 %v732_v34  ;;  %723 = vmatpush3.bf16.msra.mxu1 %v732_v34 }
  0x1c   :  { %716 = vmatprep.subr.bf16.mxu1 %v733_v35 }
  0x1e   :  { %689 = vmatpush3.bf16.msra.mxu0 %v732_v34 }
  0x1f   :  { %690 = vmatprep.subr.bf16.mxu0 %v733_v35  ;;  %724 = vmatpush3.bf16.msra.mxu1 %v733_v35 }
  0x20   :  { %717 = vmatprep.subr.bf16.mxu1 %v734_v36 }
  0x21   :  { %675 = vmatmul.mubr.msk.bf16.gmra.mxu0 %vm53_vm2, %v44_v33 }
  0x22   :  { %691 = vmatpush3.bf16.msra.mxu0 %v733_v35 }
  0x23   :  { %692 = vmatprep.subr.bf16.mxu0 %v734_v36  ;;  %725 = vmatpush3.bf16.msra.mxu1 %v734_v36 }
  0x26   :  { %693 = vmatpush3.bf16.msra.mxu0 %v734_v36 }
  0xc9   :  { %v664_v37 = vpop.f32.mrf.mxu0 }
  0xca   :  { %v128_v41 = vadd.f32 %v664_v37, %v852_v38 }
  0xcb   :  { %v119_v39 = vpop.f32.mrf.mxu0 }
  0xcc   :  { %v120_v40 = vadd.f32 %v852_v38, %v119_v39  ;;  %v200_v48 = vmul.f32 0.01, %v128_v41  ;;  %vm184_vm5 = vcmp.ge.f32.partialorder %v128_v41, 0.0 }
  0xcd   :  { %v665_v42 = vpop.f32.mrf.mxu0 }
  0xce   :  { %v131_v43 = vadd.f32 %v665_v42, %v852_v38  ;;  %v198_v45 = vmul.f32 0.01, %v120_v40  ;;  %vm182_vm4 = vcmp.ge.f32.partialorder %v120_v40, 0.0  ;;  %v216_v56 = vsel %vm184_vm5, %v128_v41, %v200_v48 }
  0xcf   :  { %v122_v44 = vpop.f32.mrf.mxu0 }
  0xd0   :  { %vm185_vm3 = vcmp.ge.f32.partialorder %v131_v43, 0.0  ;;  %v201_v46 = vmul.f32 0.01, %v131_v43  ;;  %v123_v47 = vadd.f32 %v852_v38, %v122_v44  ;;  %v214_v54 = vsel %vm182_vm4, %v120_v40, %v198_v45 }
  0xd1   :  { %v668_v49 = vpop.f32.mrf.mxu0 }
  0xd2   :  { %vm183_vm6 = vcmp.ge.f32.partialorder %v123_v47, 0.0  ;;  %v199_v50 = vmul.f32 0.01, %v123_v47  ;;  %v217_v51 = vsel %vm185_vm3, %v131_v43, %v201_v46  ;;  %v144_v57 = vadd.f32 %v668_v49, %v852_v38 }
  0xd3   :  { %v135_v52 = vpop.f32.mrf.mxu0  ;;  %v231_v60 = vpack.c.bf16 %v217_v51, %v216_v56 }
  0xd4   :  { %v136_v53 = vadd.f32 %v852_v38, %v135_v52  ;;  %v215_v55 = vsel %vm183_vm6, %v123_v47, %v199_v50  ;;  %v204_v2 = vmul.f32 0.01, %v144_v57  ;;  %vm188_vm9 = vcmp.ge.f32.partialorder %v144_v57, 0.0  ;;  %v873_v47 = vld [vmem:[%s919_s4] ss:$0 sm:$0xff] }
  0xd5   :  { %v669_v58 = vpop.f32.mrf.mxu0  ;;  %v230_v59 = vpack.c.bf16 %v215_v55, %v214_v54 }
  0xd6   :  { %v147_v61 = vadd.f32 %v669_v58, %v852_v38  ;;  %v202_v63 = vmul.f32 0.01, %v136_v53  ;;  %vm186_vm8 = vcmp.ge.f32.partialorder %v136_v53, 0.0  ;;  %v220_v13 = vsel %vm188_vm9, %v144_v57, %v204_v2 }
  0xd7   :  { %v138_v62 = vpop.f32.mrf.mxu0  ;;  %694 = vmatprep.mubr.bf16.mxu0 %v230_v59 }
  0xd8   :  { %vm189_vm7 = vcmp.ge.f32.partialorder %v147_v61, 0.0  ;;  %v205_v0 = vmul.f32 0.01, %v147_v61  ;;  %v139_v1 = vadd.f32 %v852_v38, %v138_v62  ;;  %695 = vmatmul.mubr.bf16.vlgmr.msra.gmra.mxu0 %v231_v60  ;;  %v218_v8 = vsel %vm186_vm8, %v136_v53, %v202_v63 }
  0xd9   :  { %v672_v3 = vpop.f32.mrf.mxu0 }
  0xda   :  { %v203_v4 = vmul.f32 0.01, %v139_v1  ;;  %vm187_vm10 = vcmp.ge.f32.partialorder %v139_v1, 0.0  ;;  %v221_v6 = vsel %vm189_vm7, %v147_v61, %v205_v0  ;;  %v160_v10 = vadd.f32 %v672_v3, %v852_v38 }
  0xdb   :  { %v151_v5 = vpop.f32.mrf.mxu0  ;;  %v233_v15 = vpack.c.bf16 %v221_v6, %v220_v13 }
  0xdc   :  { %v152_v7 = vadd.f32 %v852_v38, %v151_v5  ;;  %v219_v9 = vsel %vm187_vm10, %v139_v1, %v203_v4  ;;  %v208_v20 = vmul.f32 0.01, %v160_v10  ;;  %vm192_vm13 = vcmp.ge.f32.partialorder %v160_v10, 0.0 }
  0xdd   :  { %v673_v11 = vpop.f32.mrf.mxu0  ;;  %v232_v12 = vpack.c.bf16 %v219_v9, %v218_v8 }
  0xde   :  { %v163_v14 = vadd.f32 %v673_v11, %v852_v38  ;;  %v206_v17 = vmul.f32 0.01, %v152_v7  ;;  %vm190_vm12 = vcmp.ge.f32.partialorder %v152_v7, 0.0  ;;  %v224_v31 = vsel %vm192_vm13, %v160_v10, %v208_v20 }
  0xdf   :  { %v154_v16 = vpop.f32.mrf.mxu0  ;;  %698 = vmatprep.mubr.bf16.mxu1 %v232_v12 }
  0xe0   :  { %vm193_vm11 = vcmp.ge.f32.partialorder %v163_v14, 0.0  ;;  %v209_v18 = vmul.f32 0.01, %v163_v14  ;;  %v155_v19 = vadd.f32 %v852_v38, %v154_v16  ;;  %699 = vmatmul.mubr.bf16.vlgmr.msra.gmra.mxu1 %v233_v15  ;;  %v222_v26 = vsel %vm190_vm12, %v152_v7, %v206_v17 }
  0xe1   :  { %v676_v21 = vpop.f32.mrf.mxu0 }
  0xe2   :  { %vm191_vm14 = vcmp.ge.f32.partialorder %v155_v19, 0.0  ;;  %v207_v22 = vmul.f32 0.01, %v155_v19  ;;  %v225_v24 = vsel %vm193_vm11, %v163_v14, %v209_v18  ;;  %v176_v28 = vadd.f32 %v676_v21, %v852_v38 }
  0xe3   :  { %v167_v23 = vpop.f32.mrf.mxu0  ;;  %v235_v33 = vpack.c.bf16 %v225_v24, %v224_v31 }
  0xe4   :  { %v168_v25 = vadd.f32 %v852_v38, %v167_v23  ;;  %v223_v27 = vsel %vm191_vm14, %v155_v19, %v207_v22  ;;  %v212_v39 = vmul.f32 0.01, %v176_v28  ;;  %vm196_vm1 = vcmp.ge.f32.partialorder %v176_v28, 0.0 }
  0xe5   :  { %v677_v29 = vpop.f32.mrf.mxu0  ;;  %v234_v30 = vpack.c.bf16 %v223_v27, %v222_v26 }
  0xe6   :  { %v179_v32 = vadd.f32 %v677_v29, %v852_v38  ;;  %v210_v35 = vmul.f32 0.01, %v168_v25  ;;  %vm194_vm0 = vcmp.ge.f32.partialorder %v168_v25, 0.0  ;;  %v228_v45 = vsel %vm196_vm1, %v176_v28, %v212_v39 }
  0xe7   :  { %v170_v34 = vpop.f32.mrf.mxu0  ;;  %702 = vmatprep.mubr.bf16.mxu1 %v234_v30 }
  0xe8   :  { %vm197_vm15 = vcmp.ge.f32.partialorder %v179_v32, 0.0  ;;  %v213_v36 = vmul.f32 0.01, %v179_v32  ;;  %v171_v37 = vadd.f32 %v852_v38, %v170_v34  ;;  %703 = vmatmul.mubr.bf16.gmra.mxu1 %v235_v33  ;;  %v226_v42 = vsel %vm194_vm0, %v168_v25, %v210_v35 }
  0xea   :  { %vm195_vm2 = vcmp.ge.f32.partialorder %v171_v37, 0.0  ;;  %v211_v40 = vmul.f32 0.01, %v171_v37  ;;  %v229_v41 = vsel %vm197_vm15, %v179_v32, %v213_v36 }
  0xeb   :  { %v237_v46 = vpack.c.bf16 %v229_v41, %v228_v45 }
  0xec   :  { %v227_v43 = vsel %vm195_vm2, %v171_v37, %v211_v40 }
  0xed   :  { %v236_v44 = vpack.c.bf16 %v227_v43, %v226_v42 }
  0xef   :  { %706 = vmatprep.mubr.bf16.mxu1 %v236_v44 }
  0xf0   :  { %707 = vmatmul.mubr.bf16.gmra.mxu1 %v237_v46 }
 0x198   :  { %v696_v38 = vpop.f32.mrf.mxu0 }
 0x199   :  { %v352_v48 = vadd.f32 %v696_v38, %v873_v47 }
 0x19a   :  { %v343_v49 = vpop.f32.mrf.mxu0 }
 0x19b   :  { %v344_v50 = vadd.f32 %v873_v47, %v343_v49  ;;  %v424_v51 = vmul.f32 0.01, %v352_v48  ;;  %vm408_vm3 = vcmp.ge.f32.partialorder %v352_v48, 0.0 }
 0x19c   :  { %v697_v52 = vpop.f32.mrf.mxu0 }
 0x19d   :  { %v355_v53 = vadd.f32 %v697_v52, %v873_v47  ;;  %v422_v55 = vmul.f32 0.01, %v344_v50  ;;  %v440_v58 = vsel %vm408_vm3, %v352_v48, %v424_v51  ;;  %vm406_vm5 = vcmp.ge.f32.partialorder %v344_v50, 0.0 }
 0x19e   :  { %v346_v54 = vpop.f32.mrf.mxu0 }
 0x19f   :  { %vm409_vm4 = vcmp.ge.f32.partialorder %v355_v53, 0.0  ;;  %v425_v56 = vmul.f32 0.01, %v355_v53  ;;  %v347_v57 = vadd.f32 %v873_v47, %v346_v54  ;;  %v438_v1 = vsel %vm406_vm5, %v344_v50, %v422_v55 }
 0x1a0   :  { %v700_v59 = vpop.f32.mrf.mxu1 }
 0x1a1   :  { %v441_v60 = vsel %vm409_vm4, %v355_v53, %v425_v56  ;;  %vm407_vm6 = vcmp.ge.f32.partialorder %v347_v57, 0.0  ;;  %v423_v61 = vmul.f32 0.01, %v347_v57  ;;  %v368_v62 = vadd.f32 %v700_v59, %v873_v47 }
 0x1a2   :  { %v596_v63 = vpack.c.bf16 %v441_v60, %v440_v58  ;;  %v359_v0 = vpop.f32.mrf.mxu1 }
 0x1a3   :  { %v439_v2 = vsel %vm407_vm6, %v347_v57, %v423_v61  ;;  %v360_v3 = vadd.f32 %v873_v47, %v359_v0  ;;  %v428_v5 = vmul.f32 0.01, %v368_v62  ;;  %vm412_vm7 = vcmp.ge.f32.partialorder %v368_v62, 0.0 }
 0x1a4   :  { %628 = vst [vmem:[%s920_s5 + $0x8] sm:$0xff] %v596_v63   ;;  %v591_v4 = vpack.c.bf16 %v439_v2, %v438_v1  ;;  %v701_v6 = vpop.f32.mrf.mxu1 }
 0x1a5   :  { %v371_v7 = vadd.f32 %v701_v6, %v873_v47  ;;  %v426_v9 = vmul.f32 0.01, %v360_v3  ;;  %v444_v12 = vsel %vm412_vm7, %v368_v62, %v428_v5  ;;  %vm410_vm9 = vcmp.ge.f32.partialorder %v360_v3, 0.0 }
 0x1a6   :  { %592 = vst [vmem:[%s920_s5] sm:$0xff] %v591_v4   ;;  %v362_v8 = vpop.f32.mrf.mxu1 }
 0x1a7   :  { %vm413_vm8 = vcmp.ge.f32.partialorder %v371_v7, 0.0  ;;  %v429_v10 = vmul.f32 0.01, %v371_v7  ;;  %v363_v11 = vadd.f32 %v873_v47, %v362_v8  ;;  %v442_v19 = vsel %vm410_vm9, %v360_v3, %v426_v9 }
 0x1a8   :  { %v704_v13 = vpop.f32.mrf.mxu1 }
 0x1a9   :  { %v445_v14 = vsel %vm413_vm8, %v371_v7, %v429_v10  ;;  %vm411_vm10 = vcmp.ge.f32.partialorder %v363_v11, 0.0  ;;  %v427_v15 = vmul.f32 0.01, %v363_v11  ;;  %v384_v16 = vadd.f32 %v704_v13, %v873_v47 }
 0x1aa   :  { %v606_v17 = vpack.c.bf16 %v445_v14, %v444_v12  ;;  %v375_v18 = vpop.f32.mrf.mxu1 }
 0x1ab   :  { %v443_v20 = vsel %vm411_vm10, %v363_v11, %v427_v15  ;;  %v376_v21 = vadd.f32 %v873_v47, %v375_v18  ;;  %v432_v23 = vmul.f32 0.01, %v384_v16  ;;  %vm416_vm11 = vcmp.ge.f32.partialorder %v384_v16, 0.0 }
 0x1ac   :  { %630 = vst [vmem:[%s920_s5 + $0x18] sm:$0xff] %v606_v17   ;;  %v601_v22 = vpack.c.bf16 %v443_v20, %v442_v19  ;;  %v705_v24 = vpop.f32.mrf.mxu1 }
 0x1ad   :  { %v387_v25 = vadd.f32 %v705_v24, %v873_v47  ;;  %v430_v27 = vmul.f32 0.01, %v376_v21  ;;  %v448_v30 = vsel %vm416_vm11, %v384_v16, %v432_v23  ;;  %vm414_vm13 = vcmp.ge.f32.partialorder %v376_v21, 0.0 }
 0x1ae   :  { %629 = vst [vmem:[%s920_s5 + $0x10] sm:$0xff] %v601_v22   ;;  %v378_v26 = vpop.f32.mrf.mxu1 }
 0x1af   :  { %vm417_vm12 = vcmp.ge.f32.partialorder %v387_v25, 0.0  ;;  %v433_v28 = vmul.f32 0.01, %v387_v25  ;;  %v379_v29 = vadd.f32 %v873_v47, %v378_v26  ;;  %v446_v37 = vsel %vm414_vm13, %v376_v21, %v430_v27 }
 0x1b0   :  { %v708_v31 = vpop.f32.mrf.mxu1 }
 0x1b1   :  { %v449_v32 = vsel %vm417_vm12, %v387_v25, %v433_v28  ;;  %vm415_vm14 = vcmp.ge.f32.partialorder %v379_v29, 0.0  ;;  %v431_v33 = vmul.f32 0.01, %v379_v29  ;;  %v400_v34 = vadd.f32 %v708_v31, %v873_v47 }
 0x1b2   :  { %v616_v35 = vpack.c.bf16 %v449_v32, %v448_v30  ;;  %v391_v36 = vpop.f32.mrf.mxu1 }
 0x1b3   :  { %v447_v39 = vsel %vm415_vm14, %v379_v29, %v431_v33  ;;  %v392_v40 = vadd.f32 %v873_v47, %v391_v36  ;;  %v436_v43 = vmul.f32 0.01, %v400_v34  ;;  %vm420_vm15 = vcmp.ge.f32.partialorder %v400_v34, 0.0 }
 0x1b4   :  { %632 = vst [vmem:[%s920_s5 + $0x28] sm:$0xff] %v616_v35   ;;  %v611_v41 = vpack.c.bf16 %v447_v39, %v446_v37  ;;  %v709_v42 = vpop.f32.mrf.mxu1 }
 0x1b5   :  { %v403_v44 = vadd.f32 %v709_v42, %v873_v47  ;;  %v434_v46 = vmul.f32 0.01, %v392_v40  ;;  %vm418_vm1 = vcmp.ge.f32.partialorder %v392_v40, 0.0  ;;  %v452_v49 = vsel %vm420_vm15, %v400_v34, %v436_v43 }
 0x1b6   :  { %631 = vst [vmem:[%s920_s5 + $0x20] sm:$0xff] %v611_v41   ;;  %v394_v45 = vpop.f32.mrf.mxu1 }
 0x1b7   :  { %vm421_vm0 = vcmp.ge.f32.partialorder %v403_v44, 0.0  ;;  %v437_v38 = vmul.f32 0.01, %v403_v44  ;;  %v395_v48 = vadd.f32 %v873_v47, %v394_v45  ;;  %v450_v53 = vsel %vm418_vm1, %v392_v40, %v434_v46 }
 0x1b9   :  { %v453_v50 = vsel %vm421_vm0, %v403_v44, %v437_v38  ;;  %vm419_vm2 = vcmp.ge.f32.partialorder %v395_v48, 0.0  ;;  %v435_v51 = vmul.f32 0.01, %v395_v48 }
 0x1ba   :  { %v626_v52 = vpack.c.bf16 %v453_v50, %v452_v49 }
 0x1bb   :  { %v451_v54 = vsel %vm419_vm2, %v395_v48, %v435_v51 }
 0x1bc   :  { %634 = vst [vmem:[%s920_s5 + $0x38] sm:$0xff] %v626_v52   ;;  %v621_v55 = vpack.c.bf16 %v451_v54, %v450_v53 }
 0x1be   :  { %633 = vst [vmem:[%s920_s5 + $0x30] sm:$0xff] %v621_v55  }

// kernel: pct_segmentation_forward.12
= control target key start
LH: loop header
LB: loop body
LE: loop exit
PB: predicated region body
PF: predicated region fallthrough
CT: control target
= control target key end

     0   :  { %s1430_s18 = smov 0   ;;  %s1607_s0 = inlined_call_operand.vmem [shape: bf16[2,64,128], index: 0, kind: input, shape index: {}]   ;;  %s1608_s1 = inlined_call_operand.vmem [shape: bf16[128,128], index: 1, kind: input, shape index: {}]   ;;  %s1609_s2 = inlined_call_operand.vmem [shape: bf16[128,128], index: 2, kind: input, shape index: {}]   ;;  %s1610_s3 = inlined_call_operand.vmem [shape: bf16[128,128], index: 3, kind: input, shape index: {}]   ;;  %s1611_s4 = inlined_call_operand.vmem [shape: f32[1,128], index: 4, kind: input, shape index: {}]   ;;  %s1612_s5 = inlined_call_operand.vmem [shape: bf16[2,64,128], index: 5, kind: output, shape index: {}]  }
   0x1 LB: > { %s1077_s19 = sadd.s32 4294967295, %s1398_s18   ;;  %p1081_p0 = scmp.ge.s32.totalorder %s1398_s18, 1  ;;  %s1398_s18 = sphi %s1430_s18, %s15_s18  }
   0x2   : > { %p187_p1 = scmp.lt.s32.totalorder %s1398_s18, 3 }
   0x4   : > { %p188_p2 = pnand %p1081_p0, %p187_p1 }
   0x5   : > { %p215_p3 = scmp.lt.s32.totalorder (!%p188_p2), %s1077_s19, 1 }
   0x6   : > { %191 = sbr.rel (%p188_p2) target bundleno = 1120 (0x460), region = 40 }
   0xb   : > { %v1326_v0 = vld [vmem:[%s1608_s1 + $0x38] sm:$0xff]   ;;  %v1327_v1 = vld [vmem:[%s1608_s1 + $0x30] sm:$0xff]   ;;  %s1614_s19 = smov (!%p215_p3, %s1077_s19), 1  ;;  %v1328_v2 = vld [vmem:[%s1608_s1 + $0x28] sm:$0xff]   ;;  %vm585_vm0 = vcmask 523264  }
   0xc   : > { %1214 = vmatprep.subr.bf16.mxu0 %v1326_v0  ;;  %s1129_s26 = sshll.u32 %s1614_s19, 5  ;;  %v1329_v3 = vld [vmem:[%s1608_s1 + $0x20] sm:$0xff]   ;;  %v1330_v7 = vld [vmem:[%s1608_s1 + $0x18] sm:$0xff]   ;;  %v1331_v8 = vld [vmem:[%s1608_s1 + $0x10] sm:$0xff]  }
   0xd   : > { %1215 = vmatpush3.bf16.msra.mxu0 %v1326_v0  ;;  %s219_s29 = scalar_lea.vmem %s1607_s0, %s1129_s26  ;;  %v1332_v10 = vld [vmem:[%s1608_s1 + $0x8] sm:$0xff]   ;;  %v1333_v11 = vld [vmem:[%s1608_s1] sm:$0xff]   ;;  %v1338_v12 = vld [vmem:[%s1609_s2 + $0x38] sm:$0xff]   ;;  %s1592_s7 = scalar_lea.vmem %s1612_s5, %s1129_s26 }
   0xe   : > { %1216 = vmatprep.subr.bf16.mxu0 %v1327_v1  ;;  %v1458_v4 = vld [vmem:[%s219_s29] sm:$0xff]   ;;  %v1460_v5 = vld [vmem:[%s219_s29 + $0x10] sm:$0xff]   ;;  %v1462_v6 = vld [vmem:[%s219_s29 + $0x18] sm:$0xff]  }
   0xf   : > { %1230 = vmatprep.mubr.bf16.mxu0 %v1458_v4  ;;  %1238 = vmatprep.subr.bf16.mxu1 %v1462_v6  ;;  %v1474_v9 = vld [vmem:[%s219_s29 + $0x8] sm:$0xff]   ;;  %v1339_v13 = vld [vmem:[%s1609_s2 + $0x30] sm:$0xff]   ;;  %v1341_v15 = vld [vmem:[%s1609_s2 + $0x20] sm:$0xff]  }
  0x10   : > { %1239 = vmatpush3.bf16.xpose.msra.mxu1 %v1462_v6  ;;  %v1340_v14 = vld [vmem:[%s1609_s2 + $0x28] sm:$0xff]   ;;  %v1342_v16 = vld [vmem:[%s1609_s2 + $0x18] sm:$0xff]   ;;  %v1343_v17 = vld [vmem:[%s1609_s2 + $0x10] sm:$0xff]  }
  0x11   : > { %1217 = vmatpush3.bf16.msra.mxu0 %v1327_v1  ;;  %1240 = vmatprep.subr.bf16.mxu1 %v1460_v5  ;;  %v1344_v30 = vld [vmem:[%s1609_s2 + $0x8] sm:$0xff]   ;;  %v1345_v31 = vld [vmem:[%s1609_s2] sm:$0xff]  }
  0x12   : > { %1218 = vmatprep.subr.bf16.mxu0 %v1328_v2 }
  0x15   : > { %1219 = vmatpush3.bf16.msra.mxu0 %v1328_v2 }
  0x16   : > { %1220 = vmatprep.subr.bf16.mxu0 %v1329_v3 }
  0x18   : > { %1241 = vmatpush3.bf16.xpose.msra.mxu1 %v1460_v5 }
  0x19   : > { %1221 = vmatpush3.bf16.msra.mxu0 %v1329_v3  ;;  %1242 = vmatprep.subr.bf16.mxu1 %v1474_v9 }
  0x1a   : > { %1222 = vmatprep.subr.bf16.mxu0 %v1330_v7 }
  0x1d   : > { %1223 = vmatpush3.bf16.msra.mxu0 %v1330_v7 }
  0x1e   : > { %1224 = vmatprep.subr.bf16.mxu0 %v1331_v8 }
  0x20   : > { %1243 = vmatpush3.bf16.xpose.msra.mxu1 %v1474_v9 }
  0x21   : > { %1225 = vmatpush3.bf16.msra.mxu0 %v1331_v8  ;;  %1244 = vmatprep.subr.bf16.mxu1 %v1458_v4 }
  0x22   : > { %1226 = vmatprep.subr.bf16.mxu0 %v1332_v10 }
  0x25   : > { %1227 = vmatpush3.bf16.msra.mxu0 %v1332_v10 }
  0x26   : > { %1228 = vmatprep.subr.bf16.mxu0 %v1333_v11 }
  0x28   : > { %1245 = vmatpush3.bf16.xpose.msra.mxu1 %v1458_v4 }
  0x29   : > { %1229 = vmatpush3.bf16.msra.mxu0 %v1333_v11 }
  0x2a   : > { %1254 = vmatprep.subr.bf16.mxu0 %v1338_v12 }
  0x2c   : > { %1231 = vmatmul.mubr.bf16.vlgmr.msra.gmra.mxu0 %v1474_v9 }
  0x2d   : > { %1234 = vmatprep.mubr.bf16.mxu0 %v1460_v5  ;;  %1255 = vmatpush3.bf16.msra.mxu0 %v1338_v12 }
  0x2e   : > { %1256 = vmatprep.subr.bf16.mxu0 %v1339_v13 }
  0x31   : > { %1257 = vmatpush3.bf16.msra.mxu0 %v1339_v13 }
  0x32   : > { %1258 = vmatprep.subr.bf16.mxu0 %v1340_v14 }
  0x34   : > { %1235 = vmatmul.mubr.bf16.gmra.mxu0 %v1462_v6 }
  0x35   : > { %1270 = vmatprep.mubr.bf16.mxu0 %v1458_v4  ;;  %1259 = vmatpush3.bf16.msra.mxu0 %v1340_v14 }
  0x36   : > { %1260 = vmatprep.subr.bf16.mxu0 %v1341_v15 }
  0x39   : > { %1261 = vmatpush3.bf16.msra.mxu0 %v1341_v15 }
  0x3a   : > { %1262 = vmatprep.subr.bf16.mxu0 %v1342_v16 }
  0x3d   : > { %1263 = vmatpush3.bf16.msra.mxu0 %v1342_v16 }
  0x3e   : > { %1264 = vmatprep.subr.bf16.mxu0 %v1343_v17 }
  0x41   : > { %1265 = vmatpush3.bf16.msra.mxu0 %v1343_v17 }
  0x42   : > { %1266 = vmatprep.subr.bf16.mxu0 %v1344_v30 }
  0x45   : > { %1267 = vmatpush3.bf16.msra.mxu0 %v1344_v30 }
  0x46   : > { %1268 = vmatprep.subr.bf16.mxu0 %v1345_v31 }
  0x49   : > { %1269 = vmatpush3.bf16.msra.mxu0 %v1345_v31 }
  0x4c   : > { %1271 = vmatmul.mubr.bf16.vlgmr.msra.gmra.mxu0 %v1474_v9 }
  0x4d   : > { %1274 = vmatprep.mubr.bf16.mxu0 %v1460_v5 }
  0x54   : > { %1275 = vmatmul.mubr.bf16.gmra.mxu0 %v1462_v6 }
  0xec   : > { %v1232_v18 = vpop.f32.mrf.mxu0 }
  0xee   : > { %v356_v19 = vpop.f32.mrf.mxu0 }
  0xf0   : > { %v1233_v20 = vpop.f32.mrf.mxu0 }
  0xf1   : > { %v388_v23 = vpack.c.bf16 %v1233_v20, %v1232_v18 }
  0xf2   : > { %v359_v21 = vpop.f32.mrf.mxu0 }
  0xf3   : > { %v387_v22 = vpack.c.bf16 %v359_v21, %v356_v19 }
  0xf4   : > { %v1236_v24 = vpop.f32.mrf.mxu0 }
  0xf5   : > { %1246 = vmatprep.mubr.bf16.mxu1 %v387_v22 }
  0xf6   : > { %v372_v25 = vpop.f32.mrf.mxu0  ;;  %1247 = vmatmul.mubr.bf16.vlgmr.msra.gmra.mxu1 %v388_v23 }
  0xf8   : > { %v1237_v26 = vpop.f32.mrf.mxu0 }
  0xf9   : > { %v390_v29 = vpack.c.bf16 %v1237_v26, %v1236_v24 }
  0xfa   : > { %v375_v27 = vpop.f32.mrf.mxu0 }
  0xfb   : > { %v389_v28 = vpack.c.bf16 %v375_v27, %v372_v25 }
  0xfd   : > { %1250 = vmatprep.mubr.bf16.mxu1 %v389_v28 }
  0xfe   : > { %1251 = vmatmul.mubr.bf16.gmra.mxu1 %v390_v29 }
 0x1b6   : > { %v1248_v32 = vpop.f32.mrf.mxu1 }
 0x1b7   : > { %v588_v45 = vsel %vm585_vm0, %v1248_v32, -inf }
 0x1b8   : > { %v425_v33 = vpop.f32.mrf.mxu1 }
 0x1b9   : > { %v586_v46 = vsel %vm585_vm0, %v425_v33, -inf }
 0x1ba   : > { %v1249_v34 = vpop.f32.mrf.mxu1 }
 0x1bb   : > { %v589_v39 = vsel %vm585_vm0, %v1249_v34, -inf }
 0x1bc   : > { %v428_v35 = vpop.f32.mrf.mxu1 }
 0x1bd   : > { %v587_v47 = vsel %vm585_vm0, %v428_v35, -inf }
 0x1be   : > { %v1252_v36 = vpop.f32.mrf.mxu1 }
 0x1bf   : > { %v594_v40 = vsel %vm585_vm0, %v1252_v36, -inf }
 0x1c0   : > { %v441_v37 = vpop.f32.mrf.mxu1  ;;  %v595_v49 = vmax.f32 %v588_v45, %v594_v40 }
 0x1c1   : > { %v590_v41 = vsel %vm585_vm0, %v441_v37, -inf }
 0x1c2   : > { %v1253_v38 = vpop.f32.mrf.mxu1  ;;  %v591_v50 = vmax.f32 %v586_v46, %v590_v41 }
 0x1c3   : > { %v596_v42 = vsel %vm585_vm0, %v1253_v38, -inf }
 0x1c4   : > { %v597_v43 = vmax.f32 %v589_v39, %v596_v42  ;;  %v444_v44 = vpop.f32.mrf.mxu1  ;;  %v1272_v42 = vpop.f32.mrf.mxu0 }
 0x1c5   : > { %v592_v48 = vsel %vm585_vm0, %v444_v44, -inf }
 0x1c6   : > { %v593_v51 = vmax.f32 %v587_v47, %v592_v48  ;;  %v599_v52 = vmax.f32 %v595_v49, %v597_v43 }
 0x1c8   : > { %v598_v53 = vmax.f32 %v591_v50, %v593_v51 }
 0x1ca   : > { %v600_v54 = vmax.f32 %v598_v53, %v599_v52 }
 0x1cc   : > { %v601_v55 = vrot.slane %v600_v54, 4 }
 0x1ce   : > { %v602_v56 = vmax.f32 %v600_v54, %v601_v55 }
 0x1d0   : > { %v603_v57 = vrot.slane %v602_v56, 2 }
 0x1d2   : > { %v604_v58 = vmax.f32 %v602_v56, %v603_v57 }
 0x1d4   : > { %v605_v59 = vrot.slane %v604_v58, 1 }
 0x1d6   : > { %v606_v60 = vmax.f32 %v604_v58, %v605_v59 }
 0x1d8   : > { %v607_v61 = vsub.f32 %v425_v33, %v606_v60  ;;  %v608_v62 = vsub.f32 %v428_v35, %v606_v60  ;;  %v610_v63 = vsub.f32 %v1249_v34, %v606_v60  ;;  %v609_v2 = vsub.f32 %v1248_v32, %v606_v60 }
 0x1d9   : > { %v611_v3 = vsub.f32 %v441_v37, %v606_v60  ;;  %v612_v8 = vsub.f32 %v444_v44, %v606_v60  ;;  %v613_v11 = vsub.f32 %v1252_v36, %v606_v60  ;;  %v614_v13 = vsub.f32 %v1253_v38, %v606_v60  ;;  %v554_v44 = vpop.f32.mrf.mxu0 }
 0x1da   : > { %v615_v0 = vmul.f32 1.442695, %v607_v61  ;;  %v617_v1 = vmul.f32 1.442695, %v608_v62  ;;  %v621_v7 = vmul.f32 1.442695, %v610_v63 }
 0x1db   : > { %v619_v10 = vmul.f32 1.442695, %v609_v2  ;;  %v623_v12 = vmul.f32 1.442695, %v611_v3  ;;  %v625_v14 = vmul.f32 1.442695, %v612_v8  ;;  %v1273_v46 = vpop.f32.mrf.mxu0 }
 0x1dc   : > { %1358 = vpow2.f32 %v615_v0  ;;  %v627_v15 = vmul.f32 1.442695, %v613_v11  ;;  %v629_v16 = vmul.f32 1.442695, %v614_v13  ;;  %v714_v56 = vpack.c.bf16 %v1273_v46, %v1272_v42 }
 0x1dd   : > { %1360 = vpow2.f32 %v617_v1  ;;  %v557_v48 = vpop.f32.mrf.mxu0 }
 0x1de   : > { %1362 = vpow2.f32 %v621_v7  ;;  %v713_v57 = vpack.c.bf16 %v557_v48, %v554_v44 }
 0x1df   : > { %1364 = vpow2.f32 %v619_v10  ;;  %v1276_v50 = vpop.f32.mrf.mxu0 }
 0x1e0   : > { %1366 = vpow2.f32 %v623_v12 }
 0x1e1   : > { %1368 = vpow2.f32 %v625_v14  ;;  %v570_v51 = vpop.f32.mrf.mxu0 }
 0x1e2   : > { %1370 = vpow2.f32 %v627_v15  ;;  %v1346_v15 = vld [vmem:[%s1610_s3 + $0x38] sm:$0xff]  }
 0x1e3   : > { %1372 = vpow2.f32 %v629_v16  ;;  %v1277_v52 = vpop.f32.mrf.mxu0 }
 0x1e4   : > { %v716_v53 = vpack.c.bf16 %v1277_v52, %v1276_v50 }
 0x1e5   : > { %v573_v54 = vpop.f32.mrf.mxu0 }
 0x1e6   : > { %1278 = vmatprep.subr.bf16.mxu1 %v716_v53  ;;  %v715_v55 = vpack.c.bf16 %v573_v54, %v570_v51  ;;  %v1348_v51 = vld [vmem:[%s1610_s3 + $0x28] sm:$0xff]   ;;  %v1349_v54 = vld [vmem:[%s1610_s3 + $0x20] sm:$0xff]  }
 0x1e7   : > { %1279 = vmatpush3.bf16.msra.mxu1 %v716_v53 }
 0x1e8   : > { %1280 = vmatprep.subr.bf16.mxu1 %v715_v55 }
 0x1e9   : > { %v1359_v17 = vpop.eup %1358 }
 0x1ea   : > { %v1361_v18 = vpop.eup %1360  ;;  %v631_v19 = vsel %vm585_vm0, %v1359_v17, 0.0 }
 0x1eb   : > { %v632_v20 = vsel %vm585_vm0, %v1361_v18, 0.0  ;;  %v1363_v22 = vpop.eup %1362  ;;  %1281 = vmatpush3.bf16.msra.mxu1 %v715_v55  ;;  %v1350_v55 = vld [vmem:[%s1610_s3 + $0x18] sm:$0xff]  }
 0x1ec   : > { %v633_v21 = vadd.f32 %v632_v20, %v631_v19  ;;  %v1365_v23 = vpop.eup %1364  ;;  %v636_v27 = vsel %vm585_vm0, %v1363_v22, 0.0  ;;  %1282 = vmatprep.subr.bf16.mxu1 %v714_v56 }
 0x1ed   : > { %v634_v24 = vsel %vm585_vm0, %v1365_v23, 0.0  ;;  %v1367_v25 = vpop.eup %1366 }
 0x1ee   : > { %v635_v26 = vadd.f32 %v634_v24, %v633_v21  ;;  %v1369_v28 = vpop.eup %1368  ;;  %v638_v30 = vsel %vm585_vm0, %v1367_v25, 0.0 }
 0x1ef   : > { %v1371_v31 = vpop.eup %1370  ;;  %v640_v33 = vsel %vm585_vm0, %v1369_v28, 0.0  ;;  %1283 = vmatpush3.bf16.msra.mxu1 %v714_v56  ;;  %v1351_v56 = vld [vmem:[%s1610_s3 + $0x10] sm:$0xff]  }
 0x1f0   : > { %v637_v29 = vadd.f32 %v636_v27, %v635_v26  ;;  %v1373_v34 = vpop.eup %1372  ;;  %v642_v36 = vsel %vm585_vm0, %v1371_v31, 0.0  ;;  %1284 = vmatprep.subr.bf16.mxu1 %v713_v57 }
 0x1f1   : > { %v644_v38 = vsel %vm585_vm0, %v1373_v34, 0.0 }
 0x1f2   : > { %v639_v32 = vadd.f32 %v638_v30, %v637_v29 }
 0x1f3   : > { %1285 = vmatpush3.bf16.msra.mxu1 %v713_v57  ;;  %v1352_v57 = vld [vmem:[%s1610_s3 + $0x8] sm:$0xff]  }
 0x1f4   : > { %v641_v35 = vadd.f32 %v640_v33, %v639_v32  ;;  %1294 = vmatprep.subr.bf16.mxu1 %v1346_v15 }
 0x1f6   : > { %v643_v37 = vadd.f32 %v642_v36, %v641_v35 }
 0x1f8   : > { %v645_v39 = vadd.f32 %v644_v38, %v643_v37 }
 0x1fa   : > { %v646_v40 = vrot.slane %v645_v39, 4 }
 0x1fc   : > { %v647_v41 = vadd.f32 %v646_v40, %v645_v39 }
 0x1fe   : > { %v648_v43 = vrot.slane %v647_v41, 2 }
 0x200   : > { %v649_v45 = vadd.f32 %v648_v43, %v647_v41 }
 0x202   : > { %v650_v47 = vrot.slane %v649_v45, 1 }
 0x204   : > { %v651_v49 = vadd.f32 %v650_v47, %v649_v45  ;;  %v1347_v45 = vld [vmem:[%s1610_s3 + $0x30] sm:$0xff]  }
 0x206   : > { %1374 = vrcp.f32 %v651_v49 }
 0x213   : > { %v1375_v58 = vpop.eup %1374 }
 0x214   : > { %v655_v59 = vmul.f32 %v1375_v58, %v1365_v23  ;;  %v653_v60 = vmul.f32 %v1375_v58, %v1359_v17  ;;  %v656_v63 = vmul.f32 %v1375_v58, %v1363_v22  ;;  %v654_v0 = vmul.f32 %v1375_v58, %v1361_v18 }
 0x215   : > { %v658_v3 = vmul.f32 %v1375_v58, %v1369_v28  ;;  %v657_v7 = vmul.f32 %v1375_v58, %v1367_v25  ;;  %v660_v11 = vmul.f32 %v1375_v58, %v1373_v34  ;;  %v659_v12 = vmul.f32 %v1375_v58, %v1371_v31  ;;  %v1353_v58 = vld [vmem:[%s1610_s3] sm:$0xff]  }
 0x216   : > { %v667_v61 = vsel %vm585_vm0, %v655_v59, 0.0  ;;  %v661_v62 = vsel %vm585_vm0, %v653_v60, 0.0  ;;  %v670_v1 = vsel %vm585_vm0, %v656_v63, 0.0  ;;  %v664_v2 = vsel %vm585_vm0, %v654_v0, 0.0 }
 0x217   : > { %668 = vadd.xlane.f32.xlu1 %v667_v61  ;;  %662 = vadd.xlane.f32.xlu0 %v661_v62  ;;  %v676_v8 = vsel %vm585_vm0, %v658_v3, 0.0  ;;  %v673_v10 = vsel %vm585_vm0, %v657_v7, 0.0  ;;  %v682_v13 = vsel %vm585_vm0, %v660_v11, 0.0  ;;  %v679_v14 = vsel %vm585_vm0, %v659_v12, 0.0 }
 0x218   : > { %v797_v61 = vunpack.c.h.bf16 %v1474_v9  ;;  %v794_v62 = vunpack.c.l.bf16 %v1458_v4 }
 0x21b   : > { %671 = vadd.xlane.f32.xlu1 %v670_v1  ;;  %665 = vadd.xlane.f32.xlu0 %v664_v2 }
 0x21f   : > { %677 = vadd.xlane.f32.xlu1 %v676_v8  ;;  %674 = vadd.xlane.f32.xlu0 %v673_v10 }
 0x223   : > { %683 = vadd.xlane.f32.xlu1 %v682_v13  ;;  %680 = vadd.xlane.f32.xlu0 %v679_v14 }
 0x2a0   : > { %v669_v16 = vpop.xlane.xlu1 %668  ;;  %v663_v17 = vpop.xlane.xlu0 %662 }
 0x2a1   : > { %v687_v18 = vadd.f32 1e-09, %v669_v16  ;;  %v685_v19 = vadd.f32 1e-09, %v663_v17  ;;  %v798_v16 = vunpack.c.l.bf16 %v1460_v5  ;;  %v799_v17 = vunpack.c.h.bf16 %v1460_v5 }
 0x2a3   : > { %1376 = vrcp.f32 %v687_v18 }
 0x2a4   : > { %v672_v20 = vpop.xlane.xlu1 %671  ;;  %v666_v21 = vpop.xlane.xlu0 %665  ;;  %1378 = vrcp.f32 %v685_v19 }
 0x2a5   : > { %v688_v22 = vadd.f32 1e-09, %v672_v20  ;;  %v686_v23 = vadd.f32 1e-09, %v666_v21 }
 0x2a7   : > { %1380 = vrcp.f32 %v688_v22 }
 0x2a8   : > { %1382 = vrcp.f32 %v686_v23  ;;  %v678_v24 = vpop.xlane.xlu1 %677  ;;  %v675_v25 = vpop.xlane.xlu0 %674 }
 0x2a9   : > { %v690_v26 = vadd.f32 1e-09, %v678_v24  ;;  %v689_v27 = vadd.f32 1e-09, %v675_v25  ;;  %v1110_v25 = vld [vmem:[%s1611_s4] ss:$0 sm:$0xff] }
 0x2ab   : > { %1384 = vrcp.f32 %v690_v26 }
 0x2ac   : > { %1386 = vrcp.f32 %v689_v27  ;;  %v684_v28 = vpop.xlane.xlu1 %683  ;;  %v681_v29 = vpop.xlane.xlu0 %680 }
 0x2ad   : > { %v692_v30 = vadd.f32 1e-09, %v684_v28  ;;  %v691_v31 = vadd.f32 1e-09, %v681_v29 }
 0x2af   : > { %1388 = vrcp.f32 %v692_v30 }
 0x2b0   : > { %1390 = vrcp.f32 %v691_v31  ;;  %v1377_v32 = vpop.eup %1376 }
 0x2b1   : > { %v1379_v33 = vpop.eup %1378  ;;  %v703_v36 = vmul.f32 %v1377_v32, %v655_v59 }
 0x2b2   : > { %v701_v38 = vmul.f32 %v1379_v33, %v653_v60 }
 0x2b4   : > { %v1381_v34 = vpop.eup %1380 }
 0x2b5   : > { %v1383_v35 = vpop.eup %1382  ;;  %v704_v37 = vmul.f32 %v1381_v34, %v656_v63  ;;  %v795_v63 = vunpack.c.h.bf16 %v1458_v4  ;;  %v800_v4 = vunpack.c.l.bf16 %v1462_v6 }
 0x2b6   : > { %v702_v39 = vmul.f32 %v1383_v35, %v654_v0  ;;  %v796_v0 = vunpack.c.l.bf16 %v1474_v9 }
 0x2b7   : > { %v710_v40 = vpack.c.bf16 %v704_v37, %v703_v36 }
 0x2b8   : > { %v1385_v41 = vpop.eup %1384  ;;  %v709_v42 = vpack.c.bf16 %v702_v39, %v701_v38 }
 0x2b9   : > { %v1387_v43 = vpop.eup %1386  ;;  %v706_v44 = vmul.f32 %v1385_v41, %v658_v3 }
 0x2ba   : > { %1286 = vmatprep.mubr.msk.bf16.mxu1 %vm585_vm0, %v709_v42  ;;  %v705_v46 = vmul.f32 %v1387_v43, %v657_v7 }
 0x2bb   : > { %1287 = vmatmul.mubr.msk.bf16.vlgmr.msra.gmra.mxu1 %vm585_vm0, %v710_v40 }
 0x2bc   : > { %v1389_v47 = vpop.eup %1388  ;;  %v711_v48 = vpack.c.bf16 %v706_v44, %v705_v46  ;;  %1295 = vmatpush3.bf16.msra.mxu1 %v1346_v15  ;;  %v801_v15 = vunpack.c.h.bf16 %v1462_v6 }
 0x2bd   : > { %v1391_v49 = vpop.eup %1390  ;;  %v708_v50 = vmul.f32 %v1389_v47, %v660_v11  ;;  %1296 = vmatprep.subr.bf16.mxu1 %v1347_v45 }
 0x2be   : > { %1290 = vmatprep.mubr.msk.bf16.mxu1 %vm585_vm0, %v711_v48  ;;  %v707_v52 = vmul.f32 %v1391_v49, %v659_v12 }
 0x2c0   : > { %v712_v53 = vpack.c.bf16 %v708_v50, %v707_v52  ;;  %1297 = vmatpush3.bf16.msra.mxu1 %v1347_v45 }
 0x2c1   : > { %1298 = vmatprep.subr.bf16.mxu1 %v1348_v51 }
 0x2c3   : > { %1291 = vmatmul.mubr.msk.bf16.gmra.mxu1 %vm585_vm0, %v712_v53 }
 0x2c4   : > { %1299 = vmatpush3.bf16.msra.mxu1 %v1348_v51 }
 0x2c5   : > { %1300 = vmatprep.subr.bf16.mxu1 %v1349_v54 }
 0x2c8   : > { %1301 = vmatpush3.bf16.msra.mxu1 %v1349_v54 }
 0x2c9   : > { %1302 = vmatprep.subr.bf16.mxu1 %v1350_v55 }
 0x2cc   : > { %1303 = vmatpush3.bf16.msra.mxu1 %v1350_v55 }
 0x2cd   : > { %1304 = vmatprep.subr.bf16.mxu1 %v1351_v56 }
 0x2d0   : > { %1305 = vmatpush3.bf16.msra.mxu1 %v1351_v56 }
 0x2d1   : > { %1306 = vmatprep.subr.bf16.mxu1 %v1352_v57 }
 0x2d4   : > { %1307 = vmatpush3.bf16.msra.mxu1 %v1352_v57 }
 0x2d5   : > { %1308 = vmatprep.subr.bf16.mxu1 %v1353_v58 }
 0x2d8   : > { %1309 = vmatpush3.bf16.msra.mxu1 %v1353_v58 }
 0x37b   : > { %v1288_v59 = vpop.f32.mrf.mxu1 }
 0x37c   : > { %v804_v10 = vsub.f32 %v796_v0, %v1288_v59 }
 0x37d   : > { %v763_v60 = vpop.f32.mrf.mxu1 }
 0x37e   : > { %v802_v7 = vsub.f32 %v794_v62, %v763_v60 }
 0x37f   : > { %v1289_v1 = vpop.f32.mrf.mxu1 }
 0x380   : > { %v805_v2 = vsub.f32 %v797_v61, %v1289_v1 }
 0x381   : > { %v766_v3 = vpop.f32.mrf.mxu1 }
 0x382   : > { %v803_v8 = vsub.f32 %v795_v63, %v766_v3  ;;  %v811_v13 = vpack.c.bf16 %v805_v2, %v804_v10 }
 0x383   : > { %v1292_v11 = vpop.f32.mrf.mxu1 }
 0x384   : > { %v810_v12 = vpack.c.bf16 %v803_v8, %v802_v7  ;;  %v808_v22 = vsub.f32 %v800_v4, %v1292_v11 }
 0x385   : > { %v779_v14 = vpop.f32.mrf.mxu1 }
 0x386   : > { %1310 = vmatprep.mubr.bf16.mxu1 %v810_v12  ;;  %v806_v20 = vsub.f32 %v798_v16, %v779_v14 }
 0x387   : > { %v1293_v9 = vpop.f32.mrf.mxu1  ;;  %1311 = vmatmul.mubr.bf16.vlgmr.msra.gmra.mxu1 %v811_v13 }
 0x388   : > { %v809_v18 = vsub.f32 %v801_v15, %v1293_v9 }
 0x389   : > { %v782_v19 = vpop.f32.mrf.mxu1 }
 0x38a   : > { %v807_v21 = vsub.f32 %v799_v17, %v782_v19  ;;  %v813_v24 = vpack.c.bf16 %v809_v18, %v808_v22 }
 0x38c   : > { %v812_v23 = vpack.c.bf16 %v807_v21, %v806_v20 }
 0x38e   : > { %1314 = vmatprep.mubr.bf16.mxu1 %v812_v23 }
 0x38f   : > { %1315 = vmatmul.mubr.bf16.gmra.mxu1 %v813_v24 }
 0x447   : > { %v1312_v26 = vpop.f32.mrf.mxu1 }
 0x448   : > { %v928_v27 = vadd.f32 %v1312_v26, %v1110_v25 }
 0x449   : > { %v919_v28 = vpop.f32.mrf.mxu1 }
 0x44a   : > { %v960_v29 = vmul.f32 0.01, %v928_v27  ;;  %v920_v30 = vadd.f32 %v1110_v25, %v919_v28  ;;  %vm952_vm1 = vcmp.ge.f32.partialorder %v928_v27, 0.0 }
 0x44b   : > { %v1313_v31 = vpop.f32.mrf.mxu1 }
 0x44c   : > { %vm950_vm2 = vcmp.ge.f32.partialorder %v920_v30, 0.0  ;;  %v958_v32 = vmul.f32 0.01, %v920_v30  ;;  %v931_v33 = vadd.f32 %v1313_v31, %v1110_v25  ;;  %v968_v35 = vsel %vm952_vm1, %v928_v27, %v960_v29 }
 0x44d   : > { %v922_v34 = vpop.f32.mrf.mxu1  ;;  %v976_v43 = vadd.f32 %v968_v35, %v796_v0 }
 0x44e   : > { %vm953_vm3 = vcmp.ge.f32.partialorder %v931_v33, 0.0  ;;  %v961_v36 = vmul.f32 0.01, %v931_v33  ;;  %v923_v37 = vadd.f32 %v1110_v25, %v922_v34  ;;  %v966_v38 = vsel %vm950_vm2, %v920_v30, %v958_v32 }
 0x44f   : > { %v1316_v39 = vpop.f32.mrf.mxu1  ;;  %v974_v49 = vadd.f32 %v966_v38, %v794_v62 }
 0x450   : > { %v969_v40 = vsel %vm953_vm3, %v931_v33, %v961_v36  ;;  %vm951_vm4 = vcmp.ge.f32.partialorder %v923_v37, 0.0  ;;  %v959_v41 = vmul.f32 0.01, %v923_v37  ;;  %v944_v42 = vadd.f32 %v1316_v39, %v1110_v25 }
 0x451   : > { %v977_v44 = vadd.f32 %v969_v40, %v797_v61  ;;  %v935_v45 = vpop.f32.mrf.mxu1 }
 0x452   : > { %v967_v46 = vsel %vm951_vm4, %v923_v37, %v959_v41  ;;  %v964_v47 = vmul.f32 0.01, %v944_v42  ;;  %v936_v48 = vadd.f32 %v1110_v25, %v935_v45  ;;  %vm956_vm5 = vcmp.ge.f32.partialorder %v944_v42, 0.0 }
 0x453   : > { %v1147_v50 = vpack.c.bf16 %v977_v44, %v976_v43  ;;  %v975_v51 = vadd.f32 %v967_v46, %v795_v63  ;;  %v1317_v52 = vpop.f32.mrf.mxu1 }
 0x454   : > { %v962_v53 = vmul.f32 0.01, %v936_v48  ;;  %v947_v54 = vadd.f32 %v1317_v52, %v1110_v25  ;;  %vm954_vm6 = vcmp.ge.f32.partialorder %v936_v48, 0.0  ;;  %v972_v57 = vsel %vm956_vm5, %v944_v42, %v964_v47 }
 0x455   : > { %1159 = vst [vmem:[%s1592_s7 + $0x8] sm:$0xff] %v1147_v50   ;;  %v1142_v55 = vpack.c.bf16 %v975_v51, %v974_v49  ;;  %v938_v56 = vpop.f32.mrf.mxu1  ;;  %v980_v63 = vadd.f32 %v972_v57, %v800_v4 }
 0x456   : > { %vm957_vm7 = vcmp.ge.f32.partialorder %v947_v54, 0.0  ;;  %v965_v58 = vmul.f32 0.01, %v947_v54  ;;  %v939_v59 = vadd.f32 %v1110_v25, %v938_v56  ;;  %v970_v60 = vsel %vm954_vm6, %v936_v48, %v962_v53 }
 0x457   : > { %1143 = vst [vmem:[%s1592_s7] sm:$0xff] %v1142_v55   ;;  %v978_v2 = vadd.f32 %v970_v60, %v798_v16 }
 0x458   : > { %v973_v61 = vsel %vm957_vm7, %v947_v54, %v965_v58  ;;  %vm955_vm8 = vcmp.ge.f32.partialorder %v939_v59, 0.0  ;;  %v963_v62 = vmul.f32 0.01, %v939_v59 }
 0x459   : > { %v981_v0 = vadd.f32 %v973_v61, %v801_v15 }
 0x45a   : > { %v971_v1 = vsel %vm955_vm8, %v939_v59, %v963_v62 }
 0x45b   : > { %v1157_v3 = vpack.c.bf16 %v981_v0, %v980_v63  ;;  %v979_v7 = vadd.f32 %v971_v1, %v799_v17 }
 0x45d   : > { %1161 = vst [vmem:[%s1592_s7 + $0x18] sm:$0xff] %v1157_v3   ;;  %v1152_v8 = vpack.c.bf16 %v979_v7, %v978_v2 }
 0x45f   : > { %1160 = vst [vmem:[%s1592_s7 + $0x10] sm:$0xff] %v1152_v8  }
 0x460 PF: > { %s15_s18 = sadd.s32 1, %s1398_s18  }
 0x461   : > { %p12_p4 = scmp.ge.s32.totalorder %s15_s18, 4  }
 0x463   :  { %14 = sbr.rel (!%p12_p4) target bundleno = 1 (0x1), region = 70 }

// kernel: pct_segmentation_forward.11
= control target key start
LH: loop header
LB: loop body
LE: loop exit
PB: predicated region body
PF: predicated region fallthrough
CT: control target
= control target key end

     0   :  { %s4221_s24 = smov 0   ;;  %s4223_s25 = smov 0   ;;  %s5416_s0 = inlined_call_operand.vmem [shape: bf16[2,64,8,128], index: 0, kind: input, shape index: {}]   ;;  %s5417_s1 = inlined_call_operand.vmem [shape: bf16[2,64,128], index: 1, kind: input, shape index: {}]   ;;  %s5418_s2 = inlined_call_operand.vmem [shape: bf16[128,128], index: 2, kind: input, shape index: {}]   ;;  %s5419_s3 = inlined_call_operand.vmem [shape: bf16[128,128], index: 3, kind: input, shape index: {}]   ;;  %s5420_s4 = inlined_call_operand.vmem [shape: bf16[128,128], index: 4, kind: input, shape index: {}]   ;;  %s5421_s5 = inlined_call_operand.vmem [shape: f32[1,128], index: 5, kind: input, shape index: {}]   ;;  %s5422_s6 = inlined_call_operand.vmem [shape: f32[1,128], index: 6, kind: input, shape index: {}]   ;;  %s5423_s7 = inlined_call_operand.vmem [shape: bf16[2,64,128], index: 7, kind: output, shape index: {}]  }
   0x1   :  { %s4225_s26 = smov 0  }
   0x2 LB: > { %s29_s27 = sadd.s32 1, %s4174_s25  ;;  %p3592_p0 = scmp.ge.s32.totalorder %s4178_s26, 1  ;;  %s4178_s26 = sphi %s4225_s26, %s17_s26   ;;  %s4174_s25 = sphi %s4223_s25, %s5583_s25   ;;  %s4170_s24 = sphi %s4221_s24, %s5582_s24  }
   0x3   : > { %p31_p1 = scmp.ge.s32.totalorder %s29_s27, 2  ;;  %p275_p2 = scmp.lt.s32.totalorder %s4178_s26, 3 }
   0x5   : > { %s5585_s27 = smov (%p31_p1, %s29_s27), 0  ;;  %p276_p3 = pnand %p3592_p0, %p275_p2 }
   0x7   : > { %279 = sbr.rel (%p276_p3) target bundleno = 833 (0x341), region = 48 }
   0xc   : > { %v4095_v0 = vld [vmem:[%s5418_s2 + $0x38] sm:$0xff]   ;;  %p325_p4 = scmp.lt.s32.totalorder %s4170_s24, 1  ;;  %v4096_v1 = vld [vmem:[%s5418_s2 + $0x30] sm:$0xff]   ;;  %v4097_v2 = vld [vmem:[%s5418_s2 + $0x28] sm:$0xff]  }
   0xd   : > { %3886 = vmatprep.subr.bf16.mxu0 %v4095_v0  ;;  %v4098_v3 = vld [vmem:[%s5418_s2 + $0x20] sm:$0xff]   ;;  %v4099_v5 = vld [vmem:[%s5418_s2 + $0x18] sm:$0xff]   ;;  %v4100_v6 = vld [vmem:[%s5418_s2 + $0x10] sm:$0xff]  }
   0xe   : > { %s5587_s24 = smov (!%p325_p4, %s4170_s24), 1  ;;  %3887 = vmatpush3.bf16.msra.mxu0 %v4095_v0  ;;  %v4101_v7 = vld [vmem:[%s5418_s2 + $0x8] sm:$0xff]   ;;  %v4102_v8 = vld [vmem:[%s5418_s2] sm:$0xff]   ;;  %v4105_v9 = vld [vmem:[%s5419_s3 + $0x38] sm:$0xff]  }
   0xf   : > { %3888 = vmatprep.subr.bf16.mxu0 %v4096_v1  ;;  %s3727_s11 = sshll.u32 %s5587_s24, 8  ;;  %v4110_v12 = vld [vmem:[%s5419_s3 + $0x30] sm:$0xff]   ;;  %v4115_v13 = vld [vmem:[%s5419_s3 + $0x28] sm:$0xff]   ;;  %v4120_v16 = vld [vmem:[%s5419_s3 + $0x20] sm:$0xff]   ;;  %s3728_s17 = sshll.u32 %s5587_s24, 5 }
  0x10   : > { %s4254_s14 = scalar_lea.vmem %s5416_s0, %s3727_s11  ;;  %v4125_v17 = vld [vmem:[%s5419_s3 + $0x18] sm:$0xff]   ;;  %s4299_s20 = scalar_lea.vmem %s5417_s1, %s3728_s17  ;;  %v4130_v20 = vld [vmem:[%s5419_s3 + $0x10] sm:$0xff]   ;;  %v4135_v21 = vld [vmem:[%s5419_s3 + $0x8] sm:$0xff]  }
  0x11   : > { %v4103_v4 = vld [vmem:[%s4254_s14] sm:$0xff]   ;;  %v4104_v10 = vld [vmem:[%s4254_s14 + $0x8] sm:$0xff]   ;;  %v4106_v11 = vld [vmem:[%s4254_s14 + $0x10] sm:$0xff]  }
  0x12   : > { %3889 = vmatpush3.bf16.msra.mxu0 %v4096_v1  ;;  %3902 = vmatprep.mubr.bf16.mxu0 %v4103_v4  ;;  %v4107_v14 = vld [vmem:[%s4254_s14 + $0x18] sm:$0xff]   ;;  %v4108_v15 = vld [vmem:[%s4254_s14 + $0x20] sm:$0xff]   ;;  %v4109_v18 = vld [vmem:[%s4254_s14 + $0x28] sm:$0xff]  }
  0x13   : > { %3890 = vmatprep.subr.bf16.mxu0 %v4097_v2  ;;  %v4111_v19 = vld [vmem:[%s4254_s14 + $0x30] sm:$0xff]   ;;  %v4112_v22 = vld [vmem:[%s4254_s14 + $0x38] sm:$0xff]   ;;  %v4113_v23 = vld [vmem:[%s4254_s14 + $0x40] sm:$0xff]  }
  0x14   : > { %v4140_v24 = vld [vmem:[%s5419_s3] sm:$0xff]   ;;  %v4114_v25 = vld [vmem:[%s4254_s14 + $0x48] sm:$0xff]   ;;  %v4116_v26 = vld [vmem:[%s4254_s14 + $0x50] sm:$0xff]  }
  0x15   : > { %v4117_v27 = vld [vmem:[%s4254_s14 + $0x58] sm:$0xff]   ;;  %v4118_v28 = vld [vmem:[%s4254_s14 + $0x60] sm:$0xff]   ;;  %v4119_v29 = vld [vmem:[%s4254_s14 + $0x68] sm:$0xff]  }
  0x16   : > { %3891 = vmatpush3.bf16.msra.mxu0 %v4097_v2  ;;  %v4121_v30 = vld [vmem:[%s4254_s14 + $0x70] sm:$0xff]   ;;  %v4122_v31 = vld [vmem:[%s4254_s14 + $0x78] sm:$0xff]   ;;  %v4123_v32 = vld [vmem:[%s4254_s14 + $0x80] sm:$0xff]  }
  0x17   : > { %3892 = vmatprep.subr.bf16.mxu0 %v4098_v3  ;;  %v4124_v33 = vld [vmem:[%s4254_s14 + $0x88] sm:$0xff]   ;;  %v4126_v34 = vld [vmem:[%s4254_s14 + $0x90] sm:$0xff]   ;;  %v4127_v35 = vld [vmem:[%s4254_s14 + $0x98] sm:$0xff]  }
  0x18   : > { %v4128_v36 = vld [vmem:[%s4254_s14 + $0xa0] sm:$0xff]   ;;  %v4129_v37 = vld [vmem:[%s4254_s14 + $0xa8] sm:$0xff]   ;;  %v4131_v38 = vld [vmem:[%s4254_s14 + $0xb0] sm:$0xff]  }
  0x19   : > { %v4132_v39 = vld [vmem:[%s4254_s14 + $0xb8] sm:$0xff]   ;;  %v4133_v40 = vld [vmem:[%s4254_s14 + $0xc0] sm:$0xff]   ;;  %v4134_v41 = vld [vmem:[%s4254_s14 + $0xc8] sm:$0xff]  }
  0x1a   : > { %3893 = vmatpush3.bf16.msra.mxu0 %v4098_v3  ;;  %v4136_v42 = vld [vmem:[%s4254_s14 + $0xd0] sm:$0xff]   ;;  %v4137_v43 = vld [vmem:[%s4254_s14 + $0xd8] sm:$0xff]   ;;  %v4138_v44 = vld [vmem:[%s4254_s14 + $0xe0] sm:$0xff]  }
  0x1b   : > { %3894 = vmatprep.subr.bf16.mxu0 %v4099_v5  ;;  %v4139_v45 = vld [vmem:[%s4254_s14 + $0xe8] sm:$0xff]   ;;  %v4141_v46 = vld [vmem:[%s4254_s14 + $0xf0] sm:$0xff]   ;;  %v4142_v47 = vld [vmem:[%s4254_s14 + $0xf8] sm:$0xff]   ;;  %s5197_s14 = scalar_lea.vmem %s5423_s7, %s3728_s17 }
  0x1c   : > { %v4143_v48 = vld [vmem:[%s4299_s20] sm:$0xff]   ;;  %v4144_v49 = vld [vmem:[%s4299_s20 + $0x8] sm:$0xff]   ;;  %v4145_v50 = vld [vmem:[%s4299_s20 + $0x10] sm:$0xff]  }
  0x1d   : > { %v4146_v51 = vld [vmem:[%s4299_s20 + $0x18] sm:$0xff]   ;;  %v4148_v53 = vld [vmem:[%s5420_s4 + $0x30] sm:$0xff]   ;;  %v4149_v54 = vld [vmem:[%s5420_s4 + $0x28] sm:$0xff]  }
  0x1e   : > { %3895 = vmatpush3.bf16.msra.mxu0 %v4099_v5  ;;  %v4147_v52 = vld [vmem:[%s5420_s4 + $0x38] sm:$0xff]   ;;  %v4150_v58 = vld [vmem:[%s5420_s4 + $0x20] sm:$0xff]  }
  0x1f   : > { %3896 = vmatprep.subr.bf16.mxu0 %v4100_v6  ;;  %3990 = vmatprep.subr.bf16.mxu1 %v4147_v52  ;;  %v4151_v1 = vld [vmem:[%s5420_s4 + $0x18] sm:$0xff]  }
  0x20   : > { %3991 = vmatpush3.bf16.msra.mxu1 %v4147_v52 }
  0x21   : > { %3992 = vmatprep.subr.bf16.mxu1 %v4148_v53 }
  0x22   : > { %3897 = vmatpush3.bf16.msra.mxu0 %v4100_v6 }
  0x23   : > { %3898 = vmatprep.subr.bf16.mxu0 %v4101_v7 }
  0x24   : > { %3993 = vmatpush3.bf16.msra.mxu1 %v4148_v53 }
  0x25   : > { %3994 = vmatprep.subr.bf16.mxu1 %v4149_v54 }
  0x26   : > { %3899 = vmatpush3.bf16.msra.mxu0 %v4101_v7  ;;  %v4152_v7 = vld [vmem:[%s5420_s4 + $0x10] sm:$0xff]  }
  0x27   : > { %3900 = vmatprep.subr.bf16.mxu0 %v4102_v8 }
  0x28   : > { %3995 = vmatpush3.bf16.msra.mxu1 %v4149_v54 }
  0x29   : > { %3996 = vmatprep.subr.bf16.mxu1 %v4150_v58 }
  0x2a   : > { %3901 = vmatpush3.bf16.msra.mxu0 %v4102_v8 }
  0x2b   : > { %3966 = vmatprep.subr.bf16.mxu0 %v4105_v9 }
  0x2c   : > { %3997 = vmatpush3.bf16.msra.mxu1 %v4150_v58 }
  0x2d   : > { %3903 = vmatmul.mubr.bf16.vlgmr.msra.gmra.mxu0 %v4104_v10  ;;  %3998 = vmatprep.subr.bf16.mxu1 %v4151_v1 }
  0x2e   : > { %3967 = vmatpush3.bf16.msra.mxu0 %v4105_v9  ;;  %3906 = vmatprep.mubr.bf16.mxu0 %v4106_v11 }
  0x2f   : > { %3968 = vmatprep.subr.bf16.mxu0 %v4110_v12 }
  0x30   : > { %3999 = vmatpush3.bf16.msra.mxu1 %v4151_v1  ;;  %v4180_v1 = vmov 1966171168  }
  0x31   : > { %4000 = vmatprep.subr.bf16.mxu1 %v4152_v7 }
  0x32   : > { %3969 = vmatpush3.bf16.msra.mxu0 %v4110_v12 }
  0x33   : > { %3970 = vmatprep.subr.bf16.mxu0 %v4115_v13 }
  0x34   : > { %4001 = vmatpush3.bf16.msra.mxu1 %v4152_v7  ;;  %v1142_v7 = vunpack.c.l.s4 %v4180_v1 }
  0x35   : > { %3907 = vmatmul.mubr.bf16.gmra.mxu0 %v4107_v14 }
  0x36   : > { %3910 = vmatprep.mubr.bf16.mxu0 %v4108_v15  ;;  %3971 = vmatpush3.bf16.msra.mxu0 %v4115_v13  ;;  %v4153_v15 = vld [vmem:[%s5420_s4 + $0x8] sm:$0xff]  }
  0x37   : > { %3972 = vmatprep.subr.bf16.mxu0 %v4120_v16  ;;  %4002 = vmatprep.subr.bf16.mxu1 %v4153_v15 }
  0x38   : > { %4003 = vmatpush3.bf16.msra.mxu1 %v4153_v15  ;;  %v1144_v15 = vlaneseq }
  0x3a   : > { %3973 = vmatpush3.bf16.msra.mxu0 %v4120_v16 }
  0x3b   : > { %3974 = vmatprep.subr.bf16.mxu0 %v4125_v17 }
  0x3d   : > { %3911 = vmatmul.mubr.bf16.gmra.mxu0 %v4109_v18  ;;  %v4154_v18 = vld [vmem:[%s5420_s4] sm:$0xff]  }
  0x3e   : > { %3914 = vmatprep.mubr.bf16.mxu0 %v4111_v19  ;;  %3975 = vmatpush3.bf16.msra.mxu0 %v4125_v17 }
  0x3f   : > { %3976 = vmatprep.subr.bf16.mxu0 %v4130_v20  ;;  %4004 = vmatprep.subr.bf16.mxu1 %v4154_v18 }
  0x40   : > { %4005 = vmatpush3.bf16.msra.mxu1 %v4154_v18 }
  0x42   : > { %3977 = vmatpush3.bf16.msra.mxu0 %v4130_v20 }
  0x43   : > { %3978 = vmatprep.subr.bf16.mxu0 %v4135_v21 }
  0x45   : > { %3915 = vmatmul.mubr.bf16.gmra.mxu0 %v4112_v22 }
  0x46   : > { %3918 = vmatprep.mubr.bf16.mxu0 %v4113_v23  ;;  %3979 = vmatpush3.bf16.msra.mxu0 %v4135_v21 }
  0x47   : > { %3980 = vmatprep.subr.bf16.mxu0 %v4140_v24 }
  0x4a   : > { %3981 = vmatpush3.bf16.msra.mxu0 %v4140_v24 }
  0x4d   : > { %3919 = vmatmul.mubr.bf16.gmra.mxu0 %v4114_v25 }
  0x4e   : > { %3922 = vmatprep.mubr.bf16.mxu0 %v4116_v26 }
  0x55   : > { %3923 = vmatmul.mubr.bf16.gmra.mxu0 %v4117_v27 }
  0x56   : > { %3926 = vmatprep.mubr.bf16.mxu0 %v4118_v28 }
  0x5d   : > { %3927 = vmatmul.mubr.bf16.gmra.mxu0 %v4119_v29 }
  0x5e   : > { %3930 = vmatprep.mubr.bf16.mxu0 %v4121_v30 }
  0x65   : > { %3931 = vmatmul.mubr.bf16.gmra.mxu0 %v4122_v31 }
  0x66   : > { %3934 = vmatprep.mubr.bf16.mxu0 %v4123_v32 }
  0x6d   : > { %3935 = vmatmul.mubr.bf16.gmra.mxu0 %v4124_v33 }
  0x6e   : > { %3938 = vmatprep.mubr.bf16.mxu0 %v4126_v34 }
  0x75   : > { %3939 = vmatmul.mubr.bf16.gmra.mxu0 %v4127_v35 }
  0x76   : > { %3942 = vmatprep.mubr.bf16.mxu0 %v4128_v36 }
  0x7d   : > { %3943 = vmatmul.mubr.bf16.gmra.mxu0 %v4129_v37 }
  0x7e   : > { %3946 = vmatprep.mubr.bf16.mxu0 %v4131_v38 }
  0x85   : > { %3947 = vmatmul.mubr.bf16.gmra.mxu0 %v4132_v39 }
  0x86   : > { %3950 = vmatprep.mubr.bf16.mxu0 %v4133_v40 }
  0x8d   : > { %3951 = vmatmul.mubr.bf16.gmra.mxu0 %v4134_v41 }
  0x8e   : > { %3954 = vmatprep.mubr.bf16.mxu0 %v4136_v42 }
  0x95   : > { %3955 = vmatmul.mubr.bf16.gmra.mxu0 %v4137_v43 }
  0x96   : > { %3958 = vmatprep.mubr.bf16.mxu0 %v4138_v44 }
  0x9d   : > { %3959 = vmatmul.mubr.bf16.gmra.mxu0 %v4139_v45 }
  0x9e   : > { %3962 = vmatprep.mubr.bf16.mxu0 %v4141_v46 }
  0xa5   : > { %3963 = vmatmul.mubr.bf16.gmra.mxu0 %v4142_v47 }
  0xa6   : > { %3982 = vmatprep.mubr.bf16.mxu0 %v4143_v48 }
  0xad   : > { %3983 = vmatmul.mubr.bf16.vlgmr.msra.gmra.mxu0 %v4144_v49 }
  0xae   : > { %3986 = vmatprep.mubr.bf16.mxu0 %v4145_v50 }
  0xb5   : > { %3987 = vmatmul.mubr.bf16.gmra.mxu0 %v4146_v51 }
  0xed   : > { %v4348_v55 = vpop.f32.mrf.mxu0 }
  0xef   : > { %v4350_v56 = vpop.f32.mrf.mxu0 }
  0xf1   : > { %v4352_v57 = vpop.f32.mrf.mxu0 }
  0xf3   : > { %v4357_v59 = vpop.f32.mrf.mxu0 }
  0xf5   : > { %v4359_v60 = vpop.f32.mrf.mxu0 }
  0xf7   : > { %v4361_v61 = vpop.f32.mrf.mxu0 }
  0xf9   : > { %v4363_v62 = vpop.f32.mrf.mxu0 }
  0xfb   : > { %v4365_v63 = vpop.f32.mrf.mxu0 }
  0xfd   : > { %v4367_v0 = vpop.f32.mrf.mxu0 }
  0xff   : > { %v4372_v2 = vpop.f32.mrf.mxu0 }
 0x101   : > { %v4374_v3 = vpop.f32.mrf.mxu0 }
 0x103   : > { %v4376_v4 = vpop.f32.mrf.mxu0 }
 0x105   : > { %v4378_v5 = vpop.f32.mrf.mxu0 }
 0x107   : > { %v4380_v6 = vpop.f32.mrf.mxu0 }
 0x109   : > { %v4385_v8 = vpop.f32.mrf.mxu0 }
 0x10b   : > { %v4387_v9 = vpop.f32.mrf.mxu0 }
 0x10d   : > { %v4389_v10 = vpop.f32.mrf.mxu0 }
 0x10f   : > { %v4391_v11 = vpop.f32.mrf.mxu0 }
 0x111   : > { %v4393_v12 = vpop.f32.mrf.mxu0 }
 0x113   : > { %v4395_v13 = vpop.f32.mrf.mxu0 }
 0x115   : > { %v4397_v14 = vpop.f32.mrf.mxu0 }
 0x116   : > { %5440 = vst [vmem:[#allocation2_spill] sm:$0xff] %v4397_v14 }
 0x117   : > { %v4402_v16 = vpop.f32.mrf.mxu0 }
 0x118   : > { %5441 = vst [vmem:[#allocation3_spill] sm:$0xff] %v4402_v16 }
 0x119   : > { %v4404_v17 = vpop.f32.mrf.mxu0 }
 0x11a   : > { %5442 = vst [vmem:[#allocation4_spill] sm:$0xff] %v4404_v17 }
 0x11b   : > { %v4409_v19 = vpop.f32.mrf.mxu0 }
 0x11c   : > { %5443 = vst [vmem:[#allocation5_spill] sm:$0xff] %v4409_v19 }
 0x11d   : > { %v4411_v20 = vpop.f32.mrf.mxu0 }
 0x11e   : > { %5444 = vst [vmem:[#allocation6_spill] sm:$0xff] %v4411_v20 }
 0x11f   : > { %v4413_v21 = vpop.f32.mrf.mxu0 }
 0x121   : > { %v4415_v22 = vpop.f32.mrf.mxu0 }
 0x122   : > { %5445 = vst [vmem:[#allocation7_spill] sm:$0xff] %v4415_v22 }
 0x123   : > { %v4417_v23 = vpop.f32.mrf.mxu0 }
 0x124   : > { %5446 = vst [vmem:[#allocation8_spill] sm:$0xff] %v4417_v23 }
 0x125   : > { %v4419_v24 = vpop.f32.mrf.mxu0 }
 0x126   : > { %5447 = vst [vmem:[#allocation9_spill] sm:$0xff] %v4419_v24 }
 0x127   : > { %v4421_v25 = vpop.f32.mrf.mxu0 }
 0x128   : > { %5448 = vst [vmem:[#allocation10_spill] sm:$0xff] %v4421_v25 }
 0x129   : > { %v4423_v26 = vpop.f32.mrf.mxu0 }
 0x12a   : > { %5449 = vst [vmem:[#allocation11_spill] sm:$0xff] %v4423_v26 }
 0x12b   : > { %v4425_v27 = vpop.f32.mrf.mxu0 }
 0x12c   : > { %5450 = vst [vmem:[#allocation12_spill] sm:$0xff] %v4425_v27 }
 0x12d   : > { %v4427_v28 = vpop.f32.mrf.mxu0 }
 0x12e   : > { %5451 = vst [vmem:[#allocation13_spill] sm:$0xff] %v4427_v28 }
 0x12f   : > { %v4429_v29 = vpop.f32.mrf.mxu0 }
 0x131   : > { %v4431_v30 = vpop.f32.mrf.mxu0 }
 0x132   : > { %5452 = vst [vmem:[#allocation14_spill] sm:$0xff] %v4431_v30 }
 0x133   : > { %v4433_v31 = vpop.f32.mrf.mxu0 }
 0x134   : > { %5453 = vst [vmem:[#allocation15_spill] sm:$0xff] %v4433_v31 }
 0x135   : > { %v4435_v32 = vpop.f32.mrf.mxu0 }
 0x136   : > { %5454 = vst [vmem:[#allocation16_spill] sm:$0xff] %v4435_v32 }
 0x137   : > { %v4437_v33 = vpop.f32.mrf.mxu0 }
 0x138   : > { %5455 = vst [vmem:[#allocation17_spill] sm:$0xff] %v4437_v33 }
 0x139   : > { %v4439_v34 = vpop.f32.mrf.mxu0 }
 0x13a   : > { %5456 = vst [vmem:[#allocation18_spill] sm:$0xff] %v4439_v34 }
 0x13b   : > { %v4441_v35 = vpop.f32.mrf.mxu0 }
 0x13c   : > { %5457 = vst [vmem:[#allocation19_spill] sm:$0xff] %v4441_v35 }
 0x13d   : > { %v4443_v36 = vpop.f32.mrf.mxu0 }
 0x13e   : > { %5458 = vst [vmem:[#allocation20_spill] sm:$0xff] %v4443_v36 }
 0x13f   : > { %v4445_v37 = vpop.f32.mrf.mxu0 }
 0x141   : > { %v4447_v38 = vpop.f32.mrf.mxu0 }
 0x142   : > { %5459 = vst [vmem:[#allocation21_spill] sm:$0xff] %v4447_v38 }
 0x143   : > { %v4449_v39 = vpop.f32.mrf.mxu0 }
 0x144   : > { %5460 = vst [vmem:[#allocation22_spill] sm:$0xff] %v4449_v39 }
 0x145   : > { %v4451_v40 = vpop.f32.mrf.mxu0 }
 0x146   : > { %5461 = vst [vmem:[#allocation23_spill] sm:$0xff] %v4451_v40 }
 0x147   : > { %v4453_v41 = vpop.f32.mrf.mxu0 }
 0x148   : > { %5462 = vst [vmem:[#allocation24_spill] sm:$0xff] %v4453_v41 }
 0x149   : > { %v4455_v42 = vpop.f32.mrf.mxu0 }
 0x14a   : > { %5463 = vst [vmem:[#allocation25_spill] sm:$0xff] %v4455_v42 }
 0x14b   : > { %v4457_v43 = vpop.f32.mrf.mxu0 }
 0x14c   : > { %5464 = vst [vmem:[#allocation26_spill] sm:$0xff] %v4457_v43 }
 0x14d   : > { %v4459_v44 = vpop.f32.mrf.mxu0 }
 0x14e   : > { %5465 = vst [vmem:[#allocation27_spill] sm:$0xff] %v4459_v44 }
 0x14f   : > { %v4461_v45 = vpop.f32.mrf.mxu0 }
 0x151   : > { %v4463_v46 = vpop.f32.mrf.mxu0 }
 0x152   : > { %5466 = vst [vmem:[#allocation28_spill] sm:$0xff] %v4463_v46  ;;  %v1145_v46 = vshrl.u32 %v1144_v15, 7 }
 0x153   : > { %v4465_v47 = vpop.f32.mrf.mxu0 }
 0x154   : > { %5467 = vst [vmem:[#allocation29_spill] sm:$0xff] %v4465_v47  ;;  %v4503_v47 = vsub.s32 0, %v1145_v46 }
 0x155   : > { %v4467_v48 = vpop.f32.mrf.mxu0 }
 0x156   : > { %5468 = vst [vmem:[#allocation30_spill] sm:$0xff] %v4467_v48 }
 0x157   : > { %v4469_v49 = vpop.f32.mrf.mxu0 }
 0x158   : > { %5469 = vst [vmem:[#allocation31_spill] sm:$0xff] %v4469_v49  ;;  %v1143_v49 = vunpack.c.0.s8 %v1142_v7 }
 0x159   : > { %v4471_v50 = vpop.f32.mrf.mxu0 }
 0x15a   : > { %5470 = vst [vmem:[#allocation32_spill] sm:$0xff] %v4471_v50 }
 0x15b   : > { %v4473_v51 = vpop.f32.mrf.mxu0 }
 0x15c   : > { %5471 = vst [vmem:[#allocation33_spill] sm:$0xff] %v4473_v51 }
 0x15d   : > { %v4475_v52 = vpop.f32.mrf.mxu0 }
 0x15e   : > { %5472 = vst [vmem:[#allocation34_spill] sm:$0xff] %v4475_v52  ;;  %v4494_v52 = vld [vmem:[%s5421_s5] ss:$0 sm:$0xff] }
 0x15f   : > { %v4477_v53 = vpop.f32.mrf.mxu0 }
 0x161   : > { %v4479_v54 = vpop.f32.mrf.mxu0 }
 0x162   : > { %5473 = vst [vmem:[#allocation35_spill] sm:$0xff] %v4479_v54  ;;  %v4496_v54 = vsub.s32 %v1143_v49, %v1145_v46 }
 0x163   : > { %v4481_v58 = vpop.f32.mrf.mxu0 }
 0x164   : > { %5474 = vst [vmem:[#allocation36_spill] sm:$0xff] %v4481_v58 }
 0x165   : > { %v4483_v18 = vpop.f32.mrf.mxu0 }
 0x166   : > { %5475 = vst [vmem:[#allocation37_spill] sm:$0xff] %v4483_v18 }
 0x167   : > { %v4485_v48 = vpop.f32.mrf.mxu0 }
 0x168   : > { %5476 = vst [vmem:[#allocation38_spill] sm:$0xff] %v4485_v48 }
 0x169   : > { %v4487_v50 = vpop.f32.mrf.mxu0 }
 0x16a   : > { %5477 = vst [vmem:[#allocation39_spill] sm:$0xff] %v4487_v50 }
 0x16b   : > { %v4489_v51 = vpop.f32.mrf.mxu0 }
 0x16c   : > { %5478 = vst [vmem:[#allocation40_spill] sm:$0xff] %v4489_v51 }
 0x16d   : > { %v3984_v58 = vpop.f32.mrf.mxu0 }
 0x16e   : > { %v1110_v1 = vadd.f32 %v3984_v58, %v4494_v52 }
 0x16f   : > { %v1101_v44 = vpop.f32.mrf.mxu0 }
 0x170   : > { %v1238_v18 = vcombine.high %v1110_v1, %v1110_v1  ;;  %v1245_v48 = vrot.slane %v1110_v1, %v4496_v54  ;;  %v1102_v7 = vadd.f32 %v4494_v52, %v1101_v44 }
 0x171   : > { %v3985_v40 = vpop.f32.mrf.mxu0 }
 0x172   : > { %v1252_v15 = vrot.slane %v1238_v18, %v4496_v54  ;;  %v1253_v50 = vcombine.high %v1245_v48, %v1245_v48  ;;  %v1140_v51 = vcombine.high %v1102_v7, %v1102_v7  ;;  %v1261_v42 = vrot.slane %v1245_v48, %v4496_v54 }
 0x173   : > { %v1147_v49 = vrot.slane %v1102_v7, %v4496_v54  ;;  %v1113_v18 = vadd.f32 %v3985_v40, %v4494_v52  ;;  %v1104_v7 = vpop.f32.mrf.mxu0 }
 0x174   : > { %v1254_v43 = vcombine.high %v1252_v15, %v1252_v15  ;;  %v4507_v58 = vrot.slane %v1252_v15, %v4496_v54  ;;  %v4510_v41 = vrot.slane %v1253_v50, %v4496_v54  ;;  %v1154_v44 = vrot.slane %v1140_v51, %v4496_v54 }
 0x175   : > { %v1155_v1 = vcombine.high %v1147_v49, %v1147_v49  ;;  %v1283_v46 = vcombine.high %v1261_v42, %v1261_v42  ;;  %v1599_v48 = vrot.slane %v1261_v42, %v4503_v47  ;;  %v4519_v34 = vrot.slane %v1147_v49, %v4496_v54  ;;  %v3988_v33 = vpop.f32.mrf.mxu0 }
 0x176   : > { %5479 = vst [vmem:[#allocation41_spill] sm:$0xff] %v4507_v58  ;;  %v4515_v38 = vrot.slane %v1254_v43, %v4496_v54  ;;  %v1156_v36 = vcombine.high %v1154_v44, %v1154_v44  ;;  %v1284_v50 = vcombine.high %v4507_v58, %v4507_v58  ;;  %v1285_v51 = vcombine.high %v4510_v41, %v4510_v41 }
 0x177   : > { %v4528_v43 = vrot.slane %v1154_v44, %v4496_v54  ;;  %v4531_v15 = vrot.slane %v1155_v1, %v4496_v54  ;;  %v1287_v42 = vcombine.high %v1113_v18, %v1113_v18  ;;  %v1294_v32 = vrot.slane %v1113_v18, %v4496_v54  ;;  %v1117_v24 = vpop.f32.mrf.mxu0 }
 0x178   : > { %5480 = vst [vmem:[#allocation42_spill] sm:$0xff] %v4515_v38  ;;  %v1105_v49 = vadd.f32 %v4494_v52, %v1104_v7  ;;  %v4538_v35 = vrot.slane %v1283_v46, %v4503_v47  ;;  %v4543_v44 = vadd.f32 %v1599_v48, %v4391_v11  ;;  %v4546_v1 = vrot.slane %v1156_v36, %v4496_v54 }
 0x179   : > { %v1185_v18 = vcombine.high %v4519_v34, %v4519_v34  ;;  %v1301_v7 = vrot.slane %v1287_v42, %v4496_v54  ;;  %v1302_v30 = vcombine.high %v1294_v32, %v1294_v32  ;;  %v4552_v39 = vrot.slane %v1285_v51, %v4503_v47  ;;  %v3989_v23 = vpop.f32.mrf.mxu0 }
 0x17a   : > { %5481 = vst [vmem:[#allocation43_spill] sm:$0xff] %v4543_v44  ;;  %v1310_v40 = vrot.slane %v1294_v32, %v4496_v54  ;;  %v1189_v11 = vcombine.high %v1105_v49, %v1105_v49  ;;  %v1186_v48 = vcombine.high %v4528_v43, %v4528_v43  ;;  %v1187_v36 = vcombine.high %v4531_v15, %v4531_v15 }
 0x17b   : > { %v1303_v28 = vcombine.high %v1301_v7, %v1301_v7  ;;  %v1196_v26 = vrot.slane %v1105_v49, %v4496_v54  ;;  %v4563_v42 = vrot.slane %v1284_v50, %v4503_v47  ;;  %v4566_v51 = vrot.slane %v1301_v7, %v4496_v54 }
 0x17c   : > { %v4569_v46 = vrot.slane %v1302_v30, %v4496_v54  ;;  %v1203_v32 = vrot.slane %v1189_v11, %v4496_v54  ;;  %v4577_v49 = vrot.slane %v1185_v18, %v4503_v47  ;;  %v1126_v50 = vadd.f32 %v3988_v33, %v4494_v52 }
 0x17d   : > { %5482 = vst [vmem:[#allocation44_spill] sm:$0xff] %v4563_v42  ;;  %5483 = vst [vmem:[#allocation45_spill] sm:$0xff] %v4566_v51  ;;  %v1332_v25 = vcombine.high %v1310_v40, %v1310_v40  ;;  %v1204_v11 = vcombine.high %v1196_v26, %v1196_v26  ;;  %v4585_v22 = vrot.slane %v1187_v36, %v4503_v47 }
 0x17e   : > { %5484 = vst [vmem:[#allocation46_spill] sm:$0xff] %v4569_v46  ;;  %v4588_v31 = vrot.slane %v1186_v48, %v4503_v47  ;;  %v4591_v27 = vrot.slane %v1303_v28, %v4496_v54  ;;  %v1631_v18 = vrot.slane %v1310_v40, %v4503_v47  ;;  %v1333_v33 = vcombine.high %v4566_v51, %v4566_v51 }
 0x17f   : > { %v1334_v7 = vcombine.high %v4569_v46, %v4569_v46  ;;  %v1205_v30 = vcombine.high %v1203_v32, %v1203_v32  ;;  %v1212_v20 = vrot.slane %v1196_v26, %v4496_v54  ;;  %v4600_v36 = vrot.slane %v1203_v32, %v4496_v54 }
 0x180   : > { %5485 = vst [vmem:[#allocation47_spill] sm:$0xff] %v4591_v27  ;;  %v4603_v48 = vrot.slane %v1204_v11, %v4496_v54  ;;  %v1434_v28 = vcombine.high %v1126_v50, %v1126_v50  ;;  %v1441_v14 = vrot.slane %v1126_v50, %v4496_v54  ;;  %v4609_v42 = vrot.slane %v1332_v25, %v4503_v47 }
 0x181   : > { %v1118_v26 = vadd.f32 %v4494_v52, %v1117_v24  ;;  %v4617_v11 = vadd.f32 %v1631_v18, %v4413_v21  ;;  %v1129_v50 = vadd.f32 %v3989_v23, %v4494_v52  ;;  %v4622_v40 = vrot.slane %v1334_v7, %v4503_v47 }
 0x182   : > { %5486 = vst [vmem:[#allocation48_spill] sm:$0xff] %v4609_v42  ;;  %v1448_v44 = vrot.slane %v1434_v28, %v4496_v54  ;;  %v4627_v17 = vrot.slane %v1205_v30, %v4496_v54  ;;  %v1234_v24 = vcombine.high %v1212_v20, %v1212_v20  ;;  %v1235_v32 = vcombine.high %v4600_v36, %v4600_v36 }
 0x183   : > { %5487 = vst [vmem:[#allocation49_spill] sm:$0xff] %v4617_v11  ;;  %5488 = vst [vmem:[#allocation50_spill] sm:$0xff] %v4622_v40  ;;  %v1236_v21 = vcombine.high %v4603_v48, %v4603_v48  ;;  %v1449_v18 = vcombine.high %v1441_v14, %v1441_v14  ;;  %v1457_v23 = vrot.slane %v1441_v14, %v4496_v54 }
 0x184   : > { %v1450_v28 = vcombine.high %v1448_v44, %v1448_v44  ;;  %v4635_v7 = vrot.slane %v1448_v44, %v4496_v54  ;;  %v1336_v11 = vcombine.high %v1118_v26, %v1118_v26  ;;  %v1343_v25 = vrot.slane %v1118_v26, %v4496_v54 }
 0x185   : > { %v4639_v30 = vrot.slane %v1449_v18, %v4496_v54  ;;  %v1483_v51 = vcombine.high %v1129_v50, %v1129_v50  ;;  %v1490_v40 = vrot.slane %v1129_v50, %v4496_v54  ;;  %v4646_v42 = vrot.slane %v1333_v33, %v4503_v47 }
 0x186   : > { %5489 = vst [vmem:[#allocation51_spill] sm:$0xff] %v4635_v7  ;;  %v4642_v27 = vrot.slane %v1450_v28, %v4496_v54  ;;  %v1567_v14 = vrot.slane %v1212_v20, %v4503_v47  ;;  %v1727_v46 = vrot.slane %v1457_v23, %v4503_v47  ;;  %v4655_v18 = vrot.slane %v1234_v24, %v4503_v47 }
 0x187   : > { %5491 = vst [vmem:[#allocation53_spill] sm:$0xff] %v4646_v42  ;;  %v4658_v28 = vrot.slane %v1236_v21, %v4503_v47  ;;  %v4665_v50 = vrot.slane %v1235_v32, %v4503_v47  ;;  %v1350_v26 = vrot.slane %v1336_v11, %v4496_v54  ;;  %v1479_v42 = vcombine.high %v1457_v23, %v1457_v23 }
 0x188   : > { %5490 = vst [vmem:[#allocation52_spill] sm:$0xff] %v4642_v27  ;;  %v4668_v44 = vadd.f32 %v1727_v46, %v4461_v45  ;;  %v1351_v24 = vcombine.high %v1343_v25, %v1343_v25  ;;  %v1359_v58 = vrot.slane %v1343_v25, %v4496_v54  ;;  %v1497_v21 = vrot.slane %v1483_v51, %v4496_v54 }
 0x189   : > { %v1352_v16 = vcombine.high %v1350_v26, %v1350_v26  ;;  %v4674_v33 = vrot.slane %v1350_v26, %v4496_v54  ;;  %v1498_v38 = vcombine.high %v1490_v40, %v1490_v40  ;;  %v4677_v20 = vrot.slane %v1490_v40, %v4496_v54 }
 0x18a   : > { %5492 = vst [vmem:[#allocation54_spill] sm:$0xff] %v4668_v44  ;;  %v1480_v45 = vcombine.high %v4635_v7, %v4635_v7  ;;  %v1481_v46 = vcombine.high %v4639_v30, %v4639_v30  ;;  %v4684_v32 = vrot.slane %v1351_v24, %v4496_v54  ;;  %v1499_v11 = vcombine.high %v1497_v21, %v1497_v21  ;;  %v1120_v7 = vpop.f32.mrf.mxu0 }
 0x18b   : > { %v4687_v51 = vadd.f32 %v1567_v14, %v4372_v2  ;;  %v1381_v23 = vcombine.high %v1359_v58, %v1359_v58  ;;  %v4692_v40 = vrot.slane %v1497_v21, %v4496_v54  ;;  %v4697_v44 = vrot.slane %v1352_v16, %v4496_v54 }
 0x18c   : > { %v1382_v24 = vcombine.high %v4674_v33, %v4674_v33  ;;  %v1663_v19 = vrot.slane %v1359_v58, %v4503_v47  ;;  %v1383_v21 = vcombine.high %v4684_v32, %v4684_v32  ;;  %v4709_v25 = vrot.slane %v1498_v38, %v4496_v54 }
 0x18d   : > { %5493 = vst [vmem:[#allocation55_spill] sm:$0xff] %v4692_v40  ;;  %v4712_v16 = vrot.slane %v1479_v42, %v4503_v47  ;;  %v4715_v26 = vrot.slane %v1481_v46, %v4503_v47  ;;  %v4718_v58 = vrot.slane %v1480_v45, %v4503_v47  ;;  %v4721_v2 = vrot.slane %v1499_v11, %v4496_v54 }
 0x18e   : > { %5494 = vst [vmem:[#allocation56_spill] sm:$0xff] %v4709_v25  ;;  %v4726_v27 = vrot.slane %v1381_v23, %v4503_v47  ;;  %v1759_v42 = vrot.slane %v4677_v20, %v4503_v47  ;;  %v4737_v11 = vrot.slane %v1382_v24, %v4503_v47  ;;  %v4740_v14 = vadd.f32 %v1663_v19, %v4429_v29 }
 0x18f   : > { %5495 = vst [vmem:[#allocation57_spill] sm:$0xff] %v4715_v26  ;;  %5496 = vst [vmem:[#allocation58_spill] sm:$0xff] %v4718_v58  ;;  %v4743_v23 = vrot.slane %v1383_v21, %v4503_v47  ;;  %v1121_v58 = vadd.f32 %v4494_v52, %v1120_v7  ;;  %v1539_v45 = vrot.slane %v4531_v15, %v4503_v47  ;;  %vm1924_vm9 = vcmp.ge.f32.partialorder %v4687_v51, 0.0 }
 0x190   : > { %v4746_v38 = vadd.f32 %v1759_v42, %v4477_v53  ;;  %v1528_v46 = vcombine.high %v4677_v20, %v4677_v20  ;;  %v1529_v24 = vcombine.high %v4692_v40, %v4692_v40  ;;  %v5498_v19 = vrot.slane %v4519_v34, %v4503_v47 }
 0x191   : > { %v1855_v53 = vadd.f32 %v4352_v57, %v4585_v22  ;;  %v1385_v21 = vcombine.high %v1121_v58, %v1121_v58  ;;  %v1392_v52 = vrot.slane %v1121_v58, %v4496_v54  ;;  %v1853_v7 = vadd.f32 %v1539_v45, %v4357_v59 }
 0x192   : > { %5497 = vst [vmem:[#allocation59_spill] sm:$0xff] %v4746_v38  ;;  %v1852_v29 = vadd.f32 %v5498_v19, %v4350_v56  ;;  %v1854_v15 = vadd.f32 %v4348_v55, %v4577_v49  ;;  %v1530_v20 = vcombine.high %v4709_v25, %v4709_v25  ;;  %v5500_v40 = vrot.slane %v4546_v1, %v4503_v47 }
 0x193   : > { %v1399_v57 = vrot.slane %v1385_v21, %v4496_v54  ;;  %v1400_v22 = vcombine.high %v1392_v52, %v1392_v52  ;;  %v4773_v58 = vrot.slane %v1392_v52, %v4496_v54  ;;  %vm1917_vm0 = vcmp.ge.f32.partialorder %v1853_v7, 0.0 }
 0x194   : > { %v1980_v34 = vmul.f32 0.01, %v1852_v29  ;;  %vm1916_vm1 = vcmp.ge.f32.partialorder %v1852_v29, 0.0  ;;  %v1981_v59 = vmul.f32 0.01, %v1853_v7  ;;  %vm1919_vm2 = vcmp.ge.f32.partialorder %v1855_v53, 0.0 }
 0x195   : > { %v1983_v55 = vmul.f32 0.01, %v1855_v53  ;;  %v1401_v49 = vcombine.high %v1399_v57, %v1399_v57  ;;  %v4776_v45 = vrot.slane %v1399_v57, %v4496_v54  ;;  %v4779_v19 = vrot.slane %v1400_v22, %v4496_v54 }
 0x196   : > { %v1982_v56 = vmul.f32 0.01, %v1854_v15  ;;  %v2045_v42 = vsel %vm1917_vm0, %v1853_v7, %v1981_v59  ;;  %vm1918_vm3 = vcmp.ge.f32.partialorder %v1854_v15, 0.0  ;;  %v5499_v21 = vrot.slane %v4528_v43, %v4503_v47 }
 0x197   : > { %v1857_v38 = vadd.f32 %v5500_v40, %v4365_v63  ;;  %v1531_v57 = vcombine.high %v4721_v2, %v4721_v2  ;;  %v4792_v25 = vrot.slane %v1401_v49, %v4496_v54  ;;  %v2044_v22 = vsel %vm1916_vm1, %v1852_v29, %v1980_v34 }
 0x198   : > { %v1856_v52 = vadd.f32 %v5499_v21, %v4361_v61  ;;  %v2047_v26 = vsel %vm1919_vm2, %v1855_v53, %v1983_v55  ;;  %v4795_v7 = vrot.slane %v1528_v46, %v4503_v47  ;;  %v1779_v43 = vrot.slane %v4721_v2, %v4503_v47 }
 0x199   : > { %v4800_v61 = vrot.slane %v1529_v24, %v4503_v47  ;;  %v2108_v59 = vpack.c.bf16 %v2045_v42, %v2044_v22  ;;  %v4803_v63 = vrot.slane %v1530_v20, %v4503_v47  ;;  %v1430_v40 = vcombine.high %v4773_v58, %v4773_v58 }
 0x19a   : > { %v1695_v54 = vrot.slane %v4773_v58, %v4503_v47  ;;  %v2046_v29 = vsel %vm1918_vm3, %v1854_v15, %v1982_v56  ;;  %vm1920_vm4 = vcmp.ge.f32.partialorder %v1856_v52, 0.0  ;;  %vm1921_vm5 = vcmp.ge.f32.partialorder %v1857_v38, 0.0 }
 0x19b   : > { %4006 = vmatprep.mubr.bf16.mxu1 %v2108_v59  ;;  %v2109_v46 = vpack.c.bf16 %v2047_v26, %v2046_v29  ;;  %v1984_v53 = vmul.f32 0.01, %v1856_v52  ;;  %v1985_v34 = vmul.f32 0.01, %v1857_v38  ;;  %v5501_v24 = vcombine.high %v4546_v1, %v4546_v1 }
 0x19c   : > { %v1858_v20 = vadd.f32 %v4359_v60, %v4588_v31  ;;  %v5502_v55 = vrot.slane %v4603_v48, %v4503_v47  ;;  %v1431_v26 = vcombine.high %v4776_v45, %v4776_v45  ;;  %v1432_v15 = vcombine.high %v4779_v19, %v4779_v19 }
 0x19d   : > { %v1563_v42 = vrot.slane %v5501_v24, %v4503_v47  ;;  %4007 = vmatmul.mubr.bf16.vlgmr.msra.gmra.mxu1 %v2109_v46  ;;  %v2048_v56 = vsel %vm1920_vm4, %v1856_v52, %v1984_v53  ;;  %v1988_v49 = vmul.f32 0.01, %v4687_v51  ;;  %v2049_v1 = vsel %vm1921_vm5, %v1857_v38, %v1985_v34 }
 0x19e   : > { %v1861_v58 = vadd.f32 %v5502_v55, %v4376_v4  ;;  %v1986_v22 = vmul.f32 0.01, %v1858_v20  ;;  %v1862_v60 = vadd.f32 %v4367_v0, %v4655_v18  ;;  %v2110_v31 = vpack.c.bf16 %v2049_v1, %v2048_v56 }
 0x19f   : > { %v1859_v21 = vadd.f32 %v4363_v62, %v1563_v42  ;;  %vm1922_vm6 = vcmp.ge.f32.partialorder %v1858_v20, 0.0  ;;  %v1863_v52 = vadd.f32 %v4374_v3, %v4658_v28  ;;  %v1699_v38 = vrot.slane %v4779_v19, %v4503_v47 }
 0x1a0   : > { %vm1925_vm7 = vcmp.ge.f32.partialorder %v1861_v58, 0.0  ;;  %v1989_v4 = vmul.f32 0.01, %v1861_v58  ;;  %v4833_v62 = vrot.slane %v1430_v40, %v4503_v47  ;;  %4010 = vmatprep.mubr.bf16.mxu1 %v2110_v31  ;;  %v5503_v0 = vrot.slane %v4600_v36, %v4503_v47 }
 0x1a1   : > { %vm1923_vm8 = vcmp.ge.f32.partialorder %v1859_v21, 0.0  ;;  %v1987_v48 = vmul.f32 0.01, %v1859_v21  ;;  %v2050_v29 = vsel %vm1922_vm6, %v1858_v20, %v1986_v22  ;;  %vm1927_vm10 = vcmp.ge.f32.partialorder %v1863_v52, 0.0 }
 0x1a2   : > { %v2053_v59 = vsel %vm1925_vm7, %v1861_v58, %v1989_v4  ;;  %v1864_v18 = vadd.f32 %v5503_v0, %v4380_v6  ;;  %v1991_v53 = vmul.f32 0.01, %v1863_v52  ;;  %v2052_v3 = vsel %vm1924_vm9, %v4687_v51, %v1988_v49 }
 0x1a3   : > { %v2051_v46 = vsel %vm1923_vm8, %v1859_v21, %v1987_v48  ;;  %v1990_v28 = vmul.f32 0.01, %v1862_v60  ;;  %v5504_v40 = vrot.slane %v4627_v17, %v4503_v47  ;;  %v2112_v42 = vpack.c.bf16 %v2053_v59, %v2052_v3 }
 0x1a4   : > { %v2111_v34 = vpack.c.bf16 %v2051_v46, %v2050_v29  ;;  %vm1926_vm11 = vcmp.ge.f32.partialorder %v1862_v60, 0.0  ;;  %v1992_v55 = vmul.f32 0.01, %v1864_v18  ;;  %v5505_v6 = vcombine.high %v4627_v17, %v4627_v17  ;;  %v5511_v29 = vld [vmem:[#allocation3_spill] sm:$0xff] }
 0x1a5   : > { %v1865_v24 = vadd.f32 %v5504_v40, %v4387_v9  ;;  %v1711_v20 = vrot.slane %v4776_v45, %v4503_v47  ;;  %v2055_v58 = vsel %vm1927_vm10, %v1863_v52, %v1991_v53  ;;  %vm1928_vm12 = vcmp.ge.f32.partialorder %v1864_v18, 0.0  ;;  %v5507_v52 = vld [vmem:[#allocation5_spill] sm:$0xff]  ;;  %v5514_v46 = vld [vmem:[#allocation43_spill] sm:$0xff] }
 0x1a6   : > { %v1595_v36 = vrot.slane %v5505_v6, %v4503_v47  ;;  %4011 = vmatmul.mubr.bf16.gmra.mxu1 %v2111_v34  ;;  %v4851_v56 = vadd.f32 %v1695_v54, %v4445_v37  ;;  %v5506_v49 = vrot.slane %v4510_v41, %v4503_v47  ;;  %v1433_v1 = vcombine.high %v4792_v25, %v4792_v25 }
 0x1a7   : > { %v1993_v51 = vmul.f32 0.01, %v1865_v24  ;;  %4014 = vmatprep.mubr.bf16.mxu1 %v2112_v42  ;;  %vm1929_vm13 = vcmp.ge.f32.partialorder %v1865_v24, 0.0  ;;  %v4861_v21 = vrot.slane %v1432_v15, %v4503_v47  ;;  %v2054_v22 = vsel %vm1926_vm11, %v1862_v60, %v1990_v28  ;;  %v5515_v42 = vld [vmem:[#allocation4_spill] sm:$0xff] }
 0x1a8   : > { %v1867_v9 = vadd.f32 %v4385_v8, %v1595_v36  ;;  %v1869_v17 = vadd.f32 %v5506_v49, %v4395_v13  ;;  %v1866_v37 = vadd.f32 %v4378_v5, %v4665_v50  ;;  %v1715_v54 = vrot.slane %v4792_v25, %v4503_v47  ;;  %v5508_v5 = vld [vmem:[#allocation42_spill] sm:$0xff] }
 0x1a9   : > { %v4868_v8 = vrot.slane %v1431_v26, %v4503_v47  ;;  %v2113_v31 = vpack.c.bf16 %v2055_v58, %v2054_v22  ;;  %v2056_v4 = vsel %vm1928_vm12, %v1864_v18, %v1992_v55  ;;  %v2057_v41 = vsel %vm1929_vm13, %v1865_v24, %v1993_v51  ;;  %v5516_v51 = vld [vmem:[#allocation44_spill] sm:$0xff]  ;;  %v5517_v49 = vld [vmem:[#allocation2_spill] sm:$0xff] }
 0x1aa   : > { %v1995_v13 = vmul.f32 0.01, %v1867_v9  ;;  %v1870_v48 = vadd.f32 %v4389_v10, %v4538_v35  ;;  %v1871_v15 = vadd.f32 %v4393_v12, %v4552_v39  ;;  %vm1931_vm14 = vcmp.ge.f32.partialorder %v1867_v9, 0.0  ;;  %v5512_v10 = vld [vmem:[#allocation41_spill] sm:$0xff] }
 0x1ab   : > { %v1997_v60 = vmul.f32 0.01, %v1869_v17  ;;  %v5509_v50 = vrot.slane %v5508_v5, %v4503_v47  ;;  %v5510_v26 = vcombine.high %v5508_v5, %v5508_v5  ;;  %vm1930_vm15 = vcmp.ge.f32.partialorder %v1866_v37, 0.0 }
 0x1ac   : > { %v1994_v18 = vmul.f32 0.01, %v1866_v37  ;;  %vm1933_vm0 = vcmp.ge.f32.partialorder %v1869_v17, 0.0  ;;  %v5513_v35 = vrot.slane %v5512_v10, %v4503_v47  ;;  %v2114_v39 = vpack.c.bf16 %v2057_v41, %v2056_v4  ;;  %v5519_v41 = vld [vmem:[#allocation46_spill] sm:$0xff] }
 0x1ad   : > { %v1873_v59 = vadd.f32 %v5509_v50, %v5507_v52  ;;  %v1627_v0 = vrot.slane %v5510_v26, %v4503_v47  ;;  %v1996_v53 = vmul.f32 0.01, %v5514_v46  ;;  %vm1935_vm1 = vcmp.ge.f32.partialorder %v1871_v15, 0.0 }
 0x1ae   : > { %v1872_v12 = vadd.f32 %v5513_v35, %v5511_v29  ;;  %v1999_v34 = vmul.f32 0.01, %v1871_v15  ;;  %4015 = vmatmul.mubr.bf16.gmra.mxu1 %v2113_v31  ;;  %v2059_v3 = vsel %vm1931_vm14, %v1867_v9, %v1995_v13  ;;  %vm1932_vm2 = vcmp.ge.f32.partialorder %v5514_v46, 0.0  ;;  %v5518_v31 = vld [vmem:[#allocation8_spill] sm:$0xff]  ;;  %v5524_v29 = vld [vmem:[#allocation7_spill] sm:$0xff] }
 0x1af   : > { %v1998_v28 = vmul.f32 0.01, %v1870_v48  ;;  %v2001_v40 = vmul.f32 0.01, %v1873_v59  ;;  %4018 = vmatprep.mubr.bf16.mxu1 %v2114_v39  ;;  %v2061_v24 = vsel %vm1933_vm0, %v1869_v17, %v1997_v60  ;;  %vm1934_vm3 = vcmp.ge.f32.partialorder %v1870_v48, 0.0 }
 0x1b0   : > { %vm1937_vm4 = vcmp.ge.f32.partialorder %v1873_v59, 0.0  ;;  %v1875_v55 = vadd.f32 %v5515_v42, %v1627_v0  ;;  %v2058_v6 = vsel %vm1930_vm15, %v1866_v37, %v1994_v18  ;;  %v2063_v36 = vsel %vm1935_vm1, %v1871_v15, %v1999_v34  ;;  %v5521_v37 = vld [vmem:[#allocation48_spill] sm:$0xff]  ;;  %v5522_v15 = vld [vmem:[#allocation6_spill] sm:$0xff] }
 0x1b1   : > { %v2000_v58 = vmul.f32 0.01, %v1872_v12  ;;  %v1874_v22 = vadd.f32 %v5517_v49, %v5516_v51  ;;  %v2115_v4 = vpack.c.bf16 %v2059_v3, %v2058_v6  ;;  %v2060_v9 = vsel %vm1932_vm2, %v5514_v46, %v1996_v53  ;;  %v5523_v18 = vld [vmem:[#allocation50_spill] sm:$0xff]  ;;  %v5526_v53 = vld [vmem:[#allocation45_spill] sm:$0xff]  ;;  %v5529_v6 = vld [vmem:[#allocation12_spill] sm:$0xff] }
 0x1b2   : > { %vm1936_vm5 = vcmp.ge.f32.partialorder %v1872_v12, 0.0  ;;  %v5520_v13 = vrot.slane %v5519_v41, %v4503_v47  ;;  %v2116_v60 = vpack.c.bf16 %v2061_v24, %v2060_v9  ;;  %v2062_v52 = vsel %vm1934_vm3, %v1870_v48, %v1998_v28  ;;  %v5525_v46 = vld [vmem:[#allocation10_spill] sm:$0xff]  ;;  %v5528_v48 = vld [vmem:[#allocation49_spill] sm:$0xff] }
 0x1b3   : > { %v2065_v5 = vsel %vm1937_vm4, %v1873_v59, %v2001_v40  ;;  %v2003_v50 = vmul.f32 0.01, %v1875_v55  ;;  %v2117_v26 = vpack.c.bf16 %v2063_v36, %v2062_v52  ;;  %vm1939_vm6 = vcmp.ge.f32.partialorder %v1875_v55, 0.0 }
 0x1b4   : > { %v1877_v17 = vadd.f32 %v5520_v13, %v5518_v31  ;;  %v1878_v0 = vadd.f32 %v5522_v15, %v5521_v37  ;;  %v1879_v10 = vadd.f32 %v5524_v29, %v5523_v18  ;;  %v2064_v35 = vsel %vm1936_vm5, %v1872_v12, %v2000_v58  ;;  %v5530_v12 = vld [vmem:[#allocation47_spill] sm:$0xff] }
 0x1b5   : > { %vm1938_vm7 = vcmp.ge.f32.partialorder %v1874_v22, 0.0  ;;  %v2002_v39 = vmul.f32 0.01, %v1874_v22  ;;  %v5527_v34 = vrot.slane %v5526_v53, %v4503_v47  ;;  %v2118_v24 = vpack.c.bf16 %v2065_v5, %v2064_v35  ;;  %v5535_v5 = vld [vmem:[#allocation53_spill] sm:$0xff]  ;;  %v5537_v15 = vld [vmem:[#allocation11_spill] sm:$0xff] }
 0x1b6   : > { %vm1940_vm8 = vcmp.ge.f32.partialorder %v5528_v48, 0.0  ;;  %vm1941_vm9 = vcmp.ge.f32.partialorder %v1877_v17, 0.0  ;;  %v2004_v59 = vmul.f32 0.01, %v5528_v48  ;;  %4019 = vmatmul.mubr.bf16.gmra.mxu1 %v2115_v4  ;;  %v4907_v28 = vsel %vm1939_vm6, %v1875_v55, %v2003_v50  ;;  %v5533_v55 = vld [vmem:[#allocation15_spill] sm:$0xff]  ;;  %v5536_v50 = vld [vmem:[#allocation9_spill] sm:$0xff] }
 0x1b7   : > { %v1880_v3 = vadd.f32 %v5527_v34, %v5525_v46  ;;  %v2005_v40 = vmul.f32 0.01, %v1877_v17  ;;  %v2006_v42 = vmul.f32 0.01, %v1878_v0  ;;  %v5531_v36 = vrot.slane %v5530_v12, %v4503_v47  ;;  %4022 = vmatprep.mubr.bf16.mxu1 %v2116_v60  ;;  %v5538_v34 = vld [vmem:[#allocation13_spill] sm:$0xff] }
 0x1b8   : > { %vm1942_vm10 = vcmp.ge.f32.partialorder %v1878_v0, 0.0  ;;  %v2007_v51 = vmul.f32 0.01, %v1879_v10  ;;  %v5532_v9 = vcombine.high %v5530_v12, %v5530_v12  ;;  %v2066_v4 = vsel %vm1938_vm7, %v1874_v22, %v2002_v39 }
 0x1b9   : > { %v1881_v58 = vadd.f32 %v5531_v36, %v5529_v6  ;;  %v2008_v49 = vmul.f32 0.01, %v1880_v3  ;;  %vm1943_vm11 = vcmp.ge.f32.partialorder %v1879_v10, 0.0  ;;  %vm1944_vm12 = vcmp.ge.f32.partialorder %v1880_v3, 0.0  ;;  %v5539_v6 = vld [vmem:[#allocation14_spill] sm:$0xff] }
 0x1ba   : > { %v1659_v31 = vrot.slane %v5532_v9, %v4503_v47  ;;  %v5534_v41 = vrot.slane %v4684_v32, %v4503_v47  ;;  %v2119_v52 = vpack.c.bf16 %v4907_v28, %v2066_v4  ;;  %v1882_v37 = vadd.f32 %v5536_v50, %v5535_v5 }
 0x1bb   : > { %v2009_v60 = vmul.f32 0.01, %v1881_v58  ;;  %v2068_v29 = vsel %vm1940_vm8, %v5528_v48, %v2004_v59  ;;  %v2069_v22 = vsel %vm1941_vm9, %v1877_v17, %v2005_v40  ;;  %v4930_v35 = vsel %vm1942_vm10, %v1878_v0, %v2006_v42 }
 0x1bc   : > { %v1885_v13 = vadd.f32 %v5534_v41, %v5533_v55  ;;  %v1883_v18 = vadd.f32 %v5537_v15, %v1659_v31  ;;  %vm1945_vm13 = vcmp.ge.f32.partialorder %v1881_v58, 0.0  ;;  %v4932_v39 = vsel %vm1943_vm11, %v1879_v10, %v2007_v51  ;;  %v5545_v55 = vld [vmem:[#allocation22_spill] sm:$0xff] }
 0x1bd   : > { %v4934_v32 = vsel %vm1944_vm12, %v1880_v3, %v2008_v49  ;;  %v1886_v28 = vadd.f32 %v5538_v34, %v4726_v27  ;;  %v1887_v12 = vadd.f32 %v5539_v6, %v4743_v23  ;;  %v4940_v48 = vsel %vm1945_vm13, %v1881_v58, %v2009_v60  ;;  %v5540_v3 = vld [vmem:[#allocation17_spill] sm:$0xff]  ;;  %v5542_v27 = vld [vmem:[#allocation19_spill] sm:$0xff] }
 0x1be   : > { %vm1947_vm14 = vcmp.ge.f32.partialorder %v1883_v18, 0.0  ;;  %v2011_v46 = vmul.f32 0.01, %v1883_v18  ;;  %vm1949_vm15 = vcmp.ge.f32.partialorder %v1885_v13, 0.0  ;;  %v2013_v53 = vmul.f32 0.01, %v1885_v13  ;;  %4023 = vmatmul.mubr.bf16.gmra.mxu1 %v2117_v26 }
 0x1bf   : > { %vm1946_vm0 = vcmp.ge.f32.partialorder %v1882_v37, 0.0  ;;  %v2010_v17 = vmul.f32 0.01, %v1882_v37  ;;  %v2012_v0 = vmul.f32 0.01, %v4740_v14  ;;  %vm1948_vm1 = vcmp.ge.f32.partialorder %v4740_v14, 0.0  ;;  %4026 = vmatprep.mubr.bf16.mxu1 %v2118_v24 }
 0x1c0   : > { %v4943_v10 = vsel %vm1947_vm14, %v1883_v18, %v2011_v46  ;;  %v5541_v59 = vrot.slane %v4674_v33, %v4503_v47  ;;  %v5543_v23 = vrot.slane %v4697_v44, %v4503_v47  ;;  %v4956_v36 = vsel %vm1949_vm15, %v1885_v13, %v2013_v53 }
 0x1c1   : > { %vm1951_vm2 = vcmp.ge.f32.partialorder %v1887_v12, 0.0  ;;  %v2014_v26 = vmul.f32 0.01, %v1886_v28  ;;  %v2015_v58 = vmul.f32 0.01, %v1887_v12  ;;  %v2120_v51 = vpack.c.bf16 %v2069_v22, %v2068_v29  ;;  %v5547_v29 = vld [vmem:[#allocation18_spill] sm:$0xff] }
 0x1c2   : > { %v4950_v40 = vadd.f32 %v5541_v59, %v5540_v3  ;;  %v1889_v42 = vadd.f32 %v5543_v23, %v5542_v27  ;;  %v2121_v49 = vpack.c.bf16 %v4932_v39, %v4930_v35  ;;  %v2122_v33 = vpack.c.bf16 %v4940_v48, %v4934_v32  ;;  %v5548_v35 = vld [vmem:[#allocation20_spill] sm:$0xff]  ;;  %v5549_v32 = vld [vmem:[#allocation21_spill] sm:$0xff] }
 0x1c3   : > { %vm1950_vm3 = vcmp.ge.f32.partialorder %v1886_v28, 0.0  ;;  %v4963_v9 = vsel %vm1946_vm0, %v1882_v37, %v2010_v17  ;;  %v4966_v31 = vsel %vm1948_vm1, %v4740_v14, %v2012_v0  ;;  %v5544_v24 = vcombine.high %v4697_v44, %v4697_v44  ;;  %v5546_v37 = vld [vmem:[#allocation16_spill] sm:$0xff]  ;;  %v5553_v3 = vld [vmem:[#allocation29_spill] sm:$0xff] }
 0x1c4   : > { %v1893_v41 = vadd.f32 %v1699_v38, %v5545_v55  ;;  %v2123_v13 = vpack.c.bf16 %v4943_v10, %v4963_v9  ;;  %v2124_v60 = vpack.c.bf16 %v4956_v36, %v4966_v31  ;;  %v4980_v5 = vsel %vm1951_vm2, %v1887_v12, %v2015_v58  ;;  %v5551_v12 = vld [vmem:[#allocation26_spill] sm:$0xff]  ;;  %v5555_v58 = vld [vmem:[#allocation25_spill] sm:$0xff] }
 0x1c5   : > { %v1691_v4 = vrot.slane %v5544_v24, %v4503_v47  ;;  %v2017_v14 = vmul.f32 0.01, %v1889_v42  ;;  %v4982_v50 = vsel %vm1950_vm3, %v1886_v28, %v2014_v26  ;;  %vm1953_vm4 = vcmp.ge.f32.partialorder %v1889_v42, 0.0  ;;  %v5550_v28 = vld [vmem:[#allocation24_spill] sm:$0xff] }
 0x1c6   : > { %v4985_v44 = vmul.f32 0.01, %v4950_v40  ;;  %v4989_v15 = vadd.f32 %v5546_v37, %v4737_v11  ;;  %vm1956_vm5 = vcmp.ge.f32.partialorder %v4851_v56, 0.0  ;;  %vm1957_vm6 = vcmp.ge.f32.partialorder %v1893_v41, 0.0  ;;  %4027 = vmatmul.mubr.bf16.gmra.mxu1 %v2119_v52  ;;  %v5557_v37 = vld [vmem:[#allocation27_spill] sm:$0xff] }
 0x1c7   : > { %v2020_v19 = vmul.f32 0.01, %v4851_v56  ;;  %v2021_v38 = vmul.f32 0.01, %v1893_v41  ;;  %v2125_v18 = vpack.c.bf16 %v4980_v5, %v4982_v50  ;;  %v4996_v22 = vadd.f32 %v5547_v29, %v1691_v4  ;;  %4030 = vmatprep.mubr.bf16.mxu1 %v2120_v51  ;;  %v5559_v29 = vld [vmem:[#allocation28_spill] sm:$0xff] }
 0x1c8   : > { %v1894_v39 = vadd.f32 %v5548_v35, %v4833_v62  ;;  %v1895_v46 = vadd.f32 %v5549_v32, %v4861_v21  ;;  %v5002_v11 = vsel %vm1953_vm4, %v1889_v42, %v2017_v14  ;;  %v1896_v6 = vadd.f32 %v1711_v20, %v5550_v28  ;;  %v5552_v20 = vld [vmem:[#allocation23_spill] sm:$0xff] }
 0x1c9   : > { %v5005_v53 = vsel %vm1956_vm5, %v4851_v56, %v2020_v19  ;;  %v5007_v34 = vsel %vm1957_vm6, %v1893_v41, %v2021_v38  ;;  %v1897_v56 = vadd.f32 %v1715_v54, %v5551_v12  ;;  %v1723_v45 = vrot.slane %v1433_v1, %v4503_v47  ;;  %v5558_v38 = vld [vmem:[#allocation57_spill] sm:$0xff]  ;;  %v5560_v32 = vld [vmem:[#allocation31_spill] sm:$0xff] }
 0x1ca   : > { %v2128_v62 = vpack.c.bf16 %v5007_v34, %v5005_v53  ;;  %vm1958_vm7 = vcmp.ge.f32.partialorder %v1894_v39, 0.0  ;;  %vm1959_vm8 = vcmp.ge.f32.partialorder %v1895_v46, 0.0  ;;  %v2022_v21 = vmul.f32 0.01, %v1894_v39 }
 0x1cb   : > { %v2023_v52 = vmul.f32 0.01, %v1895_v46  ;;  %vm1960_vm9 = vcmp.ge.f32.partialorder %v1896_v6, 0.0  ;;  %v2024_v48 = vmul.f32 0.01, %v1896_v6  ;;  %v1898_v0 = vadd.f32 %v5552_v20, %v4868_v8  ;;  %v5556_v8 = vld [vmem:[#allocation54_spill] sm:$0xff] }
 0x1cc   : > { %v5019_v17 = vsel %vm1958_vm7, %v1894_v39, %v2022_v21  ;;  %v5554_v59 = vrot.slane %v4639_v30, %v4503_v47  ;;  %vm1961_vm10 = vcmp.ge.f32.partialorder %v1897_v56, 0.0  ;;  %v2025_v54 = vmul.f32 0.01, %v1897_v56  ;;  %v5564_v21 = vld [vmem:[#allocation52_spill] sm:$0xff] }
 0x1cd   : > { %v5031_v23 = vsel %vm1959_vm8, %v1895_v46, %v2023_v52  ;;  %v5033_v42 = vsel %vm1960_vm9, %v1896_v6, %v2024_v48  ;;  %v1899_v25 = vadd.f32 %v5555_v58, %v1723_v45  ;;  %vm1962_vm11 = vcmp.ge.f32.partialorder %v1898_v0, 0.0  ;;  %v5561_v46 = vld [vmem:[#allocation51_spill] sm:$0xff]  ;;  %v5563_v6 = vld [vmem:[#allocation33_spill] sm:$0xff]  ;;  %v5568_v58 = vld [vmem:[#allocation30_spill] sm:$0xff] }
 0x1ce   : > { %v1901_v27 = vadd.f32 %v5554_v59, %v5553_v3  ;;  %v2129_v26 = vpack.c.bf16 %v5031_v23, %v5019_v17  ;;  %v2026_v1 = vmul.f32 0.01, %v1898_v0  ;;  %v5038_v51 = vsel %vm1961_vm10, %v1897_v56, %v2025_v54  ;;  %4031 = vmatmul.mubr.bf16.gmra.mxu1 %v2121_v49  ;;  %v5567_v54 = vld [vmem:[#allocation58_spill] sm:$0xff] }
 0x1cf   : > { %vm1964_vm12 = vcmp.ge.f32.partialorder %v5556_v8, 0.0  ;;  %v2028_v30 = vmul.f32 0.01, %v5556_v8  ;;  %v2130_v24 = vpack.c.bf16 %v5038_v51, %v5033_v42  ;;  %vm1963_vm14 = vcmp.ge.f32.partialorder %v1899_v25, 0.0  ;;  %4034 = vmatprep.mubr.bf16.mxu1 %v2122_v33 }
 0x1d0   : > { %vm1965_vm13 = vcmp.ge.f32.partialorder %v1901_v27, 0.0  ;;  %v2027_v4 = vmul.f32 0.01, %v1899_v25  ;;  %v5044_v55 = vsel %vm1962_vm11, %v1898_v0, %v2026_v1  ;;  %v2029_v41 = vmul.f32 0.01, %v1901_v27 }
 0x1d1   : > { %v5047_v14 = vsel %vm1964_vm12, %v5556_v8, %v2028_v30  ;;  %v1902_v19 = vadd.f32 %v5557_v37, %v4712_v16  ;;  %v1903_v35 = vadd.f32 %v5559_v29, %v5558_v38  ;;  %vm1952_vm15 = vcmp.ge.f32.partialorder %v4950_v40, 0.0 }
 0x1d2   : > { %v5054_v39 = vsel %vm1963_vm14, %v1899_v25, %v2027_v4  ;;  %v5562_v28 = vrot.slane %v5561_v46, %v4503_v47  ;;  %v5565_v52 = vrot.slane %v5564_v21, %v4503_v47  ;;  %v5566_v16 = vcombine.high %v5564_v21, %v5564_v21  ;;  %v5570_v4 = vld [vmem:[#allocation36_spill] sm:$0xff] }
 0x1d3   : > { %v2131_v33 = vpack.c.bf16 %v5054_v39, %v5044_v55  ;;  %v5071_v48 = vsel %vm1965_vm13, %v1901_v27, %v2029_v41  ;;  %vm1966_vm0 = vcmp.ge.f32.partialorder %v1902_v19, 0.0  ;;  %vm1967_vm1 = vcmp.ge.f32.partialorder %v1903_v35, 0.0  ;;  %v5569_v27 = vld [vmem:[#allocation32_spill] sm:$0xff] }
 0x1d4   : > { %v1904_v49 = vadd.f32 %v5562_v28, %v5560_v32  ;;  %v1905_v12 = vadd.f32 %v5565_v52, %v5563_v6  ;;  %v1755_v56 = vrot.slane %v5566_v16, %v4503_v47  ;;  %v2132_v45 = vpack.c.bf16 %v5071_v48, %v5047_v14  ;;  %v5571_v41 = vld [vmem:[#allocation56_spill] sm:$0xff]  ;;  %v5573_v6 = vld [vmem:[#allocation59_spill] sm:$0xff]  ;;  %v5574_v16 = vld [vmem:[#allocation34_spill] sm:$0xff] }
 0x1d5   : > { %v2030_v20 = vmul.f32 0.01, %v1902_v19  ;;  %v2031_v0 = vmul.f32 0.01, %v1903_v35  ;;  %v1906_v25 = vadd.f32 %v5568_v58, %v5567_v54  ;;  %v5572_v37 = vrot.slane %v5571_v41, %v4503_v47  ;;  %v5580_v41 = vld [vmem:[#allocation37_spill] sm:$0xff] }
 0x1d6   : > { %vm1968_vm2 = vcmp.ge.f32.partialorder %v1904_v49, 0.0  ;;  %vm1969_vm3 = vcmp.ge.f32.partialorder %v1905_v12, 0.0  ;;  %v2032_v3 = vmul.f32 0.01, %v1904_v49  ;;  %v2033_v59 = vmul.f32 0.01, %v1905_v12  ;;  %4035 = vmatmul.mubr.bf16.gmra.mxu1 %v2123_v13 }
 0x1d7   : > { %v5077_v1 = vsel %vm1966_vm0, %v1902_v19, %v2030_v20  ;;  %v5079_v8 = vsel %vm1967_vm1, %v1903_v35, %v2031_v0  ;;  %v1907_v30 = vadd.f32 %v5569_v27, %v1755_v56  ;;  %v1909_v38 = vadd.f32 %v5572_v37, %v5570_v4  ;;  %4038 = vmatprep.mubr.bf16.mxu1 %v2124_v60  ;;  %v5575_v20 = vld [vmem:[#allocation35_spill] sm:$0xff] }
 0x1d8   : > { %v2133_v29 = vpack.c.bf16 %v5079_v8, %v5077_v1  ;;  %v5088_v32 = vsel %vm1968_vm2, %v1904_v49, %v2032_v3  ;;  %v5090_v46 = vsel %vm1969_vm3, %v1905_v12, %v2033_v59  ;;  %vm1970_vm4 = vcmp.ge.f32.partialorder %v1906_v25, 0.0  ;;  %v5576_v3 = vld [vmem:[#allocation38_spill] sm:$0xff]  ;;  %v5577_v59 = vld [vmem:[#allocation55_spill] sm:$0xff] }
 0x1d9   : > { %v2134_v19 = vpack.c.bf16 %v5090_v46, %v5088_v32  ;;  %vm1971_vm5 = vcmp.ge.f32.partialorder %v1907_v30, 0.0  ;;  %v2034_v35 = vmul.f32 0.01, %v1906_v25  ;;  %v2035_v28 = vmul.f32 0.01, %v1907_v30 }
 0x1da   : > { %vm1972_vm6 = vcmp.ge.f32.partialorder %v5573_v6, 0.0  ;;  %vm1973_vm7 = vcmp.ge.f32.partialorder %v1909_v38, 0.0  ;;  %v2036_v21 = vmul.f32 0.01, %v5573_v6  ;;  %v2037_v49 = vmul.f32 0.01, %v1909_v38 }
 0x1db   : > { %v2098_v52 = vsel %vm1970_vm4, %v1906_v25, %v2034_v35  ;;  %v2099_v12 = vsel %vm1971_vm5, %v1907_v30, %v2035_v28  ;;  %v1910_v56 = vadd.f32 %v5574_v16, %v4795_v7  ;;  %v1911_v0 = vadd.f32 %v5575_v20, %v4803_v63  ;;  %v5579_v63 = vld [vmem:[#allocation40_spill] sm:$0xff] }
 0x1dc   : > { %v2135_v10 = vpack.c.bf16 %v2099_v12, %v2098_v52  ;;  %v2100_v9 = vsel %vm1972_vm6, %v5573_v6, %v2036_v21  ;;  %v2101_v13 = vsel %vm1973_vm7, %v1909_v38, %v2037_v49  ;;  %v5578_v54 = vrot.slane %v5577_v59, %v4503_v47 }
 0x1dd   : > { %v2136_v27 = vpack.c.bf16 %v2101_v13, %v2100_v9  ;;  %vm1974_vm8 = vcmp.ge.f32.partialorder %v1910_v56, 0.0  ;;  %vm1975_vm9 = vcmp.ge.f32.partialorder %v1911_v0, 0.0  ;;  %v2038_v36 = vmul.f32 0.01, %v1910_v56 }
 0x1de   : > { %v1912_v58 = vadd.f32 %v5578_v54, %v5576_v3  ;;  %v2080_v7 = vsel %vm1952_vm15, %v4950_v40, %v4985_v44  ;;  %v2039_v31 = vmul.f32 0.01, %v1911_v0  ;;  %v1913_v60 = vadd.f32 %v1779_v43, %v5579_v63  ;;  %v5581_v43 = vld [vmem:[#allocation39_spill] sm:$0xff]  ;;  %4039 = vmatmul.mubr.bf16.gmra.mxu1 %v2125_v18 }
 0x1df   : > { %v2126_v30 = vpack.c.bf16 %v5002_v11, %v2080_v7  ;;  %v1787_v4 = vrot.slane %v1531_v57, %v4503_v47  ;;  %v1914_v37 = vadd.f32 %v5580_v41, %v4800_v61  ;;  %v2102_v38 = vsel %vm1974_vm8, %v1910_v56, %v2038_v36 }
 0x1e0   : > { %v2040_v25 = vmul.f32 0.01, %v1912_v58  ;;  %vm1976_vm10 = vcmp.ge.f32.partialorder %v1912_v58, 0.0  ;;  %v2103_v40 = vsel %vm1975_vm9, %v1911_v0, %v2039_v31  ;;  %vm1977_vm11 = vcmp.ge.f32.partialorder %v1913_v60, 0.0 }
 0x1e1   : > { %v2041_v44 = vmul.f32 0.01, %v1913_v60  ;;  %v2019_v32 = vmul.f32 0.01, %v4996_v22  ;;  %v2137_v46 = vpack.c.bf16 %v2103_v40, %v2102_v38  ;;  %v1915_v35 = vadd.f32 %v5581_v43, %v1787_v4  ;;  %4042 = vmatprep.mubr.bf16.mxu1 %v2126_v30 }
 0x1e2   : > { %v2042_v28 = vmul.f32 0.01, %v1914_v37  ;;  %vm1955_vm12 = vcmp.ge.f32.partialorder %v4996_v22, 0.0  ;;  %v2104_v47 = vsel %vm1976_vm10, %v1912_v58, %v2040_v25  ;;  %vm1978_vm13 = vcmp.ge.f32.partialorder %v1914_v37, 0.0 }
 0x1e3   : > { %v2105_v2 = vsel %vm1977_vm11, %v1913_v60, %v2041_v44  ;;  %v2018_v57 = vmul.f32 0.01, %v4989_v15  ;;  %vm1979_vm14 = vcmp.ge.f32.partialorder %v1915_v35, 0.0  ;;  %v2043_v11 = vmul.f32 0.01, %v1915_v35 }
 0x1e4   : > { %v2138_v61 = vpack.c.bf16 %v2105_v2, %v2104_v47  ;;  %vm1954_vm15 = vcmp.ge.f32.partialorder %v4989_v15, 0.0  ;;  %v2083_v6 = vsel %vm1955_vm12, %v4996_v22, %v2019_v32  ;;  %v2106_v21 = vsel %vm1978_vm13, %v1914_v37, %v2042_v28 }
 0x1e5   : > { %v2107_v49 = vsel %vm1979_vm14, %v1915_v35, %v2043_v11  ;;  %v2082_v5 = vsel %vm1954_vm15, %v4989_v15, %v2018_v57  ;;  %v5157_v15 = vld [vmem:[%s5422_s6] ss:$0 sm:$0xff]  ;;  %vm3396_vm7 = vcmask 1041409   ;;  %vm3398_vm8 = vcmask 1042434  }
 0x1e6   : > { %v2139_v52 = vpack.c.bf16 %v2107_v49, %v2106_v21  ;;  %v2127_v50 = vpack.c.bf16 %v2083_v6, %v2082_v5  ;;  %vm3400_vm10 = vcmask 1043459   ;;  %vm3402_vm12 = vcmask 1044484  }
 0x1e7   : > { %vm3404_vm13 = vcmask 1045509   ;;  %vm3406_vm15 = vcmask 1046534  }
 0x1e8   : > { %4043 = vmatmul.mubr.bf16.gmra.mxu1 %v2127_v50 }
 0x1e9   : > { %4046 = vmatprep.mubr.bf16.mxu1 %v2128_v62 }
 0x1f0   : > { %4047 = vmatmul.mubr.bf16.gmra.mxu1 %v2129_v26 }
 0x1f1   : > { %4050 = vmatprep.mubr.bf16.mxu1 %v2130_v24 }
 0x1f8   : > { %4051 = vmatmul.mubr.bf16.gmra.mxu1 %v2131_v33 }
 0x1f9   : > { %4054 = vmatprep.mubr.bf16.mxu1 %v2132_v45 }
 0x200   : > { %4055 = vmatmul.mubr.bf16.gmra.mxu1 %v2133_v29 }
 0x201   : > { %4058 = vmatprep.mubr.bf16.mxu1 %v2134_v19 }
 0x208   : > { %4059 = vmatmul.mubr.bf16.gmra.mxu1 %v2135_v10 }
 0x209   : > { %4062 = vmatprep.mubr.bf16.mxu1 %v2136_v27 }
 0x210   : > { %4063 = vmatmul.mubr.bf16.gmra.mxu1 %v2137_v46 }
 0x211   : > { %4066 = vmatprep.mubr.bf16.mxu1 %v2138_v61 }
 0x218   : > { %4067 = vmatmul.mubr.bf16.gmra.mxu1 %v2139_v52 }
 0x25d   : > { %v4008_v18 = vpop.f32.mrf.mxu1 }
 0x25e   : > { %v2254_v22 = vadd.f32 %v4008_v18, %v5157_v15 }
 0x25f   : > { %v2245_v53 = vpop.f32.mrf.mxu1 }
 0x260   : > { %vm2502_vm0 = vcmp.ge.f32.partialorder %v2254_v22, 0.0  ;;  %v2566_v34 = vmul.f32 0.01, %v2254_v22  ;;  %v2246_v62 = vadd.f32 %v5157_v15, %v2245_v53 }
 0x261   : > { %v4009_v17 = vpop.f32.mrf.mxu1 }
 0x262   : > { %v2630_v23 = vsel %vm2502_vm0, %v2254_v22, %v2566_v34  ;;  %vm2500_vm1 = vcmp.ge.f32.partialorder %v2246_v62, 0.0  ;;  %v2564_v42 = vmul.f32 0.01, %v2246_v62  ;;  %v2257_v26 = vadd.f32 %v4009_v17, %v5157_v15 }
 0x263   : > { %v2704_v51 = vrot.slane %v2630_v23, 4  ;;  %v2248_v24 = vpop.f32.mrf.mxu1  ;;  %vm3408_vm0 = vcmask 1047559  }
 0x264   : > { %v2628_v55 = vsel %vm2500_vm1, %v2246_v62, %v2564_v42  ;;  %vm2503_vm2 = vcmp.ge.f32.partialorder %v2257_v26, 0.0  ;;  %v2567_v14 = vmul.f32 0.01, %v2257_v26  ;;  %v2249_v39 = vadd.f32 %v5157_v15, %v2248_v24 }
 0x265   : > { %v2705_v33 = vmax.f32 %v2630_v23, %v2704_v51  ;;  %v2692_v48 = vrot.slane %v2628_v55, 4 }
 0x266   : > { %v4012_v45 = vpop.f32.mrf.mxu1  ;;  %v2631_v1 = vsel %vm2503_vm2, %v2257_v26, %v2567_v14  ;;  %vm2501_vm3 = vcmp.ge.f32.partialorder %v2249_v39, 0.0  ;;  %v2565_v8 = vmul.f32 0.01, %v2249_v39 }
 0x267   : > { %v2270_v29 = vadd.f32 %v4012_v45, %v5157_v15  ;;  %v2706_v19 = vrot.slane %v2705_v33, 2  ;;  %v2693_v12 = vmax.f32 %v2628_v55, %v2692_v48  ;;  %v2710_v16 = vrot.slane %v2631_v1, 4 }
 0x268   : > { %v2261_v56 = vpop.f32.mrf.mxu1  ;;  %v2629_v20 = vsel %vm2501_vm3, %v2249_v39, %v2565_v8 }
 0x269   : > { %vm2506_vm4 = vcmp.ge.f32.partialorder %v2270_v29, 0.0  ;;  %v2570_v0 = vmul.f32 0.01, %v2270_v29  ;;  %v2262_v10 = vadd.f32 %v5157_v15, %v2261_v56  ;;  %v2707_v9 = vmax.f32 %v2705_v33, %v2706_v19 }
 0x26a   : > { %v2694_v13 = vrot.slane %v2693_v12, 2  ;;  %v2711_v3 = vmax.f32 %v2631_v1, %v2710_v16  ;;  %v2698_v59 = vrot.slane %v2629_v20, 4  ;;  %v4013_v54 = vpop.f32.mrf.mxu1 }
 0x26b   : > { %v2634_v58 = vsel %vm2506_vm4, %v2270_v29, %v2570_v0  ;;  %vm2504_vm5 = vcmp.ge.f32.partialorder %v2262_v10, 0.0  ;;  %v2568_v27 = vmul.f32 0.01, %v2262_v10  ;;  %v2273_v36 = vadd.f32 %v4013_v54, %v5157_v15 }
 0x26c   : > { %v2708_v7 = vrot.slane %v2707_v9, 1  ;;  %v2695_v31 = vmax.f32 %v2693_v12, %v2694_v13  ;;  %v2712_v63 = vrot.slane %v2711_v3, 2  ;;  %v2699_v60 = vmax.f32 %v2629_v20, %v2698_v59  ;;  %v2264_v25 = vpop.f32.mrf.mxu1 }
 0x26d   : > { %v2728_v30 = vrot.slane %v2634_v58, 4  ;;  %v2632_v4 = vsel %vm2504_vm5, %v2262_v10, %v2568_v27  ;;  %vm2507_vm6 = vcmp.ge.f32.partialorder %v2273_v36, 0.0  ;;  %v2571_v41 = vmul.f32 0.01, %v2273_v36 }
 0x26e   : > { %v2709_v37 = vmax.f32 %v2707_v9, %v2708_v7  ;;  %v2696_v38 = vrot.slane %v2695_v31, 1  ;;  %v2713_v40 = vmax.f32 %v2711_v3, %v2712_v63  ;;  %v2700_v44 = vrot.slane %v2699_v60, 2  ;;  %v4016_v32 = vpop.f32.mrf.mxu1 }
 0x26f   : > { %v2729_v46 = vmax.f32 %v2634_v58, %v2728_v30  ;;  %v2716_v43 = vrot.slane %v2632_v4, 4  ;;  %v2635_v35 = vsel %vm2507_vm6, %v2273_v36, %v2571_v41  ;;  %v2265_v28 = vadd.f32 %v5157_v15, %v2264_v25 }
 0x270   : > { %v3732_v47 = vpack.c.bf16 %v2709_v37, %v2709_v37  ;;  %v2697_v2 = vmax.f32 %v2695_v31, %v2696_v38  ;;  %v2714_v57 = vrot.slane %v2713_v40, 1  ;;  %v2701_v61 = vmax.f32 %v2699_v60, %v2700_v44  ;;  %v2277_v11 = vpop.f32.mrf.mxu1 }
 0x271   : > { %v2730_v6 = vrot.slane %v2729_v46, 2  ;;  %v2717_v21 = vmax.f32 %v2632_v4, %v2716_v43  ;;  %v2734_v49 = vrot.slane %v2635_v35, 4  ;;  %vm2505_vm9 = vcmp.ge.f32.partialorder %v2265_v28, 0.0 }
 0x272   : > { %v2715_v52 = vmax.f32 %v2713_v40, %v2714_v57  ;;  %v2702_v5 = vrot.slane %v2701_v61, 1  ;;  %v4017_v50 = vpop.f32.mrf.mxu1  ;;  %v2569_v34 = vmul.f32 0.01, %v2265_v28  ;;  %v3334_v62 = vunpack.c.l.b16 %v3732_v47 }
 0x273   : > { %v2731_v18 = vmax.f32 %v2729_v46, %v2730_v6  ;;  %v2718_v22 = vrot.slane %v2717_v21, 2  ;;  %v2735_v53 = vmax.f32 %v2635_v35, %v2734_v49  ;;  %v3730_v17 = vpack.c.bf16 %v2697_v2, %v2697_v2 }
 0x274   : > { %v2703_v23 = vmax.f32 %v2701_v61, %v2702_v5  ;;  %v2286_v42 = vadd.f32 %v4016_v32, %v5157_v15  ;;  %v2280_v26 = vpop.f32.mrf.mxu1  ;;  %v2633_v14 = vsel %vm2505_vm9, %v2265_v28, %v2569_v34  ;;  %v3733_v39 = vpack.c.bf16 %v2715_v52, %v2715_v52 }
 0x275   : > { %v2732_v51 = vrot.slane %v2731_v18, 1  ;;  %v2719_v24 = vmax.f32 %v2717_v21, %v2718_v22  ;;  %v2736_v55 = vrot.slane %v2735_v53, 2  ;;  %v2722_v48 = vrot.slane %v2633_v14, 4 }
 0x276   : > { %v3731_v33 = vpack.c.bf16 %v2703_v23, %v2703_v23  ;;  %vm2510_vm11 = vcmp.ge.f32.partialorder %v2286_v42, 0.0  ;;  %v4020_v45 = vpop.f32.mrf.mxu1  ;;  %v2574_v19 = vmul.f32 0.01, %v2286_v42  ;;  %v3332_v12 = vunpack.c.l.b16 %v3730_v17 }
 0x277   : > { %v2733_v1 = vmax.f32 %v2731_v18, %v2732_v51  ;;  %v2720_v8 = vrot.slane %v2719_v24, 1  ;;  %v2737_v29 = vmax.f32 %v2735_v53, %v2736_v55  ;;  %v2723_v56 = vmax.f32 %v2633_v14, %v2722_v48 }
 0x278   : > { %v3333_v16 = vunpack.c.l.b16 %v3731_v33  ;;  %v2278_v20 = vadd.f32 %v5157_v15, %v2277_v11  ;;  %v2293_v0 = vpop.f32.mrf.mxu1  ;;  %v2638_v13 = vsel %vm2510_vm11, %v2286_v42, %v2574_v19  ;;  %v2289_v3 = vadd.f32 %v4017_v50, %v5157_v15 }
 0x279   : > { %v2721_v10 = vmax.f32 %v2719_v24, %v2720_v8  ;;  %v2738_v9 = vrot.slane %v2737_v29, 1  ;;  %v3335_v59 = vunpack.c.l.b16 %v3733_v39  ;;  %v2724_v58 = vrot.slane %v2723_v56, 2 }
 0x27a   : > { %v3397_v54 = vsel %vm3396_vm7, %v3333_v16, %v3332_v12  ;;  %v2752_v27 = vrot.slane %v2638_v13, 4  ;;  %v4021_v36 = vpop.f32.mrf.mxu1  ;;  %v3736_v7 = vpack.c.bf16 %v2733_v1, %v2733_v1  ;;  %vm2508_vm14 = vcmp.ge.f32.partialorder %v2278_v20, 0.0 }
 0x27b   : > { %v3734_v31 = vpack.c.bf16 %v2721_v10, %v2721_v10  ;;  %v2739_v63 = vmax.f32 %v2737_v29, %v2738_v9  ;;  %v3399_v60 = vsel %vm3398_vm8, %v3334_v62, %v3397_v54  ;;  %v2725_v25 = vmax.f32 %v2723_v56, %v2724_v58 }
 0x27c   : > { %v2753_v30 = vmax.f32 %v2638_v13, %v2752_v27  ;;  %v2572_v4 = vmul.f32 0.01, %v2278_v20  ;;  %v5172_v41 = vpop.f32.mrf.mxu1  ;;  %vm2511_vm1 = vcmp.ge.f32.partialorder %v2289_v3, 0.0  ;;  %v2575_v40 = vmul.f32 0.01, %v2289_v3 }
 0x27d   : > { %v3336_v37 = vunpack.c.l.b16 %v3734_v31  ;;  %v3737_v38 = vpack.c.bf16 %v2739_v63, %v2739_v63  ;;  %v2726_v44 = vrot.slane %v2725_v25, 1  ;;  %v2281_v43 = vadd.f32 %v5157_v15, %v2280_v26 }
 0x27e   : > { %v2754_v32 = vrot.slane %v2753_v30, 2  ;;  %v2636_v46 = vsel %vm2508_vm14, %v2278_v20, %v2572_v4  ;;  %v5175_v35 = vpop.f32.mrf.mxu1  ;;  %v3338_v28 = vunpack.c.l.b16 %v3736_v7  ;;  %v3401_v47 = vsel %vm3400_vm10, %v3335_v59, %v3399_v60 }
 0x27f   : > { %v2740_v2 = vrot.slane %v2636_v46, 4  ;;  %v2639_v57 = vsel %vm2511_vm1, %v2289_v3, %v2575_v40  ;;  %v2727_v61 = vmax.f32 %v2725_v25, %v2726_v44  ;;  %vm2509_vm2 = vcmp.ge.f32.partialorder %v2281_v43, 0.0 }
 0x280   : > { %v2755_v11 = vmax.f32 %v2753_v30, %v2754_v32  ;;  %v2758_v6 = vrot.slane %v2639_v57, 4  ;;  %v5178_v21 = vpop.f32.mrf.mxu1  ;;  %v2573_v52 = vmul.f32 0.01, %v2281_v43  ;;  %v2302_v5 = vadd.f32 %v4020_v45, %v5157_v15 }
 0x281   : > { %v2741_v49 = vmax.f32 %v2636_v46, %v2740_v2  ;;  %v2294_v50 = vadd.f32 %v5157_v15, %v2293_v0  ;;  %v3403_v18 = vsel %vm3402_vm12, %v3336_v37, %v3401_v47  ;;  %v3339_v22 = vunpack.c.l.b16 %v3737_v38 }
 0x282   : > { %v3735_v53 = vpack.c.bf16 %v2727_v61, %v2727_v61  ;;  %v2759_v34 = vmax.f32 %v2639_v57, %v2758_v6  ;;  %v5183_v62 = vpop.f32.mrf.mxu1  ;;  %v2637_v23 = vsel %vm2509_vm2, %v2281_v43, %v2573_v52  ;;  %vm2514_vm3 = vcmp.ge.f32.partialorder %v2302_v5, 0.0 }
 0x283   : > { %v2742_v17 = vrot.slane %v2741_v49, 2  ;;  %v2578_v42 = vmul.f32 0.01, %v2302_v5  ;;  %v2756_v51 = vrot.slane %v2755_v11, 1  ;;  %v2746_v55 = vrot.slane %v2637_v23, 4 }
 0x284   : > { %v3337_v26 = vunpack.c.l.b16 %v3735_v53  ;;  %v2760_v24 = vrot.slane %v2759_v34, 2  ;;  %v5185_v14 = vpop.f32.mrf.mxu1  ;;  %vm2512_vm4 = vcmp.ge.f32.partialorder %v2294_v50, 0.0  ;;  %v2576_v48 = vmul.f32 0.01, %v2294_v50 }
 0x285   : > { %v2743_v39 = vmax.f32 %v2741_v49, %v2742_v17  ;;  %v2642_v33 = vsel %vm2514_vm3, %v2302_v5, %v2578_v42  ;;  %v2747_v8 = vmax.f32 %v2637_v23, %v2746_v55  ;;  %v2305_v29 = vadd.f32 %v4021_v36, %v5157_v15 }
 0x286   : > { %v3405_v45 = vsel %vm3404_vm13, %v3337_v26, %v3403_v18  ;;  %v2761_v1 = vmax.f32 %v2759_v34, %v2760_v24  ;;  %v5189_v19 = vpop.f32.mrf.mxu1  ;;  %v2776_v56 = vrot.slane %v2642_v33, 4  ;;  %v2640_v20 = vsel %vm2512_vm4, %v2294_v50, %v2576_v48 }
 0x287   : > { %v3407_v12 = vsel %vm3406_vm15, %v3338_v28, %v3405_v45  ;;  %v2744_v16 = vrot.slane %v2743_v39, 1  ;;  %v2757_v10 = vmax.f32 %v2755_v11, %v2756_v51  ;;  %v2748_v13 = vrot.slane %v2747_v8, 2 }
 0x288   : > { %v3409_v0 = vsel %vm3408_vm0, %v3339_v22, %v3407_v12  ;;  %v2762_v9 = vrot.slane %v2761_v1, 1  ;;  %v5200_v3 = vpop.f32.mrf.mxu1  ;;  %v2777_v58 = vmax.f32 %v2642_v33, %v2776_v56  ;;  %v2764_v27 = vrot.slane %v2640_v20, 4 }
 0x289   : > { %v3459_v59 = vpack.c.b16 %v3409_v0, %v3409_v0  ;;  %v2745_v54 = vmax.f32 %v2743_v39, %v2744_v16  ;;  %v2749_v7 = vmax.f32 %v2747_v8, %v2748_v13  ;;  %vm2515_vm5 = vcmp.ge.f32.partialorder %v2305_v29, 0.0 }
 0x28a   : > { %v2763_v36 = vmax.f32 %v2761_v1, %v2762_v9  ;;  %v2579_v31 = vmul.f32 0.01, %v2305_v29  ;;  %v5202_v63 = vpop.f32.mrf.mxu1  ;;  %v2778_v25 = vrot.slane %v2777_v58, 2  ;;  %v2765_v30 = vmax.f32 %v2640_v20, %v2764_v27 }
 0x28b   : > { %3475 = vst [vmem:[%s5197_s14] sm:$0xf] %v3459_v59  ;;  %v3738_v60 = vpack.c.bf16 %v2745_v54, %v2745_v54  ;;  %v2297_v4 = vadd.f32 %v5157_v15, %v5172_v41  ;;  %v2750_v37 = vrot.slane %v2749_v7, 1  ;;  %v2318_v40 = vadd.f32 %v5175_v35, %v5157_v15 }
 0x28c   : > { %v2643_v38 = vsel %vm2515_vm5, %v2305_v29, %v2579_v31  ;;  %v5209_v44 = vpop.f32.mrf.mxu1  ;;  %v3740_v32 = vpack.c.bf16 %v2757_v10, %v2757_v10  ;;  %v2779_v46 = vmax.f32 %v2777_v58, %v2778_v25  ;;  %v2766_v43 = vrot.slane %v2765_v30, 2 }
 0x28d   : > { %v2782_v28 = vrot.slane %v2643_v38, 4  ;;  %v3741_v47 = vpack.c.bf16 %v2763_v36, %v2763_v36  ;;  %v2751_v2 = vmax.f32 %v2749_v7, %v2750_v37  ;;  %vm2513_vm6 = vcmp.ge.f32.partialorder %v2297_v4, 0.0 }
 0x28e   : > { %v2577_v57 = vmul.f32 0.01, %v2297_v4  ;;  %v5211_v61 = vpop.f32.mrf.mxu1  ;;  %v3340_v11 = vunpack.c.l.b16 %v3738_v60  ;;  %v2767_v6 = vmax.f32 %v2765_v30, %v2766_v43  ;;  %vm2518_vm9 = vcmp.ge.f32.partialorder %v2318_v40, 0.0 }
 0x28f   : > { %v2783_v41 = vmax.f32 %v2643_v38, %v2782_v28  ;;  %v3739_v49 = vpack.c.bf16 %v2751_v2, %v2751_v2  ;;  %v2582_v5 = vmul.f32 0.01, %v2318_v40  ;;  %v2310_v35 = vadd.f32 %v5157_v15, %v5178_v21 }
 0x290   : > { %v2641_v52 = vsel %vm2513_vm6, %v2297_v4, %v2577_v57  ;;  %v5215_v50 = vpop.f32.mrf.mxu1  ;;  %v2780_v18 = vrot.slane %v2779_v46, 1  ;;  %v2768_v22 = vrot.slane %v2767_v6, 1  ;;  %v3342_v51 = vunpack.c.l.b16 %v3740_v32 }
 0x291   : > { %v2784_v53 = vrot.slane %v2783_v41, 2  ;;  %v2770_v34 = vrot.slane %v2641_v52, 4  ;;  %v3341_v17 = vunpack.c.l.b16 %v3739_v49  ;;  %v2646_v23 = vsel %vm2518_vm9, %v2318_v40, %v2582_v5 }
 0x292   : > { %vm2516_vm11 = vcmp.ge.f32.partialorder %v2310_v35, 0.0  ;;  %v2580_v42 = vmul.f32 0.01, %v2310_v35  ;;  %v5217_v26 = vpop.f32.mrf.mxu1  ;;  %v2769_v24 = vmax.f32 %v2767_v6, %v2768_v22  ;;  %v2800_v48 = vrot.slane %v2646_v23, 4 }
 0x293   : > { %v2785_v55 = vmax.f32 %v2783_v41, %v2784_v53  ;;  %v2771_v39 = vmax.f32 %v2641_v52, %v2770_v34  ;;  %v3410_v33 = vsel %vm3396_vm7, %v3341_v17, %v3340_v11  ;;  %v2321_v45 = vadd.f32 %v5183_v62, %v5157_v15 }
 0x294   : > { %v2644_v21 = vsel %vm2516_vm11, %v2310_v35, %v2580_v42  ;;  %v5222_v1 = vpop.f32.mrf.mxu1  ;;  %v3343_v8 = vunpack.c.l.b16 %v3741_v47  ;;  %v2781_v29 = vmax.f32 %v2779_v46, %v2780_v18  ;;  %v3411_v16 = vsel %vm3398_vm8, %v3342_v51, %v3410_v33 }
 0x295   : > { %v2786_v12 = vrot.slane %v2785_v55, 1  ;;  %v2772_v56 = vrot.slane %v2771_v39, 2  ;;  %v2801_v20 = vmax.f32 %v2646_v23, %v2800_v48  ;;  %v2788_v0 = vrot.slane %v2644_v21, 4 }
 0x296   : > { %v5225_v10 = vpop.f32.mrf.mxu1  ;;  %v3742_v9 = vpack.c.bf16 %v2769_v24, %v2769_v24  ;;  %vm2519_vm14 = vcmp.ge.f32.partialorder %v2321_v45, 0.0  ;;  %v2583_v59 = vmul.f32 0.01, %v2321_v45  ;;  %v2313_v62 = vadd.f32 %v5157_v15, %v5185_v14 }
 0x297   : > { %v2787_v13 = vmax.f32 %v2785_v55, %v2786_v12  ;;  %v2773_v54 = vmax.f32 %v2771_v39, %v2772_v56  ;;  %v2802_v58 = vrot.slane %v2801_v20, 2  ;;  %v2789_v27 = vmax.f32 %v2644_v21, %v2788_v0 }
 0x298   : > { %v3744_v36 = vpack.c.bf16 %v2781_v29, %v2781_v29  ;;  %v3412_v7 = vsel %vm3400_vm10, %v3343_v8, %v3411_v16  ;;  %v2647_v31 = vsel %vm2519_vm14, %v2321_v45, %v2583_v59  ;;  %v2334_v60 = vadd.f32 %v5189_v19, %v5157_v15  ;;  %v5232_v25 = vpop.f32.mrf.mxu1 }
 0x299   : > { %v2774_v30 = vrot.slane %v2773_v54, 1  ;;  %v2803_v4 = vmax.f32 %v2801_v20, %v2802_v58  ;;  %v2790_v37 = vrot.slane %v2789_v27, 2  ;;  %v2806_v38 = vrot.slane %v2647_v31, 4 }
 0x29a   : > { %v3344_v40 = vunpack.c.l.b16 %v3742_v9  ;;  %v3745_v32 = vpack.c.bf16 %v2787_v13, %v2787_v13  ;;  %vm2517_vm1 = vcmp.ge.f32.partialorder %v2313_v62, 0.0  ;;  %v2581_v46 = vmul.f32 0.01, %v2313_v62  ;;  %v5236_v11 = vpop.f32.mrf.mxu1 }
 0x29b   : > { %v2775_v43 = vmax.f32 %v2773_v54, %v2774_v30  ;;  %v2791_v28 = vmax.f32 %v2789_v27, %v2790_v37  ;;  %v2807_v14 = vmax.f32 %v2647_v31, %v2806_v38  ;;  %vm2522_vm2 = vcmp.ge.f32.partialorder %v2334_v60, 0.0 }
 0x29c   : > { %v2804_v47 = vrot.slane %v2803_v4, 1  ;;  %v2645_v2 = vsel %vm2517_vm1, %v2313_v62, %v2581_v46  ;;  %v2586_v57 = vmul.f32 0.01, %v2334_v60  ;;  %v2326_v19 = vadd.f32 %v5157_v15, %v5200_v3  ;;  %v5241_v24 = vpop.f32.mrf.mxu1 }
 0x29d   : > { %v3743_v6 = vpack.c.bf16 %v2775_v43, %v2775_v43  ;;  %v2792_v41 = vrot.slane %v2791_v28, 1  ;;  %v2808_v49 = vrot.slane %v2807_v14, 2  ;;  %v2337_v52 = vadd.f32 %v5202_v63, %v5157_v15 }
 0x29e   : > { %v2794_v5 = vrot.slane %v2645_v2, 4  ;;  %v2650_v35 = vsel %vm2522_vm2, %v2334_v60, %v2586_v57  ;;  %vm2520_vm3 = vcmp.ge.f32.partialorder %v2326_v19, 0.0  ;;  %v2584_v18 = vmul.f32 0.01, %v2326_v19  ;;  %v5246_v13 = vpop.f32.mrf.mxu1 }
 0x29f   : > { %v3346_v22 = vunpack.c.l.b16 %v3744_v36  ;;  %v3345_v53 = vunpack.c.l.b16 %v3743_v6  ;;  %v2793_v34 = vmax.f32 %v2791_v28, %v2792_v41  ;;  %v2809_v17 = vmax.f32 %v2807_v14, %v2808_v49 }
 0x2a0   : > { %v3413_v23 = vsel %vm3402_vm12, %v3344_v40, %v3412_v7  ;;  %v2795_v42 = vmax.f32 %v2645_v2, %v2794_v5  ;;  %v2824_v3 = vrot.slane %v2650_v35, 4  ;;  %v2648_v51 = vsel %vm2520_vm3, %v2326_v19, %v2584_v18 }
 0x2a1   : > { %v3347_v55 = vunpack.c.l.b16 %v3745_v32  ;;  %v3414_v39 = vsel %vm3404_vm13, %v3345_v53, %v3413_v23  ;;  %v2805_v33 = vmax.f32 %v2803_v4, %v2804_v47  ;;  %vm2523_vm4 = vcmp.ge.f32.partialorder %v2337_v52, 0.0  ;;  %v5253_v32 = vpop.f32.mrf.mxu1 }
 0x2a2   : > { %v3415_v63 = vsel %vm3406_vm15, %v3346_v22, %v3414_v39  ;;  %v2796_v48 = vrot.slane %v2795_v42, 2  ;;  %v2825_v21 = vmax.f32 %v2650_v35, %v2824_v3  ;;  %v2812_v45 = vrot.slane %v2648_v51, 4 }
 0x2a3   : > { %v3416_v8 = vsel %vm3408_vm0, %v3347_v55, %v3415_v63  ;;  %v3746_v29 = vpack.c.bf16 %v2793_v34, %v2793_v34  ;;  %v2810_v12 = vrot.slane %v2809_v17, 1  ;;  %v2587_v16 = vmul.f32 0.01, %v2337_v52  ;;  %v5259_v35 = vpop.f32.mrf.mxu1 }
 0x2a4   : > { %v3460_v56 = vpack.c.b16 %v3416_v8, %v3416_v8  ;;  %v2797_v20 = vmax.f32 %v2795_v42, %v2796_v48  ;;  %v2826_v0 = vrot.slane %v2825_v21, 2  ;;  %v2813_v9 = vmax.f32 %v2648_v51, %v2812_v45 }
 0x2a5   : > { %v3748_v59 = vpack.c.bf16 %v2805_v33, %v2805_v33  ;;  %v2651_v54 = vsel %vm2523_vm4, %v2337_v52, %v2587_v16  ;;  %v2329_v58 = vadd.f32 %v5157_v15, %v5209_v44  ;;  %v2350_v27 = vadd.f32 %v5211_v61, %v5157_v15  ;;  %v5263_v48 = vpop.f32.mrf.mxu1 }
 0x2a6   : > { %3476 = vst [vmem:[%s5197_s14 + $0x4] sm:$0xf] %v3460_v56  ;;  %v2798_v62 = vrot.slane %v2797_v20, 1  ;;  %v2827_v36 = vmax.f32 %v2825_v21, %v2826_v0  ;;  %v2814_v7 = vrot.slane %v2813_v9, 2  ;;  %v2830_v31 = vrot.slane %v2651_v54, 4 }
 0x2a7   : > { %v3348_v60 = vunpack.c.l.b16 %v3746_v29  ;;  %v2811_v30 = vmax.f32 %v2809_v17, %v2810_v12  ;;  %vm2521_vm5 = vcmp.ge.f32.partialorder %v2329_v58, 0.0  ;;  %v2585_v4 = vmul.f32 0.01, %v2329_v58 }
 0x2a8   : > { %v2799_v37 = vmax.f32 %v2797_v20, %v2798_v62  ;;  %v2815_v38 = vmax.f32 %v2813_v9, %v2814_v7  ;;  %v2831_v40 = vmax.f32 %v2651_v54, %v2830_v31  ;;  %vm2526_vm6 = vcmp.ge.f32.partialorder %v2350_v27, 0.0 }
 0x2a9   : > { %v2828_v46 = vrot.slane %v2827_v36, 1  ;;  %v2649_v44 = vsel %vm2521_vm5, %v2329_v58, %v2585_v4  ;;  %v2590_v43 = vmul.f32 0.01, %v2350_v27  ;;  %v2342_v61 = vadd.f32 %v5157_v15, %v5215_v50 }
 0x2aa   : > { %v3747_v28 = vpack.c.bf16 %v2799_v37, %v2799_v37  ;;  %v2816_v14 = vrot.slane %v2815_v38, 1  ;;  %v2832_v47 = vrot.slane %v2831_v40, 2  ;;  %v2353_v2 = vadd.f32 %v5217_v26, %v5157_v15 }
 0x2ab   : > { %v2818_v57 = vrot.slane %v2649_v44, 4  ;;  %v2654_v19 = vsel %vm2526_vm6, %v2350_v27, %v2590_v43  ;;  %vm2524_vm9 = vcmp.ge.f32.partialorder %v2342_v61, 0.0  ;;  %v2588_v6 = vmul.f32 0.01, %v2342_v61 }
 0x2ac   : > { %v3749_v41 = vpack.c.bf16 %v2811_v30, %v2811_v30  ;;  %v3349_v49 = vunpack.c.l.b16 %v3747_v28  ;;  %v2817_v52 = vmax.f32 %v2815_v38, %v2816_v14  ;;  %v2833_v5 = vmax.f32 %v2831_v40, %v2832_v47 }
 0x2ad   : > { %v3350_v18 = vunpack.c.l.b16 %v3748_v59  ;;  %v2819_v22 = vmax.f32 %v2649_v44, %v2818_v57  ;;  %v2848_v53 = vrot.slane %v2654_v19, 4  ;;  %v2652_v50 = vsel %vm2524_vm9, %v2342_v61, %v2588_v6 }
 0x2ae   : > { %v3417_v34 = vsel %vm3396_vm7, %v3349_v49, %v3348_v60  ;;  %v2829_v17 = vmax.f32 %v2827_v36, %v2828_v46  ;;  %v3750_v23 = vpack.c.bf16 %v2817_v52, %v2817_v52  ;;  %v2834_v42 = vrot.slane %v2833_v5, 1  ;;  %v5270_v36 = vpop.f32.mrf.mxu1 }
 0x2af   : > { %v2820_v26 = vrot.slane %v2819_v22, 2  ;;  %v2849_v3 = vmax.f32 %v2654_v19, %v2848_v53  ;;  %v2836_v51 = vrot.slane %v2652_v50, 4  ;;  %vm2527_vm11 = vcmp.ge.f32.partialorder %v2353_v2, 0.0 }
 0x2b0   : > { %v3351_v55 = vunpack.c.l.b16 %v3749_v41  ;;  %v3418_v39 = vsel %vm3398_vm8, %v3350_v18, %v3417_v34  ;;  %v2835_v33 = vmax.f32 %v2833_v5, %v2834_v42  ;;  %v2591_v63 = vmul.f32 0.01, %v2353_v2  ;;  %v5276_v28 = vpop.f32.mrf.mxu1 }
 0x2b1   : > { %v2821_v21 = vmax.f32 %v2819_v22, %v2820_v26  ;;  %v2850_v45 = vrot.slane %v2849_v3, 2  ;;  %v2837_v8 = vmax.f32 %v2652_v50, %v2836_v51  ;;  %v2345_v29 = vadd.f32 %v5157_v15, %v5222_v1 }
 0x2b2   : > { %v3752_v12 = vpack.c.bf16 %v2829_v17, %v2829_v17  ;;  %v3352_v16 = vunpack.c.l.b16 %v3750_v23  ;;  %v2655_v56 = vsel %vm2527_vm11, %v2353_v2, %v2591_v63  ;;  %v2366_v20 = vadd.f32 %v5225_v10, %v5157_v15  ;;  %v5281_v50 = vpop.f32.mrf.mxu1 }
 0x2b3   : > { %v2822_v0 = vrot.slane %v2821_v21, 1  ;;  %v2851_v9 = vmax.f32 %v2849_v3, %v2850_v45  ;;  %v2838_v59 = vrot.slane %v2837_v8, 2  ;;  %v2854_v54 = vrot.slane %v2655_v56, 4 }
 0x2b4   : > { %v3419_v58 = vsel %vm3400_vm10, %v3351_v55, %v3418_v39  ;;  %v3753_v27 = vpack.c.bf16 %v2835_v33, %v2835_v33  ;;  %vm2525_vm14 = vcmp.ge.f32.partialorder %v2345_v29, 0.0  ;;  %v2589_v62 = vmul.f32 0.01, %v2345_v29 }
 0x2b5   : > { %v2823_v7 = vmax.f32 %v2821_v21, %v2822_v0  ;;  %v2839_v31 = vmax.f32 %v2837_v8, %v2838_v59  ;;  %v2855_v1 = vmax.f32 %v2655_v56, %v2854_v54  ;;  %vm2530_vm1 = vcmp.ge.f32.partialorder %v2366_v20, 0.0 }
 0x2b6   : > { %v2852_v60 = vrot.slane %v2851_v9, 1  ;;  %v2653_v30 = vsel %vm2525_vm14, %v2345_v29, %v2589_v62  ;;  %v2594_v4 = vmul.f32 0.01, %v2366_v20  ;;  %v2358_v10 = vadd.f32 %v5157_v15, %v5232_v25 }
 0x2b7   : > { %v3751_v37 = vpack.c.bf16 %v2823_v7, %v2823_v7  ;;  %v2840_v38 = vrot.slane %v2839_v31, 1  ;;  %v2856_v40 = vrot.slane %v2855_v1, 2  ;;  %v2369_v46 = vadd.f32 %v5236_v11, %v5157_v15 }
 0x2b8   : > { %v2842_v44 = vrot.slane %v2653_v30, 4  ;;  %v2658_v43 = vsel %vm2530_vm1, %v2366_v20, %v2594_v4  ;;  %vm2528_vm2 = vcmp.ge.f32.partialorder %v2358_v10, 0.0  ;;  %v2592_v61 = vmul.f32 0.01, %v2358_v10 }
 0x2b9   : > { %v3354_v14 = vunpack.c.l.b16 %v3752_v12  ;;  %v3353_v47 = vunpack.c.l.b16 %v3751_v37  ;;  %v2841_v2 = vmax.f32 %v2839_v31, %v2840_v38  ;;  %v2857_v57 = vmax.f32 %v2855_v1, %v2856_v40 }
 0x2ba   : > { %v3420_v19 = vsel %vm3402_vm12, %v3352_v16, %v3419_v58  ;;  %v2843_v6 = vmax.f32 %v2653_v30, %v2842_v44  ;;  %v2872_v25 = vrot.slane %v2658_v43, 4  ;;  %v2656_v41 = vsel %vm2528_vm2, %v2358_v10, %v2592_v61  ;;  %v5289_v16 = vpop.f32.mrf.mxu1 }
 0x2bb   : > { %v3355_v49 = vunpack.c.l.b16 %v3753_v27  ;;  %v3421_v52 = vsel %vm3404_vm13, %v3353_v47, %v3420_v19  ;;  %v2853_v5 = vmax.f32 %v2851_v9, %v2852_v60  ;;  %vm2531_vm3 = vcmp.ge.f32.partialorder %v2369_v46, 0.0 }
 0x2bc   : > { %v3422_v11 = vsel %vm3406_vm15, %v3354_v14, %v3421_v52  ;;  %v2844_v18 = vrot.slane %v2843_v6, 2  ;;  %v2873_v22 = vmax.f32 %v2658_v43, %v2872_v25  ;;  %v2860_v53 = vrot.slane %v2656_v41, 4  ;;  %v5295_v60 = vpop.f32.mrf.mxu1 }
 0x2bd   : > { %v3423_v34 = vsel %vm3408_vm0, %v3355_v49, %v3422_v11  ;;  %v3754_v17 = vpack.c.bf16 %v2841_v2, %v2841_v2  ;;  %v2858_v23 = vrot.slane %v2857_v57, 1  ;;  %v2595_v42 = vmul.f32 0.01, %v2369_v46 }
 0x2be   : > { %v3461_v26 = vpack.c.b16 %v3423_v34, %v3423_v34  ;;  %v2845_v3 = vmax.f32 %v2843_v6, %v2844_v18  ;;  %v2874_v51 = vrot.slane %v2873_v22, 2  ;;  %v2861_v55 = vmax.f32 %v2656_v41, %v2860_v53 }
 0x2bf   : > { %v3756_v39 = vpack.c.bf16 %v2853_v5, %v2853_v5  ;;  %v2659_v33 = vsel %vm2531_vm3, %v2369_v46, %v2595_v42  ;;  %v2361_v63 = vadd.f32 %v5157_v15, %v5241_v24  ;;  %v2382_v21 = vadd.f32 %v5246_v13, %v5157_v15 }
 0x2c0   : > { %3477 = vst [vmem:[%s5197_s14 + $0x8] sm:$0xf] %v3461_v26  ;;  %v2846_v45 = vrot.slane %v2845_v3, 1  ;;  %v2875_v8 = vmax.f32 %v2873_v22, %v2874_v51  ;;  %v2862_v29 = vrot.slane %v2861_v55, 2  ;;  %v2878_v12 = vrot.slane %v2659_v33, 4 }
 0x2c1   : > { %v3356_v56 = vunpack.c.l.b16 %v3754_v17  ;;  %v2859_v20 = vmax.f32 %v2857_v57, %v2858_v23  ;;  %vm2529_vm4 = vcmp.ge.f32.partialorder %v2361_v63, 0.0  ;;  %v2593_v0 = vmul.f32 0.01, %v2361_v63 }
 0x2c2   : > { %v2847_v9 = vmax.f32 %v2845_v3, %v2846_v45  ;;  %v2863_v59 = vmax.f32 %v2861_v55, %v2862_v29  ;;  %v2879_v54 = vmax.f32 %v2659_v33, %v2878_v12  ;;  %vm2534_vm5 = vcmp.ge.f32.partialorder %v2382_v21, 0.0 }
 0x2c3   : > { %v2876_v58 = vrot.slane %v2875_v8, 1  ;;  %v2657_v24 = vsel %vm2529_vm4, %v2361_v63, %v2593_v0  ;;  %v2598_v27 = vmul.f32 0.01, %v2382_v21  ;;  %v2374_v13 = vadd.f32 %v5157_v15, %v5253_v32 }
 0x2c4   : > { %v3755_v62 = vpack.c.bf16 %v2847_v9, %v2847_v9  ;;  %v2864_v7 = vrot.slane %v2863_v59, 1  ;;  %v2880_v31 = vrot.slane %v2879_v54, 2  ;;  %v2385_v1 = vadd.f32 %v5259_v35, %v5157_v15  ;;  %v5298_v35 = vpop.f32.mrf.mxu1 }
 0x2c5   : > { %v2866_v30 = vrot.slane %v2657_v24, 4  ;;  %v2662_v4 = vsel %vm2534_vm5, %v2382_v21, %v2598_v27  ;;  %vm2532_vm6 = vcmp.ge.f32.partialorder %v2374_v13, 0.0  ;;  %v2596_v10 = vmul.f32 0.01, %v2374_v13 }
 0x2c6   : > { %v3757_v37 = vpack.c.bf16 %v2859_v20, %v2859_v20  ;;  %v3357_v38 = vunpack.c.l.b16 %v3755_v62  ;;  %v2865_v40 = vmax.f32 %v2863_v59, %v2864_v7  ;;  %v2881_v46 = vmax.f32 %v2879_v54, %v2880_v31  ;;  %v5305_v26 = vpop.f32.mrf.mxu1 }
 0x2c7   : > { %v3358_v44 = vunpack.c.l.b16 %v3756_v39  ;;  %v2867_v43 = vmax.f32 %v2657_v24, %v2866_v30  ;;  %v2896_v61 = vrot.slane %v2662_v4, 4  ;;  %v2660_v32 = vsel %vm2532_vm6, %v2374_v13, %v2596_v10 }
 0x2c8   : > { %v3424_v14 = vsel %vm3396_vm7, %v3357_v38, %v3356_v56  ;;  %v2877_v47 = vmax.f32 %v2875_v8, %v2876_v58  ;;  %v3758_v2 = vpack.c.bf16 %v2865_v40, %v2865_v40  ;;  %v2882_v57 = vrot.slane %v2881_v46, 1  ;;  %v5310_v20 = vpop.f32.mrf.mxu1 }
 0x2c9   : > { %v2868_v19 = vrot.slane %v2867_v43, 2  ;;  %v2897_v6 = vmax.f32 %v2662_v4, %v2896_v61  ;;  %v2884_v25 = vrot.slane %v2660_v32, 4  ;;  %vm2535_vm9 = vcmp.ge.f32.partialorder %v2385_v1, 0.0 }
 0x2ca   : > { %v3359_v41 = vunpack.c.l.b16 %v3757_v37  ;;  %v3425_v49 = vsel %vm3398_vm8, %v3358_v44, %v3424_v14  ;;  %v2883_v52 = vmax.f32 %v2881_v46, %v2882_v57  ;;  %v2599_v5 = vmul.f32 0.01, %v2385_v1  ;;  %v5315_v10 = vpop.f32.mrf.mxu1 }
 0x2cb   : > { %v2869_v11 = vmax.f32 %v2867_v43, %v2868_v19  ;;  %v2898_v18 = vrot.slane %v2897_v6, 2  ;;  %v2885_v22 = vmax.f32 %v2660_v32, %v2884_v25  ;;  %v2377_v53 = vadd.f32 %v5157_v15, %v5263_v48 }
 0x2cc   : > { %v3760_v34 = vpack.c.bf16 %v2877_v47, %v2877_v47  ;;  %v3360_v17 = vunpack.c.l.b16 %v3758_v2  ;;  %v2663_v23 = vsel %vm2535_vm9, %v2385_v1, %v2599_v5  ;;  %v2398_v42 = vadd.f32 %v5270_v36, %v5157_v15 }
 0x2cd   : > { %v2870_v3 = vrot.slane %v2869_v11, 1  ;;  %v2899_v51 = vmax.f32 %v2897_v6, %v2898_v18  ;;  %v2886_v55 = vrot.slane %v2885_v22, 2  ;;  %v2902_v39 = vrot.slane %v2663_v23, 4  ;;  %v5320_v6 = vpop.f32.mrf.mxu1 }
 0x2ce   : > { %v3426_v33 = vsel %vm3400_vm10, %v3359_v41, %v3425_v49  ;;  %v3761_v63 = vpack.c.bf16 %v2883_v52, %v2883_v52  ;;  %vm2533_vm11 = vcmp.ge.f32.partialorder %v2377_v53, 0.0  ;;  %v2597_v21 = vmul.f32 0.01, %v2377_v53  ;;  %v5325_v49 = vld [vmem:[%s5422_s6] ss:$0 sm:$0xff] }
 0x2cf   : > { %v2871_v45 = vmax.f32 %v2869_v11, %v2870_v3  ;;  %v2887_v8 = vmax.f32 %v2885_v22, %v2886_v55  ;;  %v2903_v48 = vmax.f32 %v2663_v23, %v2902_v39  ;;  %vm2538_vm14 = vcmp.ge.f32.partialorder %v2398_v42, 0.0  ;;  %v5332_v55 = vpop.f32.mrf.mxu1 }
 0x2d0   : > { %v2900_v29 = vrot.slane %v2899_v51, 1  ;;  %v2661_v12 = vsel %vm2533_vm11, %v2377_v53, %v2597_v21  ;;  %v2602_v56 = vmul.f32 0.01, %v2398_v42  ;;  %v2390_v36 = vadd.f32 %v5157_v15, %v5276_v28 }
 0x2d1   : > { %v3759_v0 = vpack.c.bf16 %v2871_v45, %v2871_v45  ;;  %v2888_v9 = vrot.slane %v2887_v8, 1  ;;  %v2904_v59 = vrot.slane %v2903_v48, 2  ;;  %v2401_v54 = vadd.f32 %v5281_v50, %v5157_v15 }
 0x2d2   : > { %v2890_v58 = vrot.slane %v2661_v12, 4  ;;  %v2666_v24 = vsel %vm2538_vm14, %v2398_v42, %v2602_v56  ;;  %vm2536_vm1 = vcmp.ge.f32.partialorder %v2390_v36, 0.0  ;;  %v2600_v27 = vmul.f32 0.01, %v2390_v36 }
 0x2d3   : > { %v3362_v13 = vunpack.c.l.b16 %v3760_v34  ;;  %v3361_v62 = vunpack.c.l.b16 %v3759_v0  ;;  %v2889_v7 = vmax.f32 %v2887_v8, %v2888_v9  ;;  %v2905_v31 = vmax.f32 %v2903_v48, %v2904_v59  ;;  %v5338_v59 = vpop.f32.mrf.mxu1 }
 0x2d4   : > { %v3427_v1 = vsel %vm3402_vm12, %v3360_v17, %v3426_v33  ;;  %v2891_v30 = vmax.f32 %v2661_v12, %v2890_v58  ;;  %v2920_v28 = vrot.slane %v2666_v24, 4  ;;  %v2664_v4 = vsel %vm2536_vm1, %v2390_v36, %v2600_v27 }
 0x2d5   : > { %v3363_v37 = vunpack.c.l.b16 %v3761_v63  ;;  %v3428_v38 = vsel %vm3404_vm13, %v3361_v62, %v3427_v1  ;;  %v2901_v40 = vmax.f32 %v2899_v51, %v2900_v29  ;;  %vm2539_vm2 = vcmp.ge.f32.partialorder %v2401_v54, 0.0 }
 0x2d6   : > { %v3429_v15 = vsel %vm3406_vm15, %v3362_v13, %v3428_v38  ;;  %v2892_v50 = vrot.slane %v2891_v30, 2  ;;  %v2921_v46 = vmax.f32 %v2666_v24, %v2920_v28  ;;  %v2908_v44 = vrot.slane %v2664_v4, 4  ;;  %v5342_v38 = vpop.f32.mrf.mxu1 }
 0x2d7   : > { %v3430_v43 = vsel %vm3408_vm0, %v3363_v37, %v3429_v15  ;;  %v3762_v61 = vpack.c.bf16 %v2889_v7, %v2889_v7  ;;  %v2906_v32 = vrot.slane %v2905_v31, 1  ;;  %v2603_v14 = vmul.f32 0.01, %v2401_v54 }
 0x2d8   : > { %v3462_v47 = vpack.c.b16 %v3430_v43, %v3430_v43  ;;  %v2893_v2 = vmax.f32 %v2891_v30, %v2892_v50  ;;  %v2922_v57 = vrot.slane %v2921_v46, 2  ;;  %v2909_v19 = vmax.f32 %v2664_v4, %v2908_v44 }
 0x2d9   : > { %v3764_v25 = vpack.c.bf16 %v2901_v40, %v2901_v40  ;;  %v2667_v41 = vsel %vm2539_vm2, %v2401_v54, %v2603_v14  ;;  %v2393_v52 = vadd.f32 %v5325_v49, %v5289_v16  ;;  %v2414_v5 = vadd.f32 %v5325_v49, %v5295_v60 }
 0x2da   : > { %3478 = vst [vmem:[%s5197_s14 + $0xc] sm:$0xf] %v3462_v47  ;;  %v2894_v11 = vrot.slane %v2893_v2, 1  ;;  %v2923_v18 = vmax.f32 %v2921_v46, %v2922_v57  ;;  %v2910_v22 = vrot.slane %v2909_v19, 2  ;;  %v2926_v53 = vrot.slane %v2667_v41, 4 }
 0x2db   : > { %v3364_v34 = vunpack.c.l.b16 %v3762_v61  ;;  %v2907_v17 = vmax.f32 %v2905_v31, %v2906_v32  ;;  %vm2537_vm3 = vcmp.ge.f32.partialorder %v2393_v52, 0.0  ;;  %v2601_v23 = vmul.f32 0.01, %v2393_v52 }
 0x2dc   : > { %v2895_v42 = vmax.f32 %v2893_v2, %v2894_v11  ;;  %v2911_v3 = vmax.f32 %v2909_v19, %v2910_v22  ;;  %v2927_v51 = vmax.f32 %v2667_v41, %v2926_v53  ;;  %vm2542_vm4 = vcmp.ge.f32.partialorder %v2414_v5, 0.0 }
 0x2dd   : > { %v2924_v39 = vrot.slane %v2923_v18, 1  ;;  %v2665_v16 = vsel %vm2537_vm3, %v2393_v52, %v2601_v23  ;;  %v2606_v33 = vmul.f32 0.01, %v2414_v5  ;;  %v2406_v60 = vadd.f32 %v5325_v49, %v5298_v35  ;;  %v5349_v52 = vpop.f32.mrf.mxu1 }
 0x2de   : > { %v3763_v63 = vpack.c.bf16 %v2895_v42, %v2895_v42  ;;  %v2912_v21 = vrot.slane %v2911_v3, 1  ;;  %v2928_v45 = vrot.slane %v2927_v51, 2  ;;  %v2417_v8 = vadd.f32 %v5325_v49, %v5305_v26 }
 0x2df   : > { %v2914_v48 = vrot.slane %v2665_v16, 4  ;;  %v2670_v29 = vsel %vm2542_vm4, %v2414_v5, %v2606_v33  ;;  %vm2540_vm5 = vcmp.ge.f32.partialorder %v2406_v60, 0.0  ;;  %v2604_v12 = vmul.f32 0.01, %v2406_v60 }
 0x2e0   : > { %v3765_v56 = vpack.c.bf16 %v2907_v17, %v2907_v17  ;;  %v3365_v36 = vunpack.c.l.b16 %v3763_v63  ;;  %v2913_v0 = vmax.f32 %v2911_v3, %v2912_v21  ;;  %v2929_v9 = vmax.f32 %v2927_v51, %v2928_v45 }
 0x2e1   : > { %v3366_v54 = vunpack.c.l.b16 %v3764_v25  ;;  %v2915_v58 = vmax.f32 %v2665_v16, %v2914_v48  ;;  %v2944_v24 = vrot.slane %v2670_v29, 4  ;;  %v2668_v35 = vsel %vm2540_vm5, %v2406_v60, %v2604_v12  ;;  %v4057_v16 = vpop.f32.mrf.mxu1 }
 0x2e2   : > { %v3431_v27 = vsel %vm3396_vm7, %v3365_v36, %v3364_v34  ;;  %v2925_v13 = vmax.f32 %v2923_v18, %v2924_v39  ;;  %v3766_v62 = vpack.c.bf16 %v2913_v0, %v2913_v0  ;;  %v2930_v7 = vrot.slane %v2929_v9, 1 }
 0x2e3   : > { %v2916_v26 = vrot.slane %v2915_v58, 2  ;;  %v2945_v31 = vmax.f32 %v2670_v29, %v2944_v24  ;;  %v2932_v1 = vrot.slane %v2668_v35, 4  ;;  %vm2543_vm6 = vcmp.ge.f32.partialorder %v2417_v8, 0.0 }
 0x2e4   : > { %v3367_v30 = vunpack.c.l.b16 %v3765_v56  ;;  %v3432_v28 = vsel %vm3398_vm8, %v3366_v54, %v3431_v27  ;;  %v2931_v4 = vmax.f32 %v2929_v9, %v2930_v7  ;;  %v2607_v37 = vmul.f32 0.01, %v2417_v8  ;;  %v5358_v54 = vpop.f32.mrf.mxu1 }
 0x2e5   : > { %v2917_v40 = vmax.f32 %v2915_v58, %v2916_v26  ;;  %v2946_v15 = vrot.slane %v2945_v31, 2  ;;  %v2933_v50 = vmax.f32 %v2668_v35, %v2932_v1  ;;  %v2409_v46 = vadd.f32 %v5325_v49, %v5310_v20 }
 0x2e6   : > { %v3768_v44 = vpack.c.bf16 %v2925_v13, %v2925_v13  ;;  %v3368_v43 = vunpack.c.l.b16 %v3766_v62  ;;  %v2671_v61 = vsel %vm2543_vm6, %v2417_v8, %v2607_v37  ;;  %v2430_v32 = vadd.f32 %v5325_v49, %v5315_v10 }
 0x2e7   : > { %v2918_v14 = vrot.slane %v2917_v40, 1  ;;  %v2947_v47 = vmax.f32 %v2945_v31, %v2946_v15  ;;  %v2934_v2 = vrot.slane %v2933_v50, 2  ;;  %v2950_v57 = vrot.slane %v2671_v61, 4 }
 0x2e8   : > { %v3433_v19 = vsel %vm3400_vm10, %v3367_v30, %v3432_v28  ;;  %v3769_v25 = vpack.c.bf16 %v2931_v4, %v2931_v4  ;;  %vm2541_vm9 = vcmp.ge.f32.partialorder %v2409_v46, 0.0  ;;  %v2605_v41 = vmul.f32 0.01, %v2409_v46 }
 0x2e9   : > { %v2919_v5 = vmax.f32 %v2917_v40, %v2918_v14  ;;  %v2935_v11 = vmax.f32 %v2933_v50, %v2934_v2  ;;  %v2951_v20 = vmax.f32 %v2671_v61, %v2950_v57  ;;  %vm2546_vm11 = vcmp.ge.f32.partialorder %v2430_v32, 0.0  ;;  %v4060_v50 = vpop.f32.mrf.mxu1 }
 0x2ea   : > { %v2948_v18 = vrot.slane %v2947_v47, 1  ;;  %v2669_v22 = vsel %vm2541_vm9, %v2409_v46, %v2605_v41  ;;  %v2610_v53 = vmul.f32 0.01, %v2430_v32  ;;  %v2422_v10 = vadd.f32 %v5325_v49, %v5320_v6 }
 0x2eb   : > { %v3767_v34 = vpack.c.bf16 %v2919_v5, %v2919_v5  ;;  %v2936_v17 = vrot.slane %v2935_v11, 1  ;;  %v2952_v23 = vrot.slane %v2951_v20, 2  ;;  %v2433_v42 = vadd.f32 %v5325_v49, %v5332_v55  ;;  %v2453_v5 = vpop.f32.mrf.mxu1 }
 0x2ec   : > { %v2938_v3 = vrot.slane %v2669_v22, 4  ;;  %v2674_v51 = vsel %vm2546_vm11, %v2430_v32, %v2610_v53  ;;  %vm2544_vm14 = vcmp.ge.f32.partialorder %v2422_v10, 0.0  ;;  %v2608_v39 = vmul.f32 0.01, %v2422_v10 }
 0x2ed   : > { %v3370_v33 = vunpack.c.l.b16 %v3768_v44  ;;  %v3369_v60 = vunpack.c.l.b16 %v3767_v34  ;;  %v2937_v63 = vmax.f32 %v2935_v11, %v2936_v17  ;;  %v2953_v21 = vmax.f32 %v2951_v20, %v2952_v23 }
 0x2ee   : > { %v3434_v45 = vsel %vm3402_vm12, %v3368_v43, %v3433_v19  ;;  %v2939_v8 = vmax.f32 %v2669_v22, %v2938_v3  ;;  %v2968_v48 = vrot.slane %v2674_v51, 4  ;;  %v2672_v6 = vsel %vm2544_vm14, %v2422_v10, %v2608_v39 }
 0x2ef   : > { %v3371_v29 = vunpack.c.l.b16 %v3769_v25  ;;  %v3435_v12 = vsel %vm3404_vm13, %v3369_v60, %v3434_v45  ;;  %v2949_v56 = vmax.f32 %v2947_v47, %v2948_v18  ;;  %vm2547_vm1 = vcmp.ge.f32.partialorder %v2433_v42, 0.0 }
 0x2f0   : > { %v3436_v55 = vsel %vm3406_vm15, %v3370_v33, %v3435_v12  ;;  %v2940_v36 = vrot.slane %v2939_v8, 2  ;;  %v2969_v0 = vmax.f32 %v2674_v51, %v2968_v48  ;;  %v2956_v9 = vrot.slane %v2672_v6, 4  ;;  %v4061_v33 = vpop.f32.mrf.mxu1 }
 0x2f1   : > { %v3437_v58 = vsel %vm3408_vm0, %v3371_v29, %v3436_v55  ;;  %v3770_v24 = vpack.c.bf16 %v2937_v63, %v2937_v63  ;;  %v2954_v35 = vrot.slane %v2953_v21, 1  ;;  %v2611_v27 = vmul.f32 0.01, %v2433_v42 }
 0x2f2   : > { %v3463_v13 = vpack.c.b16 %v3437_v58, %v3437_v58  ;;  %v2941_v62 = vmax.f32 %v2939_v8, %v2940_v36  ;;  %v2970_v7 = vrot.slane %v2969_v0, 2  ;;  %v2957_v26 = vmax.f32 %v2672_v6, %v2956_v9  ;;  %v2456_v58 = vpop.f32.mrf.mxu1 }
 0x2f3   : > { %v3772_v31 = vpack.c.bf16 %v2949_v56, %v2949_v56  ;;  %v2675_v1 = vsel %vm2547_vm1, %v2433_v42, %v2611_v27  ;;  %v2425_v30 = vadd.f32 %v5325_v49, %v5338_v59  ;;  %v2446_v28 = vadd.f32 %v5325_v49, %v5342_v38 }
 0x2f4   : > { %3479 = vst [vmem:[%s5197_s14 + $0x10] sm:$0xf] %v3463_v13  ;;  %v2942_v4 = vrot.slane %v2941_v62, 1  ;;  %v2971_v37 = vmax.f32 %v2969_v0, %v2970_v7  ;;  %v2958_v40 = vrot.slane %v2957_v26, 2  ;;  %v2974_v15 = vrot.slane %v2675_v1, 4 }
 0x2f5   : > { %v3372_v46 = vunpack.c.l.b16 %v3770_v24  ;;  %v2955_v44 = vmax.f32 %v2953_v21, %v2954_v35  ;;  %vm2545_vm2 = vcmp.ge.f32.partialorder %v2425_v30, 0.0  ;;  %v2609_v43 = vmul.f32 0.01, %v2425_v30 }
 0x2f6   : > { %v2943_v61 = vmax.f32 %v2941_v62, %v2942_v4  ;;  %v2959_v32 = vmax.f32 %v2957_v26, %v2958_v40  ;;  %v2975_v14 = vmax.f32 %v2675_v1, %v2974_v15  ;;  %vm2550_vm3 = vcmp.ge.f32.partialorder %v2446_v28, 0.0  ;;  %v4064_v40 = vpop.f32.mrf.mxu1 }
 0x2f7   : > { %v2972_v47 = vrot.slane %v2971_v37, 1  ;;  %v2673_v2 = vsel %vm2545_vm2, %v2425_v30, %v2609_v43  ;;  %v2614_v59 = vmul.f32 0.01, %v2446_v28  ;;  %v2438_v38 = vadd.f32 %v5325_v49, %v5349_v52 }
 0x2f8   : > { %v3771_v57 = vpack.c.bf16 %v2943_v61, %v2943_v61  ;;  %v2960_v19 = vrot.slane %v2959_v32, 1  ;;  %v2976_v25 = vrot.slane %v2975_v14, 2  ;;  %v2449_v41 = vadd.f32 %v5325_v49, %v4057_v16 }
 0x2f9   : > { %v2962_v11 = vrot.slane %v2673_v2, 4  ;;  %v2678_v20 = vsel %vm2550_vm3, %v2446_v28, %v2614_v59  ;;  %vm2548_vm4 = vcmp.ge.f32.partialorder %v2438_v38, 0.0  ;;  %v2612_v18 = vmul.f32 0.01, %v2438_v38 }
 0x2fa   : > { %v3773_v22 = vpack.c.bf16 %v2955_v44, %v2955_v44  ;;  %v3373_v53 = vunpack.c.l.b16 %v3771_v57  ;;  %v2961_v10 = vmax.f32 %v2959_v32, %v2960_v19  ;;  %v2977_v34 = vmax.f32 %v2975_v14, %v2976_v25 }
 0x2fb   : > { %v2963_v17 = vmax.f32 %v2673_v2, %v2962_v11  ;;  %v2992_v23 = vrot.slane %v2678_v20, 4  ;;  %v2676_v42 = vsel %vm2548_vm4, %v2438_v38, %v2612_v18  ;;  %v3374_v3 = vunpack.c.l.b16 %v3772_v31 }
 0x2fc   : > { %v3438_v52 = vsel %vm3396_vm7, %v3373_v53, %v3372_v46  ;;  %v2973_v51 = vmax.f32 %v2971_v37, %v2972_v47  ;;  %v2978_v39 = vrot.slane %v2977_v34, 1  ;;  %v2980_v63 = vrot.slane %v2676_v42, 4 }
 0x2fd   : > { %v2964_v60 = vrot.slane %v2963_v17, 2  ;;  %v2993_v16 = vmax.f32 %v2678_v20, %v2992_v23  ;;  %vm2551_vm5 = vcmp.ge.f32.partialorder %v2449_v41, 0.0  ;;  %v3375_v21 = vunpack.c.l.b16 %v3773_v22 }
 0x2fe   : > { %v3439_v45 = vsel %vm3398_vm8, %v3374_v3, %v3438_v52  ;;  %v3774_v8 = vpack.c.bf16 %v2961_v10, %v2961_v10  ;;  %v2615_v48 = vmul.f32 0.01, %v2449_v41  ;;  %v2981_v12 = vmax.f32 %v2676_v42, %v2980_v63 }
 0x2ff   : > { %v2965_v6 = vmax.f32 %v2963_v17, %v2964_v60  ;;  %v2994_v29 = vrot.slane %v2993_v16, 2  ;;  %v2441_v56 = vadd.f32 %v5325_v49, %v5358_v54  ;;  %v3776_v55 = vpack.c.bf16 %v2973_v51, %v2973_v51 }
 0x300   : > { %v2979_v36 = vmax.f32 %v2977_v34, %v2978_v39  ;;  %v2679_v0 = vsel %vm2551_vm5, %v2449_v41, %v2615_v48  ;;  %v2462_v9 = vadd.f32 %v5325_v49, %v4060_v50  ;;  %v2982_v27 = vrot.slane %v2981_v12, 2  ;;  %v2469_v41 = vpop.f32.mrf.mxu1 }
 0x301   : > { %v2966_v24 = vrot.slane %v2965_v6, 1  ;;  %v2995_v35 = vmax.f32 %v2993_v16, %v2994_v29  ;;  %v2998_v13 = vrot.slane %v2679_v0, 4  ;;  %v3376_v62 = vunpack.c.l.b16 %v3774_v8 }
 0x302   : > { %v3440_v7 = vsel %vm3400_vm10, %v3375_v21, %v3439_v45  ;;  %vm2549_vm6 = vcmp.ge.f32.partialorder %v2441_v56, 0.0  ;;  %v2613_v26 = vmul.f32 0.01, %v2441_v56  ;;  %v2983_v1 = vmax.f32 %v2981_v12, %v2982_v27  ;;  %v4065_v39 = vpop.f32.mrf.mxu1 }
 0x303   : > { %v2967_v31 = vmax.f32 %v2965_v6, %v2966_v24  ;;  %v2999_v30 = vmax.f32 %v2679_v0, %v2998_v13  ;;  %vm2554_vm9 = vcmp.ge.f32.partialorder %v2462_v9, 0.0  ;;  %v3777_v54 = vpack.c.bf16 %v2979_v36, %v2979_v36 }
 0x304   : > { %v2677_v28 = vsel %vm2549_vm6, %v2441_v56, %v2613_v26  ;;  %v2618_v4 = vmul.f32 0.01, %v2462_v9  ;;  %v2454_v37 = vadd.f32 %v5325_v49, %v2453_v5  ;;  %v2996_v50 = vrot.slane %v2995_v35, 1  ;;  %v2472_v0 = vpop.f32.mrf.mxu1 }
 0x305   : > { %v3775_v15 = vpack.c.bf16 %v2967_v31, %v2967_v31  ;;  %v3000_v46 = vrot.slane %v2999_v30, 2  ;;  %v2465_v44 = vadd.f32 %v5325_v49, %v4061_v33  ;;  %v2986_v43 = vrot.slane %v2677_v28, 4 }
 0x306   : > { %v2682_v61 = vsel %vm2554_vm9, %v2462_v9, %v2618_v4  ;;  %vm2552_vm11 = vcmp.ge.f32.partialorder %v2454_v37, 0.0  ;;  %v2616_v32 = vmul.f32 0.01, %v2454_v37  ;;  %v3378_v14 = vunpack.c.l.b16 %v3776_v55 }
 0x307   : > { %v3441_v47 = vsel %vm3402_vm12, %v3376_v62, %v3440_v7  ;;  %v3377_v2 = vunpack.c.l.b16 %v3775_v15  ;;  %v2984_v59 = vrot.slane %v2983_v1, 1  ;;  %v3379_v38 = vunpack.c.l.b16 %v3777_v54 }
 0x308   : > { %v2987_v57 = vmax.f32 %v2677_v28, %v2986_v43  ;;  %v3016_v19 = vrot.slane %v2682_v61, 4  ;;  %v2680_v25 = vsel %vm2552_vm11, %v2454_v37, %v2616_v32  ;;  %v2997_v11 = vmax.f32 %v2995_v35, %v2996_v50  ;;  %v4068_v37 = vpop.f32.mrf.mxu1 }
 0x309   : > { %v3442_v5 = vsel %vm3404_vm13, %v3377_v2, %v3441_v47  ;;  %v3001_v20 = vmax.f32 %v2999_v30, %v3000_v46  ;;  %vm2555_vm14 = vcmp.ge.f32.partialorder %v2465_v44, 0.0  ;;  %v3004_v10 = vrot.slane %v2680_v25, 4 }
 0x30a   : > { %v3443_v18 = vsel %vm3406_vm15, %v3378_v14, %v3442_v5  ;;  %v2988_v22 = vrot.slane %v2987_v57, 2  ;;  %v3017_v53 = vmax.f32 %v2682_v61, %v3016_v19  ;;  %v2985_v17 = vmax.f32 %v2983_v1, %v2984_v59 }
 0x30b   : > { %v3444_v34 = vsel %vm3408_vm0, %v3379_v38, %v3443_v18  ;;  %v2619_v23 = vmul.f32 0.01, %v2465_v44  ;;  %v3005_v51 = vmax.f32 %v2680_v25, %v3004_v10  ;;  %v3002_v33 = vrot.slane %v3001_v20, 1 }
 0x30c   : > { %v3464_v42 = vpack.c.b16 %v3444_v34, %v3444_v34  ;;  %v2989_v3 = vmax.f32 %v2987_v57, %v2988_v22  ;;  %v3018_v52 = vrot.slane %v3017_v53, 2  ;;  %v2457_v16 = vadd.f32 %v5325_v49, %v2456_v58  ;;  %v2485_v57 = vpop.f32.mrf.mxu1 }
 0x30d   : > { %v2683_v60 = vsel %vm2555_vm14, %v2465_v44, %v2619_v23  ;;  %v2478_v63 = vadd.f32 %v5325_v49, %v4064_v40  ;;  %v3780_v21 = vpack.c.bf16 %v2997_v11, %v2997_v11  ;;  %v3006_v8 = vrot.slane %v3005_v51, 2 }
 0x30e   : > { %3480 = vst [vmem:[%s5197_s14 + $0x14] sm:$0xf] %v3464_v42  ;;  %v2990_v45 = vrot.slane %v2989_v3, 1  ;;  %v3022_v48 = vrot.slane %v2683_v60, 4  ;;  %v3778_v6 = vpack.c.bf16 %v2985_v17, %v2985_v17  ;;  %v3019_v29 = vmax.f32 %v3017_v53, %v3018_v52 }
 0x30f   : > { %vm2553_vm1 = vcmp.ge.f32.partialorder %v2457_v16, 0.0  ;;  %v2617_v12 = vmul.f32 0.01, %v2457_v16  ;;  %v3007_v55 = vmax.f32 %v3005_v51, %v3006_v8  ;;  %vm2558_vm2 = vcmp.ge.f32.partialorder %v2478_v63, 0.0 }
 0x310   : > { %v2991_v56 = vmax.f32 %v2989_v3, %v2990_v45  ;;  %v3023_v36 = vmax.f32 %v2683_v60, %v3022_v48  ;;  %v3003_v9 = vmax.f32 %v3001_v20, %v3002_v33  ;;  %v2622_v35 = vmul.f32 0.01, %v2478_v63  ;;  %v4069_v3 = vpop.f32.mrf.mxu1 }
 0x311   : > { %v2681_v24 = vsel %vm2553_vm1, %v2457_v16, %v2617_v12  ;;  %v2470_v58 = vadd.f32 %v5325_v49, %v2469_v41  ;;  %v3008_v13 = vrot.slane %v3007_v55, 1  ;;  %v2481_v7 = vadd.f32 %v5325_v49, %v4065_v39 }
 0x312   : > { %v3779_v27 = vpack.c.bf16 %v2991_v56, %v2991_v56  ;;  %v3024_v62 = vrot.slane %v3023_v36, 2  ;;  %v3010_v26 = vrot.slane %v2681_v24, 4  ;;  %v2686_v31 = vsel %vm2558_vm2, %v2478_v63, %v2622_v35 }
 0x313   : > { %vm2556_vm3 = vcmp.ge.f32.partialorder %v2470_v58, 0.0  ;;  %v2620_v1 = vmul.f32 0.01, %v2470_v58  ;;  %v3020_v54 = vrot.slane %v3019_v29, 1  ;;  %v3009_v28 = vmax.f32 %v3007_v55, %v3008_v13 }
 0x314   : > { %v3381_v30 = vunpack.c.l.b16 %v3779_v27  ;;  %v3025_v4 = vmax.f32 %v3023_v36, %v3024_v62  ;;  %v3380_v40 = vunpack.c.l.b16 %v3778_v6  ;;  %v3011_v15 = vmax.f32 %v2681_v24, %v3010_v26 }
 0x315   : > { %v2684_v50 = vsel %vm2556_vm3, %v2470_v58, %v2620_v1  ;;  %v3781_v46 = vpack.c.bf16 %v3003_v9, %v3003_v9  ;;  %v3040_v44 = vrot.slane %v2686_v31, 4  ;;  %vm2559_vm4 = vcmp.ge.f32.partialorder %v2481_v7, 0.0 }
 0x316   : > { %v3445_v43 = vsel %vm3396_vm7, %v3381_v30, %v3380_v40  ;;  %v3026_v61 = vrot.slane %v3025_v4, 1  ;;  %v3012_v32 = vrot.slane %v3011_v15, 2  ;;  %v3028_v14 = vrot.slane %v2684_v50, 4  ;;  %v2488_v30 = vpop.f32.mrf.mxu1 }
 0x317   : > { %v3382_v47 = vunpack.c.l.b16 %v3780_v21  ;;  %v3021_v2 = vmax.f32 %v3019_v29, %v3020_v54  ;;  %v3782_v59 = vpack.c.bf16 %v3009_v28, %v3009_v28  ;;  %v2623_v38 = vmul.f32 0.01, %v2481_v7 }
 0x318   : > { %v3013_v19 = vmax.f32 %v3011_v15, %v3012_v32  ;;  %v3029_v25 = vmax.f32 %v2684_v50, %v3028_v14  ;;  %v2473_v41 = vadd.f32 %v5325_v49, %v2472_v0  ;;  %v3041_v11 = vmax.f32 %v2686_v31, %v3040_v44 }
 0x319   : > { %v3446_v5 = vsel %vm3398_vm8, %v3382_v47, %v3445_v43  ;;  %v2687_v20 = vsel %vm2559_vm4, %v2481_v7, %v2623_v38  ;;  %v2494_v18 = vadd.f32 %v5325_v49, %v4068_v37  ;;  %v3383_v22 = vunpack.c.l.b16 %v3781_v46 }
 0x31a   : > { %v3027_v53 = vmax.f32 %v3025_v4, %v3026_v61  ;;  %v3014_v10 = vrot.slane %v3013_v19, 1  ;;  %v3046_v34 = vrot.slane %v2687_v20, 4  ;;  %v3784_v17 = vpack.c.bf16 %v3021_v2, %v3021_v2 }
 0x31b   : > { %v3384_v23 = vunpack.c.l.b16 %v3782_v59  ;;  %vm2557_vm5 = vcmp.ge.f32.partialorder %v2473_v41, 0.0  ;;  %v2621_v42 = vmul.f32 0.01, %v2473_v41  ;;  %v3447_v52 = vsel %vm3400_vm10, %v3383_v22, %v3446_v5 }
 0x31c   : > { %v3015_v51 = vmax.f32 %v3013_v19, %v3014_v10  ;;  %v3030_v39 = vrot.slane %v3029_v25, 2  ;;  %vm2562_vm6 = vcmp.ge.f32.partialorder %v2494_v18, 0.0  ;;  %v3042_v33 = vrot.slane %v3041_v11, 2 }
 0x31d   : > { %v2685_v60 = vsel %vm2557_vm5, %v2473_v41, %v2621_v42  ;;  %v2626_v16 = vmul.f32 0.01, %v2494_v18  ;;  %v2486_v63 = vadd.f32 %v5325_v49, %v2485_v57  ;;  %v3785_v21 = vpack.c.bf16 %v3027_v53, %v3027_v53 }
 0x31e   : > { %v3783_v45 = vpack.c.bf16 %v3015_v51, %v3015_v51  ;;  %v3047_v8 = vmax.f32 %v2687_v20, %v3046_v34  ;;  %v2497_v48 = vadd.f32 %v5325_v49, %v4069_v3  ;;  %v3034_v6 = vrot.slane %v2685_v60, 4 }
 0x31f   : > { %v2690_v29 = vsel %vm2562_vm6, %v2494_v18, %v2626_v16  ;;  %vm2560_vm9 = vcmp.ge.f32.partialorder %v2486_v63, 0.0  ;;  %v2624_v12 = vmul.f32 0.01, %v2486_v63  ;;  %v3386_v56 = vunpack.c.l.b16 %v3784_v17 }
 0x320   : > { %v3448_v55 = vsel %vm3402_vm12, %v3384_v23, %v3447_v52  ;;  %v3385_v36 = vunpack.c.l.b16 %v3783_v45  ;;  %v3031_v0 = vmax.f32 %v3029_v25, %v3030_v39  ;;  %v3043_v9 = vmax.f32 %v3041_v11, %v3042_v33 }
 0x321   : > { %v3035_v24 = vmax.f32 %v2685_v60, %v3034_v6  ;;  %v3064_v35 = vrot.slane %v2690_v29, 4  ;;  %v2688_v58 = vsel %vm2560_vm9, %v2486_v63, %v2624_v12  ;;  %v3387_v27 = vunpack.c.l.b16 %v3785_v21 }
 0x322   : > { %v3449_v13 = vsel %vm3404_vm13, %v3385_v36, %v3448_v55  ;;  %v3048_v62 = vrot.slane %v3047_v8, 2  ;;  %vm2563_vm11 = vcmp.ge.f32.partialorder %v2497_v48, 0.0  ;;  %v3052_v1 = vrot.slane %v2688_v58, 4 }
 0x323   : > { %v3450_v7 = vsel %vm3406_vm15, %v3386_v56, %v3449_v13  ;;  %v3036_v26 = vrot.slane %v3035_v24, 2  ;;  %v3065_v31 = vmax.f32 %v2690_v29, %v3064_v35  ;;  %v3032_v28 = vrot.slane %v3031_v0, 1 }
 0x324   : > { %v3451_v54 = vsel %vm3408_vm0, %v3387_v27, %v3450_v7  ;;  %v2627_v4 = vmul.f32 0.01, %v2497_v48  ;;  %v3053_v15 = vmax.f32 %v2688_v58, %v3052_v1  ;;  %v3044_v50 = vrot.slane %v3043_v9, 1 }
 0x325   : > { %v3465_v37 = vpack.c.b16 %v3451_v54, %v3451_v54  ;;  %v3037_v40 = vmax.f32 %v3035_v24, %v3036_v26  ;;  %v3049_v46 = vmax.f32 %v3047_v8, %v3048_v62  ;;  %v2489_v43 = vadd.f32 %v5325_v49, %v2488_v30 }
 0x326   : > { %v2691_v44 = vsel %vm2563_vm11, %v2497_v48, %v2627_v4  ;;  %v3066_v32 = vrot.slane %v3065_v31, 2  ;;  %v3054_v14 = vrot.slane %v3053_v15, 2  ;;  %v3033_v2 = vmax.f32 %v3031_v0, %v3032_v28 }
 0x327   : > { %3481 = vst [vmem:[%s5197_s14 + $0x18] sm:$0xf] %v3465_v37  ;;  %v3038_v61 = vrot.slane %v3037_v40, 1  ;;  %v3070_v47 = vrot.slane %v2691_v44, 4  ;;  %vm2561_vm14 = vcmp.ge.f32.partialorder %v2489_v43, 0.0  ;;  %v3045_v25 = vmax.f32 %v3043_v9, %v3044_v50 }
 0x328   : > { %v2625_v59 = vmul.f32 0.01, %v2489_v43  ;;  %v3055_v57 = vmax.f32 %v3053_v15, %v3054_v14  ;;  %v3050_v41 = vrot.slane %v3049_v46, 1  ;;  %v3067_v20 = vmax.f32 %v3065_v31, %v3066_v32 }
 0x329   : > { %v3039_v38 = vmax.f32 %v3037_v40, %v3038_v61  ;;  %v3071_v19 = vmax.f32 %v2691_v44, %v3070_v47  ;;  %v3786_v53 = vpack.c.bf16 %v3033_v2, %v3033_v2  ;;  %v3788_v42 = vpack.c.bf16 %v3045_v25, %v3045_v25 }
 0x32a   : > { %v2689_v5 = vsel %vm2561_vm14, %v2489_v43, %v2625_v59  ;;  %v3056_v18 = vrot.slane %v3055_v57, 1  ;;  %v3051_v34 = vmax.f32 %v3049_v46, %v3050_v41  ;;  %v3068_v3 = vrot.slane %v3067_v20, 1 }
 0x32b   : > { %v3787_v11 = vpack.c.bf16 %v3039_v38, %v3039_v38  ;;  %v3072_v22 = vrot.slane %v3071_v19, 2  ;;  %v3058_v49 = vrot.slane %v2689_v5, 4  ;;  %v3388_v51 = vunpack.c.l.b16 %v3786_v53 }
 0x32c   : > { %v3057_v52 = vmax.f32 %v3055_v57, %v3056_v18  ;;  %v3789_v60 = vpack.c.bf16 %v3051_v34, %v3051_v34  ;;  %v3390_v21 = vunpack.c.l.b16 %v3788_v42  ;;  %v3069_v45 = vmax.f32 %v3067_v20, %v3068_v3 }
 0x32d   : > { %v3073_v10 = vmax.f32 %v3071_v19, %v3072_v22  ;;  %v3389_v17 = vunpack.c.l.b16 %v3787_v11  ;;  %v3059_v23 = vmax.f32 %v2689_v5, %v3058_v49 }
 0x32e   : > { %v3790_v8 = vpack.c.bf16 %v3057_v52, %v3057_v52  ;;  %v3391_v12 = vunpack.c.l.b16 %v3789_v60  ;;  %v3792_v55 = vpack.c.bf16 %v3069_v45, %v3069_v45 }
 0x32f   : > { %v3074_v39 = vrot.slane %v3073_v10, 1  ;;  %v3060_v33 = vrot.slane %v3059_v23, 2  ;;  %v3452_v16 = vsel %vm3396_vm7, %v3389_v17, %v3388_v51 }
 0x330   : > { %v3453_v29 = vsel %vm3398_vm8, %v3390_v21, %v3452_v16  ;;  %v3392_v36 = vunpack.c.l.b16 %v3790_v8  ;;  %v3394_v58 = vunpack.c.l.b16 %v3792_v55 }
 0x331   : > { %v3061_v63 = vmax.f32 %v3059_v23, %v3060_v33  ;;  %v3075_v48 = vmax.f32 %v3073_v10, %v3074_v39  ;;  %v3454_v0 = vsel %vm3400_vm10, %v3391_v12, %v3453_v29 }
 0x332   : > { %v3455_v27 = vsel %vm3402_vm12, %v3392_v36, %v3454_v0 }
 0x333   : > { %v3062_v6 = vrot.slane %v3061_v63, 1  ;;  %v3793_v9 = vpack.c.bf16 %v3075_v48, %v3075_v48 }
 0x335   : > { %v3063_v56 = vmax.f32 %v3061_v63, %v3062_v6  ;;  %v3395_v13 = vunpack.c.l.b16 %v3793_v9 }
 0x337   : > { %v3791_v24 = vpack.c.bf16 %v3063_v56, %v3063_v56 }
 0x339   : > { %v3393_v35 = vunpack.c.l.b16 %v3791_v24 }
 0x33b   : > { %v3456_v62 = vsel %vm3404_vm13, %v3393_v35, %v3455_v27 }
 0x33c   : > { %v3457_v7 = vsel %vm3406_vm15, %v3394_v58, %v3456_v62 }
 0x33d   : > { %v3458_v26 = vsel %vm3408_vm0, %v3395_v13, %v3457_v7 }
 0x33e   : > { %v3466_v31 = vpack.c.b16 %v3458_v26, %v3458_v26 }
 0x340   : > { %3482 = vst [vmem:[%s5197_s14 + $0x1c] sm:$0xf] %v3466_v31 }
 0x341 PF: > { %s17_s26 = sadd.s32 1, %s4178_s26   ;;  %s5582_s24 = smov %s4174_s25 }
 0x342   : > { %p14_p5 = scmp.ge.s32.totalorder %s17_s26, 4   ;;  %s5583_s25 = smov %s5585_s27 }
 0x344   :  { %16 = sbr.rel (!%p14_p5) target bundleno = 2 (0x2), region = 81 }

// kernel: pct_segmentation_forward.16
= control target key start
LH: loop header
LB: loop body
LE: loop exit
PB: predicated region body
PF: predicated region fallthrough
CT: control target
= control target key end

     0   :  { %s1983_s17 = smov 0   ;;  %s1985_s18 = smov 0   ;;  %s2182_s0 = inlined_call_operand.vmem [shape: bf16[2,64,128], index: 0, kind: input, shape index: {}]   ;;  %s2183_s1 = inlined_call_operand.vmem [shape: bf16[2,64,128], index: 1, kind: input, shape index: {}]   ;;  %s2184_s2 = inlined_call_operand.vmem [shape: bf16[2,64,128], index: 2, kind: input, shape index: {}]   ;;  %s2185_s3 = inlined_call_operand.vmem [shape: bf16[2,64,128], index: 3, kind: input, shape index: {}]   ;;  %s2186_s4 = inlined_call_operand.vmem [shape: bf16[128,128], index: 4, kind: input, shape index: {}]   ;;  %s2187_s5 = inlined_call_operand.vmem [shape: bf16[128,128], index: 5, kind: input, shape index: {}]   ;;  %s2188_s6 = inlined_call_operand.vmem [shape: bf16[128,128], index: 6, kind: input, shape index: {}]   ;;  %s2189_s7 = inlined_call_operand.vmem [shape: bf16[128,128], index: 7, kind: input, shape index: {}]   ;;  %s2190_s8 = inlined_call_operand.vmem [shape: f32[1,128], index: 8, kind: input, shape index: {}]   ;;  %s2191_s9 = inlined_call_operand.vmem [shape: bf16[2,64,128], index: 9, kind: output, shape index: {0}]   ;;  %s2192_s10 = inlined_call_operand.vmem [shape: f32[2,1,128], index: 10, kind: output, shape index: {1}]   ;;  %s2193_s11 = inlined_call_operand.vmem [shape: f32[2,1,128], index: 11, kind: output, shape index: {2}]  }
   0x1   :  { %s1987_s19 = smov 0  }
   0x2 LB: > { %s34_s20 = sadd.s32 1, %s1917_s18  ;;  %p1577_p0 = scmp.ge.s32.totalorder %s1921_s19, 1  ;;  %s1921_s19 = sphi %s1987_s19, %s22_s19   ;;  %s1917_s18 = sphi %s1985_s18, %s2195_s18   ;;  %s1913_s17 = sphi %s1983_s17, %s2194_s17  }
   0x3   : > { %p36_p1 = scmp.ge.s32.totalorder %s34_s20, 2  ;;  %p414_p2 = scmp.lt.s32.totalorder %s1921_s19, 3 }
   0x5   : > { %s2197_s20 = smov (%p36_p1, %s34_s20), 0  ;;  %p415_p3 = pnand %p1577_p0, %p414_p2 }
   0x6   : > { %p496_p4 = scmp.lt.s32.totalorder (!%p415_p3), %s1913_s17, 1 }
   0x7   : > { %418 = sbr.rel (%p415_p3) target bundleno = 323 (0x143), region = 56 }
   0xc   : > { %v1851_v0 = vld [vmem:[%s2187_s5 + $0x38] sm:$0xff]   ;;  %v1853_v2 = vld [vmem:[%s2187_s5 + $0x30] sm:$0xff]   ;;  %v1855_v4 = vld [vmem:[%s2187_s5 + $0x28] sm:$0xff]   ;;  %s2199_s17 = smov (!%p496_p4, %s1913_s17), 1 }
   0xd   : > { %v1852_v1 = vld [vmem:[%s2186_s4 + $0x38] sm:$0xff]   ;;  %1731 = vmatprep.subr.bf16.mxu0 %v1851_v0  ;;  %v1854_v3 = vld [vmem:[%s2186_s4 + $0x30] sm:$0xff]   ;;  %v1856_v5 = vld [vmem:[%s2186_s4 + $0x28] sm:$0xff]   ;;  %s2028_s22 = sshll.u32 %s2199_s17, 5  ;;  %s547_s24 = scalar_lea.vmem %s2192_s10, %s2199_s17 }
   0xe   : > { %1755 = vmatprep.subr.bf16.mxu1 %v1852_v1  ;;  %1732 = vmatpush3.bf16.msra.mxu0 %v1851_v0  ;;  %v1857_v6 = vld [vmem:[%s2187_s5 + $0x20] sm:$0xff]   ;;  %v1859_v8 = vld [vmem:[%s2187_s5 + $0x18] sm:$0xff]   ;;  %s2040_s29 = scalar_lea.vmem %s2183_s1, %s2028_s22  ;;  %v1861_v10 = vld [vmem:[%s2187_s5 + $0x10] sm:$0xff]   ;;  %s2049_s15 = scalar_lea.vmem %s2182_s0, %s2028_s22 }
   0xf   : > { %1756 = vmatpush3.bf16.msra.mxu1 %v1852_v1  ;;  %1733 = vmatprep.subr.bf16.mxu0 %v1853_v2  ;;  %v1858_v7 = vld [vmem:[%s2186_s4 + $0x20] sm:$0xff]   ;;  %v1860_v9 = vld [vmem:[%s2186_s4 + $0x18] sm:$0xff]   ;;  %v1862_v11 = vld [vmem:[%s2186_s4 + $0x10] sm:$0xff]   ;;  %s2098_s23 = scalar_lea.vmem %s2184_s2, %s2028_s22  ;;  %s2105_s26 = scalar_lea.vmem %s2185_s3, %s2028_s22 }
  0x10   : > { %1757 = vmatprep.subr.bf16.mxu1 %v1854_v3  ;;  %v1867_v12 = vld [vmem:[%s2040_s29] sm:$0xff]   ;;  %v1863_v14 = vld [vmem:[%s2187_s5 + $0x8] sm:$0xff]   ;;  %v1871_v19 = vld [vmem:[%s2188_s6 + $0x38] sm:$0xff]   ;;  %s2155_s16 = scalar_lea.vmem %s2191_s9, %s2028_s22  ;;  %s550_s28 = scalar_lea.vmem %s2193_s11, %s2199_s17 }
  0x11   : > { %v1868_v13 = vld [vmem:[%s2049_s15] sm:$0xff]   ;;  %1747 = vmatprep.mubr.bf16.mxu0 %v1867_v12  ;;  %v1864_v15 = vld [vmem:[%s2186_s4 + $0x8] sm:$0xff]   ;;  %v1872_v20 = vld [vmem:[%s2189_s7 + $0x38] sm:$0xff]  }
  0x12   : > { %1734 = vmatpush3.bf16.msra.mxu0 %v1853_v2  ;;  %1771 = vmatprep.mubr.bf16.mxu1 %v1868_v13  ;;  %v1865_v16 = vld [vmem:[%s2187_s5] sm:$0xff]   ;;  %v1869_v18 = vld [vmem:[%s2040_s29 + $0x8] sm:$0xff]   ;;  %v1873_v22 = vld [vmem:[%s2188_s6 + $0x30] sm:$0xff]  }
  0x13   : > { %1758 = vmatpush3.bf16.msra.mxu1 %v1854_v3  ;;  %1735 = vmatprep.subr.bf16.mxu0 %v1855_v4  ;;  %v1866_v17 = vld [vmem:[%s2186_s4] sm:$0xff]   ;;  %v1870_v21 = vld [vmem:[%s2049_s15 + $0x8] sm:$0xff]   ;;  %v1874_v23 = vld [vmem:[%s2189_s7 + $0x30] sm:$0xff]  }
  0x14   : > { %1759 = vmatprep.subr.bf16.mxu1 %v1856_v5  ;;  %v1881_v24 = vld [vmem:[%s2040_s29 + $0x10] sm:$0xff]   ;;  %v1875_v26 = vld [vmem:[%s2188_s6 + $0x28] sm:$0xff]   ;;  %v1877_v28 = vld [vmem:[%s2188_s6 + $0x20] sm:$0xff]  }
  0x15   : > { %v1882_v25 = vld [vmem:[%s2049_s15 + $0x10] sm:$0xff]   ;;  %v1876_v27 = vld [vmem:[%s2189_s7 + $0x28] sm:$0xff]   ;;  %v1883_v29 = vld [vmem:[%s2040_s29 + $0x18] sm:$0xff]  }
  0x16   : > { %1736 = vmatpush3.bf16.msra.mxu0 %v1855_v4  ;;  %v1884_v30 = vld [vmem:[%s2049_s15 + $0x18] sm:$0xff]   ;;  %v1878_v31 = vld [vmem:[%s2189_s7 + $0x20] sm:$0xff]   ;;  %v1885_v36 = vld [vmem:[%s2188_s6 + $0x10] sm:$0xff]  }
  0x17   : > { %1760 = vmatpush3.bf16.msra.mxu1 %v1856_v5  ;;  %1737 = vmatprep.subr.bf16.mxu0 %v1857_v6  ;;  %v1891_v32 = vld [vmem:[%s2098_s23] sm:$0xff]   ;;  %v1879_v34 = vld [vmem:[%s2188_s6 + $0x18] sm:$0xff]   ;;  %v1886_v37 = vld [vmem:[%s2189_s7 + $0x10] sm:$0xff]  }
  0x18   : > { %1761 = vmatprep.subr.bf16.mxu1 %v1858_v7  ;;  %v1892_v33 = vld [vmem:[%s2105_s26] sm:$0xff]   ;;  %v1880_v35 = vld [vmem:[%s2189_s7 + $0x18] sm:$0xff]   ;;  %v1887_v38 = vld [vmem:[%s2188_s6 + $0x8] sm:$0xff]  }
  0x19   : > { %v1888_v39 = vld [vmem:[%s2189_s7 + $0x8] sm:$0xff]   ;;  %v1889_v40 = vld [vmem:[%s2188_s6] sm:$0xff]   ;;  %v1895_v44 = vld [vmem:[%s2098_s23 + $0x10] sm:$0xff]  }
  0x1a   : > { %1738 = vmatpush3.bf16.msra.mxu0 %v1857_v6  ;;  %v1890_v41 = vld [vmem:[%s2189_s7] sm:$0xff]   ;;  %v1893_v42 = vld [vmem:[%s2098_s23 + $0x8] sm:$0xff]   ;;  %v1896_v45 = vld [vmem:[%s2105_s26 + $0x10] sm:$0xff]  }
  0x1b   : > { %1762 = vmatpush3.bf16.msra.mxu1 %v1858_v7  ;;  %1739 = vmatprep.subr.bf16.mxu0 %v1859_v8  ;;  %v1894_v43 = vld [vmem:[%s2105_s26 + $0x8] sm:$0xff]   ;;  %v1897_v46 = vld [vmem:[%s2098_s23 + $0x18] sm:$0xff]   ;;  %v2145_v5 = vld [vmem:[%s2190_s8] ss:$0 sm:$0xff] }
  0x1c   : > { %1763 = vmatprep.subr.bf16.mxu1 %v1860_v9  ;;  %v1898_v47 = vld [vmem:[%s2105_s26 + $0x18] sm:$0xff]  }
  0x1e   : > { %1740 = vmatpush3.bf16.msra.mxu0 %v1859_v8 }
  0x1f   : > { %1764 = vmatpush3.bf16.msra.mxu1 %v1860_v9  ;;  %1741 = vmatprep.subr.bf16.mxu0 %v1861_v10 }
  0x20   : > { %1765 = vmatprep.subr.bf16.mxu1 %v1862_v11 }
  0x22   : > { %1742 = vmatpush3.bf16.msra.mxu0 %v1861_v10 }
  0x23   : > { %1766 = vmatpush3.bf16.msra.mxu1 %v1862_v11  ;;  %1743 = vmatprep.subr.bf16.mxu0 %v1863_v14 }
  0x24   : > { %1767 = vmatprep.subr.bf16.mxu1 %v1864_v15 }
  0x26   : > { %1744 = vmatpush3.bf16.msra.mxu0 %v1863_v14 }
  0x27   : > { %1768 = vmatpush3.bf16.msra.mxu1 %v1864_v15  ;;  %1745 = vmatprep.subr.bf16.mxu0 %v1865_v16 }
  0x28   : > { %1769 = vmatprep.subr.bf16.mxu1 %v1866_v17 }
  0x2a   : > { %1746 = vmatpush3.bf16.msra.mxu0 %v1865_v16 }
  0x2b   : > { %1770 = vmatpush3.bf16.msra.mxu1 %v1866_v17  ;;  %1779 = vmatprep.subr.bf16.mxu0 %v1871_v19 }
  0x2c   : > { %1803 = vmatprep.subr.bf16.mxu1 %v1872_v20 }
  0x2d   : > { %1748 = vmatmul.mubr.bf16.vlgmr.msra.gmra.mxu0 %v1869_v18 }
  0x2e   : > { %1772 = vmatmul.mubr.bf16.vlgmr.msra.gmra.mxu1 %v1870_v21  ;;  %1780 = vmatpush3.bf16.msra.mxu0 %v1871_v19 }
  0x2f   : > { %1804 = vmatpush3.bf16.msra.mxu1 %v1872_v20  ;;  %1781 = vmatprep.subr.bf16.mxu0 %v1873_v22 }
  0x30   : > { %1805 = vmatprep.subr.bf16.mxu1 %v1874_v23  ;;  %1751 = vmatprep.mubr.bf16.mxu0 %v1881_v24 }
  0x31   : > { %1775 = vmatprep.mubr.bf16.mxu1 %v1882_v25 }
  0x32   : > { %1782 = vmatpush3.bf16.msra.mxu0 %v1873_v22 }
  0x33   : > { %1806 = vmatpush3.bf16.msra.mxu1 %v1874_v23  ;;  %1783 = vmatprep.subr.bf16.mxu0 %v1875_v26 }
  0x34   : > { %1807 = vmatprep.subr.bf16.mxu1 %v1876_v27 }
  0x35   : > { %1752 = vmatmul.mubr.bf16.gmra.mxu0 %v1883_v29 }
  0x36   : > { %1784 = vmatpush3.bf16.msra.mxu0 %v1875_v26  ;;  %1776 = vmatmul.mubr.bf16.gmra.mxu1 %v1884_v30 }
  0x37   : > { %1808 = vmatpush3.bf16.msra.mxu1 %v1876_v27  ;;  %1785 = vmatprep.subr.bf16.mxu0 %v1877_v28 }
  0x38   : > { %1809 = vmatprep.subr.bf16.mxu1 %v1878_v31  ;;  %1795 = vmatprep.mubr.bf16.mxu0 %v1891_v32 }
  0x39   : > { %1819 = vmatprep.mubr.bf16.mxu1 %v1892_v33 }
  0x3a   : > { %1786 = vmatpush3.bf16.msra.mxu0 %v1877_v28 }
  0x3b   : > { %1810 = vmatpush3.bf16.msra.mxu1 %v1878_v31  ;;  %1787 = vmatprep.subr.bf16.mxu0 %v1879_v34 }
  0x3c   : > { %1811 = vmatprep.subr.bf16.mxu1 %v1880_v35 }
  0x3e   : > { %1788 = vmatpush3.bf16.msra.mxu0 %v1879_v34 }
  0x3f   : > { %1812 = vmatpush3.bf16.msra.mxu1 %v1880_v35  ;;  %1789 = vmatprep.subr.bf16.mxu0 %v1885_v36 }
  0x40   : > { %1813 = vmatprep.subr.bf16.mxu1 %v1886_v37 }
  0x42   : > { %1790 = vmatpush3.bf16.msra.mxu0 %v1885_v36 }
  0x43   : > { %1814 = vmatpush3.bf16.msra.mxu1 %v1886_v37  ;;  %1791 = vmatprep.subr.bf16.mxu0 %v1887_v38 }
  0x44   : > { %1815 = vmatprep.subr.bf16.mxu1 %v1888_v39 }
  0x46   : > { %1792 = vmatpush3.bf16.msra.mxu0 %v1887_v38 }
  0x47   : > { %1816 = vmatpush3.bf16.msra.mxu1 %v1888_v39  ;;  %1793 = vmatprep.subr.bf16.mxu0 %v1889_v40 }
  0x48   : > { %1817 = vmatprep.subr.bf16.mxu1 %v1890_v41 }
  0x4a   : > { %1794 = vmatpush3.bf16.msra.mxu0 %v1889_v40 }
  0x4b   : > { %1818 = vmatpush3.bf16.msra.mxu1 %v1890_v41 }
  0x4d   : > { %1796 = vmatmul.mubr.bf16.vlgmr.msra.gmra.mxu0 %v1893_v42 }
  0x4e   : > { %1820 = vmatmul.mubr.bf16.vlgmr.msra.gmra.mxu1 %v1894_v43  ;;  %1799 = vmatprep.mubr.bf16.mxu0 %v1895_v44 }
  0x4f   : > { %1823 = vmatprep.mubr.bf16.mxu1 %v1896_v45 }
  0x55   : > { %1800 = vmatmul.mubr.bf16.gmra.mxu0 %v1897_v46 }
  0x56   : > { %1824 = vmatmul.mubr.bf16.gmra.mxu1 %v1898_v47 }
  0xed   : > { %v1749_v48 = vpop.f32.mrf.mxu0 }
  0xee   : > { %v1773_v49 = vpop.f32.mrf.mxu1 }
  0xef   : > { %v706_v50 = vpop.f32.mrf.mxu0  ;;  %v852_v63 = vadd.f32 %v1773_v49, %v1749_v48 }
  0xf0   : > { %v843_v51 = vpop.f32.mrf.mxu1 }
  0xf1   : > { %v1750_v52 = vpop.f32.mrf.mxu0  ;;  %v844_v2 = vadd.f32 %v843_v51, %v706_v50 }
  0xf2   : > { %v1774_v53 = vpop.f32.mrf.mxu1 }
  0xf3   : > { %v709_v54 = vpop.f32.mrf.mxu0  ;;  %v855_v7 = vadd.f32 %v1774_v53, %v1750_v52 }
  0xf4   : > { %v846_v55 = vpop.f32.mrf.mxu1 }
  0xf5   : > { %v1753_v56 = vpop.f32.mrf.mxu0  ;;  %v847_v16 = vadd.f32 %v846_v55, %v709_v54 }
  0xf6   : > { %v1777_v57 = vpop.f32.mrf.mxu1 }
  0xf7   : > { %v722_v58 = vpop.f32.mrf.mxu0  ;;  %v868_v20 = vadd.f32 %v1777_v57, %v1753_v56 }
  0xf8   : > { %v859_v59 = vpop.f32.mrf.mxu1 }
  0xf9   : > { %v1754_v60 = vpop.f32.mrf.mxu0  ;;  %v860_v25 = vadd.f32 %v859_v59, %v722_v58 }
  0xfa   : > { %v1778_v61 = vpop.f32.mrf.mxu1 }
  0xfb   : > { %v725_v62 = vpop.f32.mrf.mxu0  ;;  %v871_v28 = vadd.f32 %v1778_v61, %v1754_v60 }
  0xfc   : > { %v862_v0 = vpop.f32.mrf.mxu1 }
  0xfd   : > { %v863_v32 = vadd.f32 %v862_v0, %v725_v62 }
 0x10d   : > { %v1797_v1 = vpop.f32.mrf.mxu0 }
 0x10e   : > { %v1037_v3 = vadd.f32 %v1797_v1, %v852_v63  ;;  %v1821_v4 = vpop.f32.mrf.mxu1 }
 0x10f   : > { %v1004_v6 = vpop.f32.mrf.mxu0 }
 0x110   : > { %v1206_v8 = vadd.f32 %v1821_v4, %v1037_v3  ;;  %v1035_v9 = vadd.f32 %v1004_v6, %v844_v2  ;;  %v1173_v10 = vpop.f32.mrf.mxu1 }
 0x111   : > { %v1798_v11 = vpop.f32.mrf.mxu0 }
 0x112   : > { %v1221_v12 = vadd.f32 %v2145_v5, %v1206_v8  ;;  %v1204_v13 = vadd.f32 %v1173_v10, %v1035_v9  ;;  %v1038_v14 = vadd.f32 %v1798_v11, %v855_v7  ;;  %v1822_v15 = vpop.f32.mrf.mxu1 }
 0x113   : > { %v1007_v17 = vpop.f32.mrf.mxu0 }
 0x114   : > { %v1207_v18 = vadd.f32 %v1822_v15, %v1038_v14  ;;  %v1176_v19 = vpop.f32.mrf.mxu1  ;;  %v1237_v21 = vmul.f32 0.01, %v1221_v12  ;;  %v1219_v22 = vadd.f32 %v2145_v5, %v1204_v13  ;;  %v1036_v23 = vadd.f32 %v1007_v17, %v847_v16 }
 0x115   : > { %v1801_v24 = vpop.f32.mrf.mxu0  ;;  %vm1229_vm0 = vcmp.ge.f32.partialorder %v1221_v12, 0.0 }
 0x116   : > { %v1222_v26 = vadd.f32 %v2145_v5, %v1207_v18  ;;  %v1825_v27 = vpop.f32.mrf.mxu1  ;;  %v1205_v29 = vadd.f32 %v1176_v19, %v1036_v23  ;;  %v1041_v30 = vadd.f32 %v1801_v24, %v868_v20  ;;  %v1245_v36 = vsel %vm1229_vm0, %v1221_v12, %v1237_v21 }
 0x117   : > { %v1020_v31 = vpop.f32.mrf.mxu0  ;;  %v1235_v37 = vmul.f32 0.01, %v1219_v22  ;;  %vm1227_vm2 = vcmp.ge.f32.partialorder %v1219_v22, 0.0 }
 0x118   : > { %vm1230_vm1 = vcmp.ge.f32.partialorder %v1222_v26, 0.0  ;;  %v1238_v33 = vmul.f32 0.01, %v1222_v26  ;;  %v1039_v34 = vadd.f32 %v1020_v31, %v860_v25  ;;  %v1189_v35 = vpop.f32.mrf.mxu1  ;;  %v1220_v38 = vadd.f32 %v2145_v5, %v1205_v29 }
 0x119   : > { %v1210_v39 = vadd.f32 %v1825_v27, %v1041_v30  ;;  %v1802_v40 = vpop.f32.mrf.mxu0  ;;  %v1243_v52 = vsel %vm1227_vm2, %v1219_v22, %v1235_v37 }
 0x11a   : > { %v1246_v41 = vsel %vm1230_vm1, %v1222_v26, %v1238_v33  ;;  %v1208_v42 = vadd.f32 %v1189_v35, %v1039_v34  ;;  %v1042_v43 = vadd.f32 %v1802_v40, %v871_v28  ;;  %v1826_v44 = vpop.f32.mrf.mxu1  ;;  %vm1228_vm3 = vcmp.ge.f32.partialorder %v1220_v38, 0.0 }
 0x11b   : > { %v1668_v45 = vpack.c.bf16 %v1246_v41, %v1245_v36  ;;  %v1236_v46 = vmul.f32 0.01, %v1220_v38  ;;  %v1225_v47 = vadd.f32 %v2145_v5, %v1210_v39  ;;  %v1023_v48 = vpop.f32.mrf.mxu0 }
 0x11c   : > { %v1223_v49 = vadd.f32 %v2145_v5, %v1208_v42  ;;  %v1211_v50 = vadd.f32 %v1826_v44, %v1042_v43  ;;  %v1040_v51 = vadd.f32 %v1023_v48, %v863_v32  ;;  %v1192_v57 = vpop.f32.mrf.mxu1 }
 0x11d   : > { %1680 = vst [vmem:[%s2155_s16 + $0x8] sm:$0xff] %v1668_v45   ;;  %v1244_v53 = vsel %vm1228_vm3, %v1220_v38, %v1236_v46  ;;  %v1241_v56 = vmul.f32 0.01, %v1225_v47  ;;  %vm1233_vm4 = vcmp.ge.f32.partialorder %v1225_v47, 0.0 }
 0x11e   : > { %v1663_v54 = vpack.c.bf16 %v1244_v53, %v1243_v52  ;;  %v1347_v55 = vadd.f32 %v1244_v53, %v1243_v52  ;;  %v1239_v58 = vmul.f32 0.01, %v1223_v49  ;;  %v1226_v59 = vadd.f32 %v2145_v5, %v1211_v50 }
 0x11f   : > { %v1209_v60 = vadd.f32 %v1192_v57, %v1040_v51  ;;  %vm1231_vm5 = vcmp.ge.f32.partialorder %v1223_v49, 0.0  ;;  %v1249_v0 = vsel %vm1233_vm4, %v1225_v47, %v1241_v56 }
 0x120   : > { %1664 = vst [vmem:[%s2155_s16] sm:$0xff] %v1663_v54   ;;  %v1348_v61 = vadd.f32 %v1347_v55, %v1245_v36  ;;  %vm1234_vm6 = vcmp.ge.f32.partialorder %v1226_v59, 0.0  ;;  %v1242_v62 = vmul.f32 0.01, %v1226_v59  ;;  %v1247_v2 = vsel %vm1231_vm5, %v1223_v49, %v1239_v58 }
 0x121   : > { %v1224_v63 = vadd.f32 %v2145_v5, %v1209_v60  ;;  %v1328_v9 = vmax.f32 %v1245_v36, %v1249_v0  ;;  %v1326_v11 = vmax.f32 %v1243_v52, %v1247_v2 }
 0x122   : > { %v1349_v1 = vadd.f32 %v1348_v61, %v1246_v41  ;;  %v1250_v3 = vsel %vm1234_vm6, %v1226_v59, %v1242_v62 }
 0x123   : > { %vm1232_vm7 = vcmp.ge.f32.partialorder %v1224_v63, 0.0  ;;  %v1240_v4 = vmul.f32 0.01, %v1224_v63  ;;  %v1678_v7 = vpack.c.bf16 %v1250_v3, %v1249_v0  ;;  %v1329_v8 = vmax.f32 %v1246_v41, %v1250_v3 }
 0x124   : > { %v1350_v6 = vadd.f32 %v1349_v1, %v1247_v2 }
 0x125   : > { %v1248_v10 = vsel %vm1232_vm7, %v1224_v63, %v1240_v4  ;;  %1682 = vst [vmem:[%s2155_s16 + $0x18] sm:$0xff] %v1678_v7   ;;  %v1331_v15 = vmax.f32 %v1328_v9, %v1329_v8 }
 0x126   : > { %v1673_v12 = vpack.c.bf16 %v1248_v10, %v1247_v2  ;;  %v1327_v13 = vmax.f32 %v1244_v53, %v1248_v10  ;;  %v1351_v14 = vadd.f32 %v1350_v6, %v1248_v10 }
 0x128   : > { %1681 = vst [vmem:[%s2155_s16 + $0x10] sm:$0xff] %v1673_v12   ;;  %v1330_v5 = vmax.f32 %v1326_v11, %v1327_v13  ;;  %v1352_v16 = vadd.f32 %v1351_v14, %v1249_v0 }
 0x12a   : > { %v1332_v17 = vmax.f32 %v1330_v5, %v1331_v15  ;;  %v1353_v18 = vadd.f32 %v1352_v16, %v1250_v3 }
 0x12c   : > { %v1333_v19 = vrot.slane %v1332_v17, 4  ;;  %v1354_v20 = vrot.slane %v1353_v18, 4 }
 0x12e   : > { %v1334_v21 = vmax.f32 %v1332_v17, %v1333_v19  ;;  %v1355_v22 = vadd.f32 %v1354_v20, %v1353_v18 }
 0x130   : > { %v1335_v23 = vrot.slane %v1334_v21, 2  ;;  %v1356_v24 = vrot.slane %v1355_v22, 2 }
 0x132   : > { %v1336_v25 = vmax.f32 %v1334_v21, %v1335_v23  ;;  %v1357_v26 = vadd.f32 %v1356_v24, %v1355_v22 }
 0x134   : > { %v1337_v27 = vrot.slane %v1336_v25, 1  ;;  %v1358_v28 = vrot.slane %v1357_v26, 1 }
 0x136   : > { %v1338_v29 = vmax.f32 %v1336_v25, %v1337_v27  ;;  %v1359_v30 = vadd.f32 %v1358_v28, %v1357_v26 }
 0x138   : > { %1364 = vst [vmem:[%s547_s24] sm:$0x1] %v1338_v29  ;;  %1365 = vst [vmem:[%s550_s28] sm:$0x1] %v1359_v30 }
 0x13f   : > { %v1379_v31 = vld [vmem:[%s550_s28] sm:$0x1] }
 0x140   : > { %v1380_v32 = vmul.f32 0.015625, %v1379_v31 }
 0x142   : > { %1381 = vst [vmem:[%s550_s28] sm:$0x1] %v1380_v32 }
 0x143 PF: > { %s22_s19 = sadd.s32 1, %s1921_s19   ;;  %s2194_s17 = smov %s1917_s18 }
 0x144   : > { %p19_p5 = scmp.ge.s32.totalorder %s22_s19, 4   ;;  %s2195_s18 = smov %s2197_s20 }
 0x146   :  { %21 = sbr.rel (!%p19_p5) target bundleno = 2 (0x2), region = 131 }

// kernel: pct_segmentation_forward.17
= control target key start
LH: loop header
LB: loop body
LE: loop exit
PB: predicated region body
PF: predicated region fallthrough
CT: control target
= control target key end

     0   :  { %s1217_s24 = smov 0   ;;  %s1219_s25 = smov 0   ;;  %s1354_s0 = inlined_call_operand.vmem [shape: bf16[2,64,128], index: 0, kind: input, shape index: {}]   ;;  %s1355_s1 = inlined_call_operand.vmem [shape: f32[2,1,128], index: 1, kind: input, shape index: {}]   ;;  %s1356_s2 = inlined_call_operand.vmem [shape: bf16[128,128], index: 2, kind: input, shape index: {}]   ;;  %s1357_s3 = inlined_call_operand.vmem [shape: bf16[128,128], index: 3, kind: input, shape index: {}]   ;;  %s1358_s4 = inlined_call_operand.vmem [shape: f32[1,128], index: 4, kind: input, shape index: {}]   ;;  %s1359_s5 = inlined_call_operand.vmem [shape: bf16[128,128], index: 5, kind: input, shape index: {}]   ;;  %s1360_s6 = inlined_call_operand.vmem [shape: f32[1,128], index: 6, kind: input, shape index: {}]   ;;  %s1361_s7 = inlined_call_operand.vmem [shape: f32[2,64,128], index: 7, kind: output, shape index: {}]  }
   0x1   :  { %s1221_s26 = smov 0  }
   0x2 LB: > { %s29_s27 = sadd.s32 1, %s1171_s25  ;;  %p937_p0 = scmp.ge.s32.totalorder %s1175_s26, 1  ;;  %s1175_s26 = sphi %s1221_s26, %s17_s26   ;;  %s1171_s25 = sphi %s1219_s25, %s1363_s25   ;;  %s1167_s24 = sphi %s1217_s24, %s1362_s24  }
   0x3   : > { %p31_p1 = scmp.ge.s32.totalorder %s29_s27, 2  ;;  %p266_p2 = scmp.lt.s32.totalorder %s1175_s26, 3 }
   0x5   : > { %s1365_s27 = smov (%p31_p1, %s29_s27), 0  ;;  %p267_p3 = pnand %p937_p0, %p266_p2 }
   0x6   : > { %p310_p4 = scmp.lt.s32.totalorder (!%p267_p3), %s1167_s24, 1 }
   0x7   : > { %270 = sbr.rel (%p267_p3) target bundleno = 669 (0x29d), region = 48 }
   0xc   : > { %v1125_v0 = vld [vmem:[%s1356_s2 + $0x38] sm:$0xff]   ;;  %v1126_v1 = vld [vmem:[%s1356_s2 + $0x30] sm:$0xff]   ;;  %s1367_s24 = smov (!%p310_p4, %s1167_s24), 1  ;;  %v1127_v2 = vld [vmem:[%s1356_s2 + $0x28] sm:$0xff]  }
   0xd   : > { %1013 = vmatprep.subr.bf16.mxu0 %v1125_v0  ;;  %s975_s11 = sshll.u32 %s1367_s24, 5  ;;  %v1128_v3 = vld [vmem:[%s1356_s2 + $0x20] sm:$0xff]   ;;  %v1129_v5 = vld [vmem:[%s1356_s2 + $0x18] sm:$0xff]   ;;  %v1138_v7 = vld [vmem:[%s1357_s3 + $0x30] sm:$0xff]   ;;  %s321_s16 = scalar_lea.vmem %s1355_s1, %s1367_s24 }
   0xe   : > { %1014 = vmatpush3.bf16.msra.mxu0 %v1125_v0  ;;  %s1250_s14 = scalar_lea.vmem %s1354_s0, %s975_s11  ;;  %v1137_v6 = vld [vmem:[%s1357_s3 + $0x38] sm:$0xff]   ;;  %v1130_v8 = vld [vmem:[%s1356_s2 + $0x10] sm:$0xff]   ;;  %v1139_v9 = vld [vmem:[%s1357_s3 + $0x28] sm:$0xff]   ;;  %s976_s28 = sshll.u32 %s1367_s24, 6 }
   0xf   : > { %1015 = vmatprep.subr.bf16.mxu0 %v1126_v1  ;;  %v1133_v4 = vld [vmem:[%s1250_s14] sm:$0xff]   ;;  %1037 = vmatprep.subr.bf16.mxu1 %v1137_v6  ;;  %v1131_v10 = vld [vmem:[%s1356_s2 + $0x8] sm:$0xff]   ;;  %v1141_v13 = vld [vmem:[%s1357_s3 + $0x18] sm:$0xff]   ;;  %s330_s10 = scalar_lea.vmem %s1361_s7, %s976_s28 }
  0x10   : > { %1029 = vmatprep.mubr.bf16.mxu0 %v1133_v4  ;;  %1038 = vmatpush3.bf16.msra.mxu1 %v1137_v6  ;;  %v1140_v11 = vld [vmem:[%s1357_s3 + $0x20] sm:$0xff]   ;;  %v1134_v14 = vld [vmem:[%s1250_s14 + $0x8] sm:$0xff]   ;;  %v1135_v15 = vld [vmem:[%s1250_s14 + $0x10] sm:$0xff]  }
  0x11   : > { %1039 = vmatprep.subr.bf16.mxu1 %v1138_v7  ;;  %v1132_v12 = vld [vmem:[%s1356_s2] sm:$0xff]   ;;  %v1136_v16 = vld [vmem:[%s1250_s14 + $0x18] sm:$0xff]   ;;  %v1142_v17 = vld [vmem:[%s1357_s3 + $0x10] sm:$0xff]  }
  0x12   : > { %1016 = vmatpush3.bf16.msra.mxu0 %v1126_v1  ;;  %v1143_v18 = vld [vmem:[%s1357_s3 + $0x8] sm:$0xff]   ;;  %v1144_v19 = vld [vmem:[%s1357_s3] sm:$0xff]   ;;  %v1145_v20 = vld [vmem:[%s1359_s5 + $0x38] sm:$0xff]  }
  0x13   : > { %1017 = vmatprep.subr.bf16.mxu0 %v1127_v2  ;;  %v1301_v21 = vld [vmem:[%s1359_s5 + $0x30] sm:$0xff]   ;;  %v1307_v22 = vld [vmem:[%s1359_s5 + $0x28] sm:$0xff]   ;;  %v1148_v23 = vld [vmem:[%s1359_s5 + $0x20] sm:$0xff]  }
  0x14   : > { %1040 = vmatpush3.bf16.msra.mxu1 %v1138_v7  ;;  %v1149_v24 = vld [vmem:[%s1359_s5 + $0x18] sm:$0xff]   ;;  %v942_v26 = vld [vmem:[%s321_s16] ss:$0 sm:$0xff]  ;;  %v1150_v62 = vld [vmem:[%s1359_s5 + $0x10] sm:$0xff]  }
  0x15   : > { %1041 = vmatprep.subr.bf16.mxu1 %v1139_v9  ;;  %v1151_v63 = vld [vmem:[%s1359_s5 + $0x8] sm:$0xff]   ;;  %v1152_v0 = vld [vmem:[%s1359_s5] sm:$0xff]  }
  0x16   : > { %1018 = vmatpush3.bf16.msra.mxu0 %v1127_v2  ;;  %v955_v2 = vld [vmem:[%s1358_s4] ss:$0 sm:$0xff] }
  0x17   : > { %1019 = vmatprep.subr.bf16.mxu0 %v1128_v3 }
  0x18   : > { %1042 = vmatpush3.bf16.msra.mxu1 %v1139_v9 }
  0x19   : > { %1043 = vmatprep.subr.bf16.mxu1 %v1140_v11 }
  0x1a   : > { %1020 = vmatpush3.bf16.msra.mxu0 %v1128_v3 }
  0x1b   : > { %1021 = vmatprep.subr.bf16.mxu0 %v1129_v5 }
  0x1c   : > { %1044 = vmatpush3.bf16.msra.mxu1 %v1140_v11 }
  0x1d   : > { %1045 = vmatprep.subr.bf16.mxu1 %v1141_v13 }
  0x1e   : > { %1022 = vmatpush3.bf16.msra.mxu0 %v1129_v5 }
  0x1f   : > { %1023 = vmatprep.subr.bf16.mxu0 %v1130_v8 }
  0x20   : > { %1046 = vmatpush3.bf16.msra.mxu1 %v1141_v13 }
  0x21   : > { %1047 = vmatprep.subr.bf16.mxu1 %v1142_v17 }
  0x22   : > { %1024 = vmatpush3.bf16.msra.mxu0 %v1130_v8 }
  0x23   : > { %1025 = vmatprep.subr.bf16.mxu0 %v1131_v10 }
  0x24   : > { %1048 = vmatpush3.bf16.msra.mxu1 %v1142_v17 }
  0x25   : > { %1049 = vmatprep.subr.bf16.mxu1 %v1143_v18 }
  0x26   : > { %1026 = vmatpush3.bf16.msra.mxu0 %v1131_v10 }
  0x27   : > { %1027 = vmatprep.subr.bf16.mxu0 %v1132_v12 }
  0x28   : > { %1050 = vmatpush3.bf16.msra.mxu1 %v1143_v18 }
  0x29   : > { %1051 = vmatprep.subr.bf16.mxu1 %v1144_v19 }
  0x2a   : > { %1028 = vmatpush3.bf16.msra.mxu0 %v1132_v12 }
  0x2b   : > { %1061 = vmatprep.subr.bf16.mxu0 %v1145_v20 }
  0x2c   : > { %1052 = vmatpush3.bf16.msra.mxu1 %v1144_v19 }
  0x2d   : > { %1030 = vmatmul.mubr.bf16.vlgmr.msra.gmra.mxu0 %v1134_v14  ;;  %1085 = vmatprep.subr.bf16.mxu1 %v1145_v20 }
  0x2e   : > { %1033 = vmatprep.mubr.bf16.mxu0 %v1135_v15  ;;  %1062 = vmatpush3.bf16.msra.mxu0 %v1145_v20 }
  0x2f   : > { %1063 = vmatprep.subr.bf16.mxu0 %v1301_v21 }
  0x32   : > { %1064 = vmatpush3.bf16.msra.mxu0 %v1301_v21 }
  0x33   : > { %1065 = vmatprep.subr.bf16.mxu0 %v1307_v22 }
  0x35   : > { %1034 = vmatmul.mubr.bf16.gmra.mxu0 %v1136_v16 }
  0x36   : > { %1066 = vmatpush3.bf16.msra.mxu0 %v1307_v22 }
  0x37   : > { %1067 = vmatprep.subr.bf16.mxu0 %v1148_v23 }
  0x3a   : > { %1068 = vmatpush3.bf16.msra.mxu0 %v1148_v23 }
  0x3b   : > { %1069 = vmatprep.subr.bf16.mxu0 %v1149_v24 }
  0x3e   : > { %1070 = vmatpush3.bf16.msra.mxu0 %v1149_v24 }
  0x3f   : > { %1071 = vmatprep.subr.bf16.mxu0 %v1150_v62 }
  0x42   : > { %1072 = vmatpush3.bf16.msra.mxu0 %v1150_v62 }
  0x43   : > { %1073 = vmatprep.subr.bf16.mxu0 %v1151_v63 }
  0x46   : > { %1074 = vmatpush3.bf16.msra.mxu0 %v1151_v63 }
  0x47   : > { %1075 = vmatprep.subr.bf16.mxu0 %v1152_v0 }
  0x4a   : > { %1076 = vmatpush3.bf16.msra.mxu0 %v1152_v0 }
  0xed   : > { %v1031_v25 = vpop.f32.mrf.mxu0 }
  0xee   : > { %v479_v29 = vadd.f32 %v1031_v25, %v942_v26 }
  0xef   : > { %v470_v27 = vpop.f32.mrf.mxu0 }
  0xf0   : > { %v471_v28 = vadd.f32 %v942_v26, %v470_v27  ;;  %v511_v36 = vmul.f32 0.01, %v479_v29  ;;  %vm503_vm2 = vcmp.ge.f32.partialorder %v479_v29, 0.0 }
  0xf1   : > { %v1032_v30 = vpop.f32.mrf.mxu0 }
  0xf2   : > { %v482_v31 = vadd.f32 %v1032_v30, %v942_v26  ;;  %v509_v33 = vmul.f32 0.01, %v471_v28  ;;  %vm501_vm1 = vcmp.ge.f32.partialorder %v471_v28, 0.0  ;;  %v519_v47 = vsel %vm503_vm2, %v479_v29, %v511_v36 }
  0xf3   : > { %v473_v32 = vpop.f32.mrf.mxu0 }
  0xf4   : > { %vm504_vm0 = vcmp.ge.f32.partialorder %v482_v31, 0.0  ;;  %v512_v34 = vmul.f32 0.01, %v482_v31  ;;  %v474_v35 = vadd.f32 %v942_v26, %v473_v32  ;;  %v517_v42 = vsel %vm501_vm1, %v471_v28, %v509_v33 }
  0xf5   : > { %v1035_v37 = vpop.f32.mrf.mxu0 }
  0xf6   : > { %v510_v38 = vmul.f32 0.01, %v474_v35  ;;  %vm502_vm3 = vcmp.ge.f32.partialorder %v474_v35, 0.0  ;;  %v520_v40 = vsel %vm504_vm0, %v482_v31, %v512_v34  ;;  %v495_v44 = vadd.f32 %v1035_v37, %v942_v26 }
  0xf7   : > { %v486_v39 = vpop.f32.mrf.mxu0  ;;  %v526_v49 = vpack.c.bf16 %v520_v40, %v519_v47 }
  0xf8   : > { %v487_v41 = vadd.f32 %v942_v26, %v486_v39  ;;  %v518_v43 = vsel %vm502_vm3, %v474_v35, %v510_v38  ;;  %v515_v54 = vmul.f32 0.01, %v495_v44  ;;  %vm507_vm6 = vcmp.ge.f32.partialorder %v495_v44, 0.0  ;;  %v964_v38 = vld [vmem:[%s1360_s6] ss:$0 sm:$0xff] }
  0xf9   : > { %v1036_v45 = vpop.f32.mrf.mxu0  ;;  %v525_v46 = vpack.c.bf16 %v518_v43, %v517_v42 }
  0xfa   : > { %v498_v48 = vadd.f32 %v1036_v45, %v942_v26  ;;  %v513_v51 = vmul.f32 0.01, %v487_v41  ;;  %vm505_vm5 = vcmp.ge.f32.partialorder %v487_v41, 0.0  ;;  %v523_v60 = vsel %vm507_vm6, %v495_v44, %v515_v54 }
  0xfb   : > { %v489_v50 = vpop.f32.mrf.mxu0  ;;  %1053 = vmatprep.mubr.bf16.mxu1 %v525_v46 }
  0xfc   : > { %vm508_vm4 = vcmp.ge.f32.partialorder %v498_v48, 0.0  ;;  %v516_v52 = vmul.f32 0.01, %v498_v48  ;;  %v490_v53 = vadd.f32 %v942_v26, %v489_v50  ;;  %1054 = vmatmul.mubr.bf16.vlgmr.msra.gmra.mxu1 %v526_v49  ;;  %v521_v57 = vsel %vm505_vm5, %v487_v41, %v513_v51 }
  0xfd   : > { %1093 = vmatpush3.bf16.msra.mxu1 %v1145_v20 }
  0xfe   : > { %vm506_vm7 = vcmp.ge.f32.partialorder %v490_v53, 0.0  ;;  %v514_v55 = vmul.f32 0.01, %v490_v53  ;;  %1086 = vmatprep.subr.bf16.mxu1 %v1301_v21  ;;  %v524_v56 = vsel %vm508_vm4, %v498_v48, %v516_v52 }
  0xff   : > { %v528_v61 = vpack.c.bf16 %v524_v56, %v523_v60 }
 0x100   : > { %v522_v58 = vsel %vm506_vm7, %v490_v53, %v514_v55 }
 0x101   : > { %v527_v59 = vpack.c.bf16 %v522_v58, %v521_v57  ;;  %1094 = vmatpush3.bf16.msra.mxu1 %v1301_v21 }
 0x102   : > { %1087 = vmatprep.subr.bf16.mxu1 %v1307_v22 }
 0x103   : > { %1057 = vmatprep.mubr.bf16.mxu1 %v527_v59 }
 0x104   : > { %1058 = vmatmul.mubr.bf16.gmra.mxu1 %v528_v61 }
 0x105   : > { %1095 = vmatpush3.bf16.msra.mxu1 %v1307_v22 }
 0x106   : > { %1088 = vmatprep.subr.bf16.mxu1 %v1148_v23 }
 0x109   : > { %1096 = vmatpush3.bf16.msra.mxu1 %v1148_v23 }
 0x10a   : > { %1089 = vmatprep.subr.bf16.mxu1 %v1149_v24 }
 0x10d   : > { %1097 = vmatpush3.bf16.msra.mxu1 %v1149_v24 }
 0x10e   : > { %1090 = vmatprep.subr.bf16.mxu1 %v1150_v62 }
 0x111   : > { %1098 = vmatpush3.bf16.msra.mxu1 %v1150_v62 }
 0x112   : > { %1091 = vmatprep.subr.bf16.mxu1 %v1151_v63 }
 0x115   : > { %1099 = vmatpush3.bf16.msra.mxu1 %v1151_v63 }
 0x116   : > { %1092 = vmatprep.subr.bf16.mxu1 %v1152_v0 }
 0x119   : > { %1100 = vmatpush3.bf16.msra.mxu1 %v1152_v0 }
 0x1bc   : > { %v1055_v1 = vpop.f32.mrf.mxu1 }
 0x1bd   : > { %v643_v5 = vadd.f32 %v1055_v1, %v955_v2 }
 0x1be   : > { %v634_v3 = vpop.f32.mrf.mxu1 }
 0x1bf   : > { %v635_v4 = vadd.f32 %v955_v2, %v634_v3  ;;  %v675_v12 = vmul.f32 0.01, %v643_v5  ;;  %vm667_vm10 = vcmp.ge.f32.partialorder %v643_v5, 0.0 }
 0x1c0   : > { %v1056_v6 = vpop.f32.mrf.mxu1 }
 0x1c1   : > { %v646_v7 = vadd.f32 %v1056_v6, %v955_v2  ;;  %v673_v9 = vmul.f32 0.01, %v635_v4  ;;  %vm665_vm9 = vcmp.ge.f32.partialorder %v635_v4, 0.0  ;;  %v683_v20 = vsel %vm667_vm10, %v643_v5, %v675_v12 }
 0x1c2   : > { %v637_v8 = vpop.f32.mrf.mxu1 }
 0x1c3   : > { %vm668_vm8 = vcmp.ge.f32.partialorder %v646_v7, 0.0  ;;  %v676_v10 = vmul.f32 0.01, %v646_v7  ;;  %v638_v11 = vadd.f32 %v955_v2, %v637_v8  ;;  %v681_v18 = vsel %vm665_vm9, %v635_v4, %v673_v9 }
 0x1c4   : > { %v1059_v13 = vpop.f32.mrf.mxu1 }
 0x1c5   : > { %vm666_vm11 = vcmp.ge.f32.partialorder %v638_v11, 0.0  ;;  %v674_v14 = vmul.f32 0.01, %v638_v11  ;;  %v684_v15 = vsel %vm668_vm8, %v646_v7, %v676_v10  ;;  %v659_v21 = vadd.f32 %v1059_v13, %v955_v2 }
 0x1c6   : > { %v650_v16 = vpop.f32.mrf.mxu1  ;;  %v690_v24 = vpack.c.bf16 %v684_v15, %v683_v20 }
 0x1c7   : > { %v651_v17 = vadd.f32 %v955_v2, %v650_v16  ;;  %v682_v19 = vsel %vm666_vm11, %v638_v11, %v674_v14  ;;  %v679_v30 = vmul.f32 0.01, %v659_v21  ;;  %vm671_vm14 = vcmp.ge.f32.partialorder %v659_v21, 0.0 }
 0x1c8   : > { %v1060_v22 = vpop.f32.mrf.mxu1  ;;  %v689_v23 = vpack.c.bf16 %v682_v19, %v681_v18 }
 0x1c9   : > { %v662_v25 = vadd.f32 %v1060_v22, %v955_v2  ;;  %v677_v27 = vmul.f32 0.01, %v651_v17  ;;  %vm669_vm13 = vcmp.ge.f32.partialorder %v651_v17, 0.0  ;;  %v687_v35 = vsel %vm671_vm14, %v659_v21, %v679_v30 }
 0x1ca   : > { %v653_v26 = vpop.f32.mrf.mxu1  ;;  %1077 = vmatprep.mubr.bf16.mxu0 %v689_v23 }
 0x1cb   : > { %vm672_vm12 = vcmp.ge.f32.partialorder %v662_v25, 0.0  ;;  %v680_v28 = vmul.f32 0.01, %v662_v25  ;;  %v654_v29 = vadd.f32 %v955_v2, %v653_v26  ;;  %1078 = vmatmul.mubr.bf16.vlgmr.msra.gmra.mxu0 %v690_v24  ;;  %v685_v33 = vsel %vm669_vm13, %v651_v17, %v677_v27 }
 0x1cd   : > { %vm670_vm15 = vcmp.ge.f32.partialorder %v654_v29, 0.0  ;;  %v678_v31 = vmul.f32 0.01, %v654_v29  ;;  %v688_v32 = vsel %vm672_vm12, %v662_v25, %v680_v28 }
 0x1ce   : > { %v692_v37 = vpack.c.bf16 %v688_v32, %v687_v35 }
 0x1cf   : > { %v686_v34 = vsel %vm670_vm15, %v654_v29, %v678_v31 }
 0x1d0   : > { %v691_v36 = vpack.c.bf16 %v686_v34, %v685_v33 }
 0x1d2   : > { %1081 = vmatprep.mubr.bf16.mxu1 %v691_v36 }
 0x1d3   : > { %1082 = vmatmul.mubr.bf16.vlgmr.msra.gmra.mxu1 %v692_v37 }
 0x28b   : > { %v1079_v39 = vpop.f32.mrf.mxu0 }
 0x28c   : > { %v807_v40 = vadd.f32 %v1079_v39, %v964_v38 }
 0x28d   : > { %v798_v41 = vpop.f32.mrf.mxu0 }
 0x28e   : > { %831 = vst [vmem:[%s330_s10 + $0x10] sm:$0xff] %v807_v40  ;;  %v799_v42 = vadd.f32 %v964_v38, %v798_v41 }
 0x28f   : > { %v1080_v43 = vpop.f32.mrf.mxu0 }
 0x290   : > { %829 = vst [vmem:[%s330_s10] sm:$0xff] %v799_v42  ;;  %v810_v44 = vadd.f32 %v1080_v43, %v964_v38 }
 0x291   : > { %v801_v45 = vpop.f32.mrf.mxu0 }
 0x292   : > { %832 = vst [vmem:[%s330_s10 + $0x18] sm:$0xff] %v810_v44  ;;  %v802_v46 = vadd.f32 %v964_v38, %v801_v45 }
 0x293   : > { %v1083_v47 = vpop.f32.mrf.mxu1 }
 0x294   : > { %830 = vst [vmem:[%s330_s10 + $0x8] sm:$0xff] %v802_v46  ;;  %v823_v48 = vadd.f32 %v1083_v47, %v964_v38 }
 0x295   : > { %v814_v49 = vpop.f32.mrf.mxu1 }
 0x296   : > { %835 = vst [vmem:[%s330_s10 + $0x30] sm:$0xff] %v823_v48  ;;  %v815_v50 = vadd.f32 %v964_v38, %v814_v49 }
 0x297   : > { %v1084_v51 = vpop.f32.mrf.mxu1 }
 0x298   : > { %833 = vst [vmem:[%s330_s10 + $0x20] sm:$0xff] %v815_v50  ;;  %v826_v52 = vadd.f32 %v1084_v51, %v964_v38 }
 0x299   : > { %v817_v53 = vpop.f32.mrf.mxu1 }
 0x29a   : > { %836 = vst [vmem:[%s330_s10 + $0x38] sm:$0xff] %v826_v52  ;;  %v818_v54 = vadd.f32 %v964_v38, %v817_v53 }
 0x29c   : > { %834 = vst [vmem:[%s330_s10 + $0x28] sm:$0xff] %v818_v54 }
 0x29d PF: > { %s17_s26 = sadd.s32 1, %s1175_s26   ;;  %s1362_s24 = smov %s1171_s25 }
 0x29e   : > { %p14_p5 = scmp.ge.s32.totalorder %s17_s26, 4   ;;  %s1363_s25 = smov %s1365_s27 }
 0x2a0   :  { %16 = sbr.rel (!%p14_p5) target bundleno = 2 (0x2), region = 81 }

</bundles_post_ra>
